<compile_context>
chip_gen: v5e
topology: v5e:2x2
jax: 0.10.0
libtpu: 0.0.40
codegen_flags: <defaults>
</compile_context>

<pallas_src>
import functools

import numpy as np
import jax
import jax.numpy as jnp
from jax.experimental import pallas as pl
from jax.experimental.pallas import tpu as pltpu


# =============================================================================
# VMEM limit per TPU generation
# =============================================================================

@functools.lru_cache(maxsize=1)
def _vmem_limit_bytes():
    """~3/4 of physical VMEM, capped at 100 MiB (96 MiB on v5e/v6e, 48 MiB on v7x)."""
    try:
        cap = int(pltpu.get_tpu_info().vmem_capacity_bytes)
    except Exception:
        cap = 64 * 1024 * 1024                      # safe fallback for any generation
    return max(32 * 1024 * 1024, min(100 * 1024 * 1024, (cap * 3) // 4))


# =============================================================================
# The fused conv kernel: im2col-in-VMEM + ONE MXU matmul + fused epilogue
# =============================================================================

def _conv_kernel(*refs, taps, cin, tm, relu, has_halo, has_res, has_proj, use_scratch):
    """One output row-tile of the flattened, spatially padded frame.

    refs = x_tile, [halo_tile], w, scale, shift, [residual], [proj_w, proj_b], out,
           [im2col VMEM scratch (tm, ntaps*cin)]
    """
    i = 0
    x_ref = refs[i]; i += 1
    h_ref = None
    if has_halo:
        h_ref = refs[i]; i += 1
    w_ref, s_ref, b_ref = refs[i], refs[i + 1], refs[i + 2]; i += 3
    res_ref = None
    if has_res:
        res_ref = refs[i]; i += 1
    pw_ref = pb_ref = None
    if has_proj:
        pw_ref, pb_ref = refs[i], refs[i + 1]; i += 2
    o_ref = refs[i]; i += 1
    xs_ref = refs[i] if use_scratch else None

    ntaps = len(taps)
    if ntaps == 1:
        a = x_ref[...]                               # 1x1 conv: operand is the tile itself
    else:
        # Build the (tm, ntaps*cin) im2col operand.  The in-tile part of every tap is read
        # straight from x_ref; only the boundary-crossing tail comes from the halo tile
        # (no redundant main-tile staging copy).
        cols = []
        for t, off in enumerate(taps):               # static, unrolled
            pieces = []
            if off < tm:
                pieces.append(x_ref[off:tm, :])
            if off > 0:
                pieces.append(h_ref[0:off, :])
            col = pieces[0] if len(pieces) == 1 else jnp.concatenate(pieces, axis=0)
            if use_scratch:                          # lane-aligned chunk store (cin % 128 == 0)
                xs_ref[:, t * cin:(t + 1) * cin] = col
            else:                                    # tiny K (conv1): keep it in vregs
                cols.append(col)
        a = xs_ref[...] if use_scratch else jnp.concatenate(cols, axis=1)

    # ONE matmul with the full concatenated K -> accumulation stays inside the MXU.
    y = jnp.dot(a, w_ref[...], preferred_element_type=jnp.float32)

    y = y * s_ref[...] + b_ref[...]                  # folded BN / conv bias (f32)
    if has_res:
        y = y + res_ref[...].astype(jnp.float32)     # fused residual add
    if relu:
        y = jnp.maximum(y, 0.0)
    if has_proj:                                     # fused mask-head 1x1 projection (lane-dense 128)
        y = jnp.dot(y, pw_ref[...], preferred_element_type=jnp.float32) + pb_ref[...]
    o_ref[...] = y.astype(o_ref.dtype)


# =============================================================================
# Wrapper: padding / space-to-depth / flattened-frame tiling around the kernel
# =============================================================================

def _round_up(x, m):
    return ((x + m - 1) // m) * m


def _space_to_depth(x):
    """[N, H, W, C] -> [N, H//2, W//2, 4C]; channel packing (row parity, col parity, C)."""
    n, h, w, c = x.shape
    assert h % 2 == 0 and w % 2 == 0
    x = x.reshape(n, h // 2, 2, w // 2, 2, c).transpose(0, 1, 3, 2, 4, 5)
    return x.reshape(n, h // 2, w // 2, 4 * c)


def _s2d_weights(w):
    """HWIO weights of a stride-2 conv -> equivalent stride-1 weights over the s2d input."""
    kh, kw, cin, cout = w.shape
    khp, kwp = (kh + 1) // 2, (kw + 1) // 2
    wp = jnp.pad(w, ((0, 2 * khp - kh), (0, 2 * kwp - kw), (0, 0), (0, 0)))
    wz = wp.reshape(khp, 2, kwp, 2, cin, cout).transpose(0, 2, 1, 3, 4, 5)
    return wz.reshape(khp, kwp, 4 * cin, cout)


def conv2d_fused(x, w, scale, shift, *, stride=1, pad=0, relu=False, res=None,
                 proj=None, out_dtype=None, compute_dtype=jnp.bfloat16, tm_target=1024):
    """Conv2d (NHWC x HWIO) + affine [+ residual] [+ ReLU] [+ fused 1x1 projection]."""
    if pad:
        x = jnp.pad(x, ((0, 0), (pad, pad), (pad, pad), (0, 0)))
    if stride == 2:
        x = _space_to_depth(x)
        w = _s2d_weights(w)
    elif stride != 1:
        raise NotImplementedError(stride)

    kh, kw, cin, cout = w.shape
    N, Hin, Win, cin_x = x.shape
    assert cin_x == cin
    Ho, Wo = Hin - kh + 1, Win - kw + 1
    M = N * Hin * Win                               # rows of the flattened (padded) frame
    ntaps = kh * kw
    K = ntaps * cin
    taps = tuple(di * Win + dj for di in range(kh) for dj in range(kw))
    o_max = taps[-1]                                # largest forward row offset any tap needs
    has_halo = o_max > 0
    hrows = _round_up(o_max, 8) if has_halo else 0  # single halo tile of >= o_max rows
    base = hrows if has_halo else 8
    use_scratch = has_halo and (cin % 128 == 0)     # conv1 (cin=4) uses the vreg-concat path

    out_dtype = compute_dtype if out_dtype is None else out_dtype
    cout_final = cout if proj is None else proj[0].shape[-1]
    ds = jnp.dtype(compute_dtype).itemsize
    ods = jnp.dtype(out_dtype).itemsize

    # --- row-tile size: multiple of hrows, >= ~4*hrows, within the VMEM budget, and small
    #     enough that the grid keeps ~4 tiles (v7x megacore). -------------------------------
    vmem_limit = _vmem_limit_bytes()
    fixed = 2 * K * cout * ds + 2 * hrows * cin * ds + 8 * cout * 4
    if proj is not None:
        fixed += 2 * (cout * cout_final + cout_final) * 4
    per_row = 2 * cin * ds + 2 * cout_final * ods + K * ds + 2 * cout * 4
    if res is not None:
        per_row += 2 * cout * ds
    budget = int(vmem_limit * 0.7) - fixed
    cap = max(base, (budget // per_row // base) * base)

    want = max(tm_target, 4 * hrows) if has_halo else tm_target
    tm = max(base, (min(want, cap) // base) * base)
    tm = min(tm, _round_up(M, base))                       # don't exceed the problem size
    tm = min(tm, _round_up(pl.cdiv(M, 4), base))           # keep >= ~4 tiles when possible
    nmb = pl.cdiv(M, tm)
    rows_total = nmb * tm + hrows

    xf = x.astype(compute_dtype).reshape(M, cin)
    xf = jnp.pad(xf, ((0, rows_total - M), (0, 0)))
    wf = w.astype(compute_dtype).reshape(K, cout)
    scale = scale.reshape(1, cout).astype(jnp.float32)
    shift = shift.reshape(1, cout).astype(jnp.float32)

    inputs = [xf]
    in_specs = [pl.BlockSpec((tm, cin), lambda m: (m, 0))]
    if has_halo:                                    # halo = the rows right after the main tile
        hstep = tm // hrows
        inputs.append(xf)
        in_specs.append(pl.BlockSpec((hrows, cin), lambda m, _s=hstep: ((m + 1) * _s, 0)))

    inputs += [wf, scale, shift]
    in_specs += [pl.BlockSpec((K, cout), lambda m: (0, 0)),
                 pl.BlockSpec((1, cout), lambda m: (0, 0)),
                 pl.BlockSpec((1, cout), lambda m: (0, 0))]

    if res is not None:                             # residual, aligned to the padded frame
        assert res.shape == (N, Ho, Wo, cout)
        rf = jnp.pad(res, ((0, 0), (0, Hin - Ho), (0, Win - Wo), (0, 0)))
        rf = rf.astype(compute_dtype).reshape(M, cout)
        rf = jnp.pad(rf, ((0, nmb * tm - M), (0, 0)))
        inputs.append(rf)
        in_specs.append(pl.BlockSpec((tm, cout), lambda m: (m, 0)))

    if proj is not None:                            # fused trailing 1x1 conv (mask head)
        pw, pb = proj
        inputs += [pw.reshape(cout, cout_final).astype(jnp.float32),
                   pb.reshape(1, cout_final).astype(jnp.float32)]
        in_specs += [pl.BlockSpec((cout, cout_final), lambda m: (0, 0)),
                     pl.BlockSpec((1, cout_final), lambda m: (0, 0))]

    scratch = [pltpu.VMEM((tm, K), compute_dtype)] if use_scratch else []

    kern = functools.partial(
        _conv_kernel, taps=taps, cin=cin, tm=tm, relu=relu, has_halo=has_halo,
        has_res=res is not None, has_proj=proj is not None, use_scratch=use_scratch)

    yf = pl.pallas_call(
        kern,
        out_shape=jax.ShapeDtypeStruct((nmb * tm, cout_final), out_dtype),
        grid=(nmb,),
        in_specs=in_specs,
        out_specs=pl.BlockSpec((tm, cout_final), lambda m: (m, 0)),
        scratch_shapes=scratch,
        compiler_params=pltpu.CompilerParams(
            dimension_semantics=("parallel",),      # row tiles independent (v7x megacore)
            vmem_limit_bytes=vmem_limit),
    )(*inputs)

    # Drop pad-border / tail rows and restore NHWC.
    return yf[:M].reshape(N, Hin, Win, cout_final)[:, :Ho, :Wo, :]


# =============================================================================
# Network
# =============================================================================

def ONES(c):
    return jnp.ones((1, c), jnp.float32)


def ZEROS(c):
    return jnp.zeros((1, c), jnp.float32)


def _basic_block(x, p, stride, cdt):
    if stride == 1:
        identity = x
    else:                                            # 1x1 stride-2 downsample (single matmul)
        identity = conv2d_fused(x, p["wd"], p["sd"], p["bd"], stride=stride, pad=0,
                                relu=False, compute_dtype=cdt)
    y = conv2d_fused(x, p["w1"], p["s1"], p["b1"], stride=stride, pad=1, relu=True,
                     compute_dtype=cdt)
    # conv2 + BN2 + residual add + ReLU fused in one kernel call
    return conv2d_fused(y, p["w2"], p["s2"], p["b2"], stride=1, pad=1, relu=True,
                        res=identity, compute_dtype=cdt)


def loftr_masknet_forward(P, img_nchw, compute_dtype=jnp.bfloat16):
    cdt = compute_dtype
    x = jnp.transpose(img_nchw, (0, 2, 3, 1)).astype(cdt)            # NCHW -> NHWC
    x = conv2d_fused(x, P["conv1_w"], P["bn1_s"], P["bn1_b"], stride=2, pad=3,
                     relu=True, compute_dtype=cdt)
    x = _basic_block(x, P["l1b1"], 1, cdt)
    x = _basic_block(x, P["l1b2"], 1, cdt)
    x = _basic_block(x, P["l2b1"], 2, cdt)
    x = _basic_block(x, P["l2b2"], 1, cdt)
    x = _basic_block(x, P["l3b1"], 2, cdt)
    x = _basic_block(x, P["l3b2"], 1, cdt)
    feats_c = conv2d_fused(x, P["l3_out_w"], ONES(256), ZEROS(256), stride=1, pad=0,
                           relu=False, compute_dtype=cdt)
    # mask head: Conv(256->64,3x3)+ReLU and Conv(64->1,1x1) fused into ONE kernel call.
    # (channels padded 64->128 / 1->128 for lane-dense stores; real output is channel 0)
    c1 = P["mh1_w"].shape[-1]
    mask = conv2d_fused(feats_c, P["mh1_w"], ONES(c1), P["mh1_b"], stride=1, pad=1,
                        relu=True, proj=(P["mh2_w"], P["mh2_b"]),
                        out_dtype=jnp.float32, compute_dtype=cdt)
    mask = mask[..., :1]
    return jnp.transpose(mask, (0, 3, 1, 2))                          # [N, 1, H/8, W/8]


# =============================================================================
# Deterministic parameter initialization + lane-alignment padding
# =============================================================================
# TODO(synk): LoFTR's pretrained 'outdoor' checkpoint cannot be loaded in-script;
#             deterministic He-init weights + folded eval-mode BN stats are used instead.

def _conv_w(ks, kh, kw, cin, cout):
    std = (2.0 / (kh * kw * cin)) ** 0.5
    return std * jax.random.normal(next(ks), (kh, kw, cin, cout), jnp.float32)


def _bn_fold(ks, c):
    # Eval-mode BatchNorm folded to an affine: scale = g/sqrt(var+eps), shift = b - mean*scale
    eps = 1e-5
    g = 1.0 + 0.1 * jax.random.normal(next(ks), (c,), jnp.float32)
    b = 0.1 * jax.random.normal(next(ks), (c,), jnp.float32)
    m = 0.1 * jax.random.normal(next(ks), (c,), jnp.float32)
    v = 1.0 + 0.1 * jnp.abs(jax.random.normal(next(ks), (c,), jnp.float32))
    scale = g / jnp.sqrt(v + eps)
    shift = b - m * scale
    return scale.reshape(1, c), shift.reshape(1, c)


def init_params(key):
    ks = iter(jax.random.split(key, 128))
    P = {}
    P["conv1_w"] = _conv_w(ks, 7, 7, 1, 128)
    P["bn1_s"], P["bn1_b"] = _bn_fold(ks, 128)

    def block(cin, cout, stride):
        p = {"w1": _conv_w(ks, 3, 3, cin, cout)}
        p["s1"], p["b1"] = _bn_fold(ks, cout)
        p["w2"] = _conv_w(ks, 3, 3, cout, cout)
        p["s2"], p["b2"] = _bn_fold(ks, cout)
        if stride != 1:
            p["wd"] = _conv_w(ks, 1, 1, cin, cout)
            p["sd"], p["bd"] = _bn_fold(ks, cout)
        return p

    P["l1b1"] = block(128, 128, 1)
    P["l1b2"] = block(128, 128, 1)
    P["l2b1"] = block(128, 196, 2)
    P["l2b2"] = block(196, 196, 1)
    P["l3b1"] = block(196, 256, 2)
    P["l3b2"] = block(256, 256, 1)
    P["l3_out_w"] = _conv_w(ks, 1, 1, 256, 256)     # layer3_outconv (bias=False, no BN/act)
    P["mh1_w"] = _conv_w(ks, 3, 3, 256, 64)         # mask_head conv1 (bias=True)
    P["mh1_b"] = 0.01 * jax.random.normal(next(ks), (1, 64), jnp.float32)
    P["mh2_w"] = _conv_w(ks, 1, 1, 64, 1)           # mask_head conv2 (bias=True)
    P["mh2_b"] = 0.01 * jax.random.normal(next(ks), (1, 1), jnp.float32)
    return P


def _pad_w(w, cin_to, cout_to):
    kh, kw, cin, cout = w.shape
    return jnp.pad(w, ((0, 0), (0, 0), (0, cin_to - cin), (0, cout_to - cout)))


def _pad_a(a, cout_to):
    return jnp.pad(a, ((0, 0), (0, cout_to - a.shape[1])))


def pad_params_for_pallas(P):
    """Zero-pad layer2's 196 channels to 256 and the mask head to 128 (lane-dense matmuls).

    Padded channels have zero weights/scale/shift everywhere, so they stay exactly zero
    through conv / BN / ReLU / residual / projection and the real channels are numerically
    identical."""
    PP = dict(P)

    def pad_block(p, cin_to, cout_to):
        q = dict(p)
        q["w1"] = _pad_w(p["w1"], cin_to, cout_to)
        q["s1"], q["b1"] = _pad_a(p["s1"], cout_to), _pad_a(p["b1"], cout_to)
        q["w2"] = _pad_w(p["w2"], cout_to, cout_to)
        q["s2"], q["b2"] = _pad_a(p["s2"], cout_to), _pad_a(p["b2"], cout_to)
        if "wd" in p:
            q["wd"] = _pad_w(p["wd"], cin_to, cout_to)
            q["sd"], q["bd"] = _pad_a(p["sd"], cout_to), _pad_a(p["bd"], cout_to)
        return q

    PP["l2b1"] = pad_block(P["l2b1"], 128, 256)
    PP["l2b2"] = pad_block(P["l2b2"], 256, 256)
    PP["l3b1"] = pad_block(P["l3b1"], 256, 256)     # only Cin 196->256 actually pads
    PP["mh1_w"] = _pad_w(P["mh1_w"], 256, 128)      # mask head cout 64 -> 128
    PP["mh1_b"] = _pad_a(P["mh1_b"], 128)
    PP["mh2_w"] = _pad_w(P["mh2_w"], 128, 128)      # proj 64x1 -> 128x128 (channel 0 is real)
    PP["mh2_b"] = _pad_a(P["mh2_b"], 128)
    return PP


# =============================================================================
# Pure-JAX reference (lax.conv, f32, unpadded channels)
# =============================================================================

def _conv_ref(x, w, stride, pad):
    return jax.lax.conv_general_dilated(
        x, w, (stride, stride), [(pad, pad), (pad, pad)],
        dimension_numbers=("NHWC", "HWIO", "NHWC"),
        precision=jax.lax.Precision.HIGHEST)


def _cba_ref(x, w, scale, shift, stride, pad, act):
    y = _conv_ref(x, w, stride, pad) * scale.reshape(1, 1, 1, -1) + shift.reshape(1, 1, 1, -1)
    return jnp.maximum(y, 0.0) if act == "relu" else y


def _block_ref(x, p, stride):
    y = _cba_ref(x, p["w1"], p["s1"], p["b1"], stride, 1, "relu")
    y = _cba_ref(y, p["w2"], p["s2"], p["b2"], 1, 1, "none")
    if "wd" in p:
        x = _cba_ref(x, p["wd"], p["sd"], p["bd"], stride, 0, "none")
    return jnp.maximum(x + y, 0.0)


def reference_forward(P, img_nchw):
    x = jnp.transpose(img_nchw, (0, 2, 3, 1)).astype(jnp.float32)
    x0 = _cba_ref(x, P["conv1_w"], P["bn1_s"], P["bn1_b"], 2, 3, "relu")
    x1 = _block_ref(x0, P["l1b1"], 1)
    x1 = _block_ref(x1, P["l1b2"], 1)
    x2 = _block_ref(x1, P["l2b1"], 2)
    x2 = _block_ref(x2, P["l2b2"], 1)
    x3 = _block_ref(x2, P["l3b1"], 2)
    x3 = _block_ref(x3, P["l3b2"], 1)
    feats_c = _cba_ref(x3, P["l3_out_w"], ONES(256), ZEROS(256), 1, 0, "none")
    h = _cba_ref(feats_c, P["mh1_w"], ONES(64), P["mh1_b"], 1, 1, "relu")
    mask = _cba_ref(h, P["mh2_w"], ONES(1), P["mh2_b"], 1, 0, "none")
    return jnp.transpose(mask, (0, 3, 1, 2))


# =============================================================================
# Exact structural checks: small-integer inputs make every matmul exact, so the Pallas
# conv must match lax.conv bit-for-bit (catches tap/halo/s2d/residual/proj indexing bugs).
# =============================================================================

def _exact_conv_check(key, *, N, H, cin, cout, kh, stride, pad, relu,
                      with_res, with_proj, tm_target=1024):
    ks = jax.random.split(key, 6)
    x = jax.random.randint(ks[0], (N, H, H, cin), -1, 2).astype(jnp.float32)
    w = jax.random.randint(ks[1], (kh, kh, cin, cout), -1, 2).astype(jnp.float32)
    scale = jnp.ones((1, cout), jnp.float32)
    shift = jax.random.randint(ks[2], (1, cout), -1, 2).astype(jnp.float32)
    Ho = (H + 2 * pad - kh) // stride + 1
    res = None
    if with_res:
        res = jax.random.randint(ks[3], (N, Ho, Ho, cout), -1, 2).astype(jnp.float32)
    proj = None
    if with_proj:
        pw = jax.random.randint(ks[4], (1, 1, cout, 128), -1, 2).astype(jnp.float32)
        pb = jax.random.randint(ks[5], (1, 128), -1, 2).astype(jnp.float32)
        proj = (pw, pb)

    got = conv2d_fused(x, w, scale, shift, stride=stride, pad=pad, relu=relu,
                       res=res, proj=proj, out_dtype=jnp.float32,
                       compute_dtype=jnp.bfloat16, tm_target=tm_target)

    ref = _conv_ref(x, w, stride, pad) + shift.reshape(1, 1, 1, -1)
    if with_res:
        ref = ref + res
    if relu:
        ref = jnp.maximum(ref, 0.0)
    if with_proj:
        ref = jnp.einsum("nhwc,cd->nhwd", ref, proj[0].reshape(cout, 128),
                         precision=jax.lax.Precision.HIGHEST) + proj[1].reshape(1, 1, 1, -1)
    err = float(jnp.max(jnp.abs(got - ref)))
    assert err < 1e-3, f"exact conv check failed (k={kh}, s={stride}, cin={cin}): err={err}"


# =============================================================================
# Main
# =============================================================================

if __name__ == "__main__":
    key = jax.random.PRNGKey(0)
    pkey, xkey, tkey = jax.random.split(key, 3)
    tks = jax.random.split(tkey, 4)

    # --- exact structural unit tests of the fused conv kernel (must match lax.conv exactly).
    # 3x3 s1 p1 + residual + ReLU, multi-tile grid so the halo path is exercised:
    _exact_conv_check(tks[0], N=2, H=12, cin=128, cout=128, kh=3, stride=1, pad=1,
                      relu=True, with_res=True, with_proj=False, tm_target=64)
    # conv1 path: 7x7 stride-2 pad-3, cin=1 (space-to-depth + vreg-concat im2col):
    _exact_conv_check(tks[1], N=2, H=16, cin=1, cout=128, kh=7, stride=2, pad=3,
                      relu=True, with_res=False, with_proj=False)
    # fused 1x1 projection epilogue (mask-head style), kept small so it is exact:
    _exact_conv_check(tks[2], N=2, H=8, cin=128, cout=128, kh=1, stride=1, pad=0,
                      relu=True, with_res=False, with_proj=True)
    # 1x1 stride-2 downsample path (space-to-depth of a 1x1 conv):
    _exact_conv_check(tks[3], N=2, H=8, cin=128, cout=256, kh=1, stride=2, pad=0,
                      relu=False, with_res=False, with_proj=False)

    # --- end-to-end network check --------------------------------------------------------
    P = init_params(pkey)
    PP = pad_params_for_pallas(P)

    # LoFTR takes single-channel (grayscale) images; spatial dims divisible by 8.
    img = jax.random.normal(xkey, (2, 1, 32, 32), jnp.float32)       # NCHW

    ref = jax.block_until_ready(reference_forward(P, img))

    # f32 run: end-to-end check against the lax.conv reference (the strict structural checks
    # above are the exact tests; this tolerance allows for bf16-pass lowering of f32 matmuls).
    fwd_f32 = jax.jit(functools.partial(loftr_masknet_forward, compute_dtype=jnp.float32))
    out_f32 = jax.block_until_ready(fwd_f32(PP, img))
    assert out_f32.shape == (2, 1, 4, 4), out_f32.shape               # N, 1, H/8, W/8
    assert np.isfinite(np.asarray(out_f32)).all()
    err_f32 = float(jnp.max(jnp.abs(out_f32 - ref)) / (jnp.max(jnp.abs(ref)) + 1e-6))
    assert err_f32 < 2e-2, f"f32 mismatch vs lax.conv reference: rel_err={err_f32}"

    # bf16 run (performance configuration): f32 accumulation + f32 epilogue keep it close.
    fwd_bf16 = jax.jit(functools.partial(loftr_masknet_forward, compute_dtype=jnp.bfloat16))
    out_bf16 = jax.block_until_ready(fwd_bf16(PP, img))
    assert out_bf16.shape == (2, 1, 4, 4), out_bf16.shape
    assert np.isfinite(np.asarray(out_bf16)).all()
    err_bf16 = float(jnp.max(jnp.abs(out_bf16 - ref)) / (jnp.max(jnp.abs(ref)) + 1e-6))
    assert err_bf16 < 0.25, f"bf16 sanity check vs reference: rel_err={err_bf16}"

    print("KERNEL_OK")
</pallas_src>

<mosaic_0001>
module attributes {stable_mosaic.version = 11 : i64} {
  func.func @_conv_kernel(%arg0: i32, %arg1: memref<128x128xbf16, #tpu.memory_space<vmem>>, %arg2: memref<32x128xbf16, #tpu.memory_space<vmem>>, %arg3: memref<1152x128xbf16, #tpu.memory_space<vmem>>, %arg4: memref<1x128xf32, #tpu.memory_space<vmem>>, %arg5: memref<1x128xf32, #tpu.memory_space<vmem>>, %arg6: memref<128x128xbf16, #tpu.memory_space<vmem>>, %arg7: memref<128x128xf32, #tpu.memory_space<vmem>>, %arg8: memref<128x1152xbf16, #tpu.memory_space<vmem>>) attributes {dimension_semantics = [#tpu.dimension_semantics<parallel>], iteration_bounds = array<i64: 4>, scalar_prefetch = 0 : i64, scratch_operands = 1 : i64, tpu.core_type = #tpu.core_type<tc>, window_params = [{transform_indices = @transform_0, window_bounds = array<i64: 128, 128>}, {transform_indices = @transform_1, window_bounds = array<i64: 32, 128>}, {pipeline_mode = #tpu.pipeline_mode<synchronous>, transform_indices = @transform_2, window_bounds = array<i64: 1152, 128>}, {pipeline_mode = #tpu.pipeline_mode<synchronous>, transform_indices = @transform_3, window_bounds = array<i64: 1, 128>}, {pipeline_mode = #tpu.pipeline_mode<synchronous>, transform_indices = @transform_4, window_bounds = array<i64: 1, 128>}, {transform_indices = @transform_5, window_bounds = array<i64: 128, 128>}, {transform_indices = @transform_6, window_bounds = array<i64: 128, 128>}]} {
    %c0 = arith.constant 0 : index
    %c0_0 = arith.constant 0 : index
    %0 = vector.load %arg1[%c0, %c0_0] : memref<128x128xbf16, #tpu.memory_space<vmem>>, vector<128x128xbf16>
    %c0_1 = arith.constant 0 : index
    %c0_2 = arith.constant 0 : index
    %1 = vector.load %arg8[%c0_1, %c0_2] : memref<128x1152xbf16, #tpu.memory_space<vmem>>, vector<128x128xbf16>
    tpu.vector_store %arg8[%c0_1, %c0_2], %0 {strides = array<i32>} : memref<128x1152xbf16, #tpu.memory_space<vmem>>, vector<128x128xbf16>,
    %c1 = arith.constant 1 : index
    %c0_3 = arith.constant 0 : index
    %2 = vector.load %arg1[%c1, %c0_3] : memref<128x128xbf16, #tpu.memory_space<vmem>>, vector<127x128xbf16>
    %c0_4 = arith.constant 0 : index
    %c0_5 = arith.constant 0 : index
    %3 = vector.load %arg2[%c0_4, %c0_5] : memref<32x128xbf16, #tpu.memory_space<vmem>>, vector<1x128xbf16>
    %4 = tpu.concatenate %2, %3 in 0 : vector<127x128xbf16>, vector<1x128xbf16> -> vector<128x128xbf16>
    %c0_6 = arith.constant 0 : index
    %c128 = arith.constant 128 : index
    %5 = vector.load %arg8[%c0_6, %c128] : memref<128x1152xbf16, #tpu.memory_space<vmem>>, vector<128x128xbf16>
    tpu.vector_store %arg8[%c0_6, %c128], %4 {strides = array<i32>} : memref<128x1152xbf16, #tpu.memory_space<vmem>>, vector<128x128xbf16>,
    %c2 = arith.constant 2 : index
    %c0_7 = arith.constant 0 : index
    %6 = vector.load %arg1[%c2, %c0_7] : memref<128x128xbf16, #tpu.memory_space<vmem>>, vector<126x128xbf16>
    %c0_8 = arith.constant 0 : index
    %c0_9 = arith.constant 0 : index
    %7 = vector.load %arg2[%c0_8, %c0_9] : memref<32x128xbf16, #tpu.memory_space<vmem>>, vector<2x128xbf16>
    %8 = tpu.concatenate %6, %7 in 0 : vector<126x128xbf16>, vector<2x128xbf16> -> vector<128x128xbf16>
    %c0_10 = arith.constant 0 : index
    %c256 = arith.constant 256 : index
    %9 = vector.load %arg8[%c0_10, %c256] : memref<128x1152xbf16, #tpu.memory_space<vmem>>, vector<128x128xbf16>
    tpu.vector_store %arg8[%c0_10, %c256], %8 {strides = array<i32>} : memref<128x1152xbf16, #tpu.memory_space<vmem>>, vector<128x128xbf16>,
    %c14 = arith.constant 14 : index
    %c0_11 = arith.constant 0 : index
    %10 = vector.load %arg1[%c14, %c0_11] : memref<128x128xbf16, #tpu.memory_space<vmem>>, vector<114x128xbf16>
    %c0_12 = arith.constant 0 : index
    %c0_13 = arith.constant 0 : index
    %11 = vector.load %arg2[%c0_12, %c0_13] : memref<32x128xbf16, #tpu.memory_space<vmem>>, vector<14x128xbf16>
    %12 = tpu.concatenate %10, %11 in 0 : vector<114x128xbf16>, vector<14x128xbf16> -> vector<128x128xbf16>
    %c0_14 = arith.constant 0 : index
    %c384 = arith.constant 384 : index
    %13 = vector.load %arg8[%c0_14, %c384] : memref<128x1152xbf16, #tpu.memory_space<vmem>>, vector<128x128xbf16>
    tpu.vector_store %arg8[%c0_14, %c384], %12 {strides = array<i32>} : memref<128x1152xbf16, #tpu.memory_space<vmem>>, vector<128x128xbf16>,
    %c15 = arith.constant 15 : index
    %c0_15 = arith.constant 0 : index
    %14 = vector.load %arg1[%c15, %c0_15] : memref<128x128xbf16, #tpu.memory_space<vmem>>, vector<113x128xbf16>
    %c0_16 = arith.constant 0 : index
    %c0_17 = arith.constant 0 : index
    %15 = vector.load %arg2[%c0_16, %c0_17] : memref<32x128xbf16, #tpu.memory_space<vmem>>, vector<15x128xbf16>
    %16 = tpu.concatenate %14, %15 in 0 : vector<113x128xbf16>, vector<15x128xbf16> -> vector<128x128xbf16>
    %c0_18 = arith.constant 0 : index
    %c512 = arith.constant 512 : index
    %17 = vector.load %arg8[%c0_18, %c512] : memref<128x1152xbf16, #tpu.memory_space<vmem>>, vector<128x128xbf16>
    tpu.vector_store %arg8[%c0_18, %c512], %16 {strides = array<i32>} : memref<128x1152xbf16, #tpu.memory_space<vmem>>, vector<128x128xbf16>,
    %c16 = arith.constant 16 : index
    %c0_19 = arith.constant 0 : index
    %18 = vector.load %arg1[%c16, %c0_19] : memref<128x128xbf16, #tpu.memory_space<vmem>>, vector<112x128xbf16>
    %c0_20 = arith.constant 0 : index
    %c0_21 = arith.constant 0 : index
    %19 = vector.load %arg2[%c0_20, %c0_21] : memref<32x128xbf16, #tpu.memory_space<vmem>>, vector<16x128xbf16>
    %20 = tpu.concatenate %18, %19 in 0 : vector<112x128xbf16>, vector<16x128xbf16> -> vector<128x128xbf16>
    %c0_22 = arith.constant 0 : index
    %c640 = arith.constant 640 : index
    %21 = vector.load %arg8[%c0_22, %c640] : memref<128x1152xbf16, #tpu.memory_space<vmem>>, vector<128x128xbf16>
    tpu.vector_store %arg8[%c0_22, %c640], %20 {strides = array<i32>} : memref<128x1152xbf16, #tpu.memory_space<vmem>>, vector<128x128xbf16>,
    %c28 = arith.constant 28 : index
    %c0_23 = arith.constant 0 : index
    %22 = vector.load %arg1[%c28, %c0_23] : memref<128x128xbf16, #tpu.memory_space<vmem>>, vector<100x128xbf16>
    %c0_24 = arith.constant 0 : index
    %c0_25 = arith.constant 0 : index
    %23 = vector.load %arg2[%c0_24, %c0_25] : memref<32x128xbf16, #tpu.memory_space<vmem>>, vector<28x128xbf16>
    %24 = tpu.concatenate %22, %23 in 0 : vector<100x128xbf16>, vector<28x128xbf16> -> vector<128x128xbf16>
    %c0_26 = arith.constant 0 : index
    %c768 = arith.constant 768 : index
    %25 = vector.load %arg8[%c0_26, %c768] : memref<128x1152xbf16, #tpu.memory_space<vmem>>, vector<128x128xbf16>
    tpu.vector_store %arg8[%c0_26, %c768], %24 {strides = array<i32>} : memref<128x1152xbf16, #tpu.memory_space<vmem>>, vector<128x128xbf16>,
    %c29 = arith.constant 29 : index
    %c0_27 = arith.constant 0 : index
    %26 = vector.load %arg1[%c29, %c0_27] : memref<128x128xbf16, #tpu.memory_space<vmem>>, vector<99x128xbf16>
    %c0_28 = arith.constant 0 : index
    %c0_29 = arith.constant 0 : index
    %27 = vector.load %arg2[%c0_28, %c0_29] : memref<32x128xbf16, #tpu.memory_space<vmem>>, vector<29x128xbf16>
    %28 = tpu.concatenate %26, %27 in 0 : vector<99x128xbf16>, vector<29x128xbf16> -> vector<128x128xbf16>
    %c0_30 = arith.constant 0 : index
    %c896 = arith.constant 896 : index
    %29 = vector.load %arg8[%c0_30, %c896] : memref<128x1152xbf16, #tpu.memory_space<vmem>>, vector<128x128xbf16>
    tpu.vector_store %arg8[%c0_30, %c896], %28 {strides = array<i32>} : memref<128x1152xbf16, #tpu.memory_space<vmem>>, vector<128x128xbf16>,
    %c30 = arith.constant 30 : index
    %c0_31 = arith.constant 0 : index
    %30 = vector.load %arg1[%c30, %c0_31] : memref<128x128xbf16, #tpu.memory_space<vmem>>, vector<98x128xbf16>
    %c0_32 = arith.constant 0 : index
    %c0_33 = arith.constant 0 : index
    %31 = vector.load %arg2[%c0_32, %c0_33] : memref<32x128xbf16, #tpu.memory_space<vmem>>, vector<30x128xbf16>
    %32 = tpu.concatenate %30, %31 in 0 : vector<98x128xbf16>, vector<30x128xbf16> -> vector<128x128xbf16>
    %c0_34 = arith.constant 0 : index
    %c1024 = arith.constant 1024 : index
    %33 = vector.load %arg8[%c0_34, %c1024] : memref<128x1152xbf16, #tpu.memory_space<vmem>>, vector<128x128xbf16>
    tpu.vector_store %arg8[%c0_34, %c1024], %32 {strides = array<i32>} : memref<128x1152xbf16, #tpu.memory_space<vmem>>, vector<128x128xbf16>,
    %c0_35 = arith.constant 0 : index
    %c0_36 = arith.constant 0 : index
    %34 = vector.load %arg8[%c0_35, %c0_36] : memref<128x1152xbf16, #tpu.memory_space<vmem>>, vector<128x1152xbf16>
    %c0_37 = arith.constant 0 : index
    %c0_38 = arith.constant 0 : index
    %35 = vector.load %arg3[%c0_37, %c0_38] : memref<1152x128xbf16, #tpu.memory_space<vmem>>, vector<1152x128xbf16>
    %cst = arith.constant dense<0.000000e+00> : vector<128x128xf32>
    %36 = tpu.matmul %34, %35, %cst {dimension_numbers = #tpu.dot_dimension_numbers<[1], [0], [0], [1], [0, 0, 1, 1], [], []>} : vector<128x1152xbf16>, vector<1152x128xbf16>, vector<128x128xf32> -> vector<128x128xf32>
    %c0_39 = arith.constant 0 : index
    %c0_40 = arith.constant 0 : index
    %37 = vector.load %arg4[%c0_39, %c0_40] : memref<1x128xf32, #tpu.memory_space<vmem>>, vector<1x128xf32>
    %38 = vector.broadcast %37 : vector<1x128xf32> to vector<128x128xf32>
    %39 = arith.mulf %36, %38 : vector<128x128xf32>
    %c0_41 = arith.constant 0 : index
    %c0_42 = arith.constant 0 : index
    %40 = vector.load %arg5[%c0_41, %c0_42] : memref<1x128xf32, #tpu.memory_space<vmem>>, vector<1x128xf32>
    %41 = vector.broadcast %40 : vector<1x128xf32> to vector<128x128xf32>
    %42 = arith.addf %39, %41 : vector<128x128xf32>
    %c0_43 = arith.constant 0 : index
    %c0_44 = arith.constant 0 : index
    %43 = vector.load %arg6[%c0_43, %c0_44] : memref<128x128xbf16, #tpu.memory_space<vmem>>, vector<128x128xbf16>
    %44 = arith.extf %43 : vector<128x128xbf16> to vector<128x128xf32>
    %45 = arith.addf %42, %44 : vector<128x128xf32>
    %cst_45 = arith.constant 0.000000e+00 : f32
    %46 = vector.broadcast %cst_45 : f32 to vector<128x128xf32>
    %47 = arith.maximumf %45, %46 : vector<128x128xf32>
    %c0_46 = arith.constant 0 : index
    %c0_47 = arith.constant 0 : index
    %48 = vector.load %arg7[%c0_46, %c0_47] : memref<128x128xf32, #tpu.memory_space<vmem>>, vector<128x128xf32>
    tpu.vector_store %arg7[%c0_46, %c0_47], %47 {strides = array<i32>} : memref<128x128xf32, #tpu.memory_space<vmem>>, vector<128x128xf32>,
    return
  }
  func.func @transform_0(%arg0: i32) -> (i32, i32) {
    %c0_i32 = arith.constant 0 : i32
    %c0_i32_0 = arith.constant 0 : i32
    return %arg0, %c0_i32 : i32, i32
  }
  func.func @transform_1(%arg0: i32) -> (i32, i32) {
    %c1_i32 = arith.constant 1 : i32
    %0 = arith.addi %arg0, %c1_i32 : i32
    %c4_i32 = arith.constant 4 : i32
    %1 = arith.muli %0, %c4_i32 : i32
    %c0_i32 = arith.constant 0 : i32
    %c0_i32_0 = arith.constant 0 : i32
    return %1, %c0_i32 : i32, i32
  }
  func.func @transform_2(%arg0: i32) -> (i32, i32) {
    %c0_i32 = arith.constant 0 : i32
    %c0_i32_0 = arith.constant 0 : i32
    %c0_i32_1 = arith.constant 0 : i32
    return %c0_i32, %c0_i32_0 : i32, i32
  }
  func.func @transform_3(%arg0: i32) -> (i32, i32) {
    %c0_i32 = arith.constant 0 : i32
    %c0_i32_0 = arith.constant 0 : i32
    %c0_i32_1 = arith.constant 0 : i32
    return %c0_i32, %c0_i32_0 : i32, i32
  }
  func.func @transform_4(%arg0: i32) -> (i32, i32) {
    %c0_i32 = arith.constant 0 : i32
    %c0_i32_0 = arith.constant 0 : i32
    %c0_i32_1 = arith.constant 0 : i32
    return %c0_i32, %c0_i32_0 : i32, i32
  }
  func.func @transform_5(%arg0: i32) -> (i32, i32) {
    %c0_i32 = arith.constant 0 : i32
    %c0_i32_0 = arith.constant 0 : i32
    return %arg0, %c0_i32 : i32, i32
  }
  func.func @transform_6(%arg0: i32) -> (i32, i32) {
    %c0_i32 = arith.constant 0 : i32
    %c0_i32_0 = arith.constant 0 : i32
    return %arg0, %c0_i32 : i32, i32
  }
}

</mosaic_0001>

<bundles_post_ra>
// kernel: tpu_custom_call.1
= control target key start
LH: loop header
LB: loop body
LE: loop exit
PB: predicated region body
PF: predicated region fallthrough
CT: control target
= control target key end

     0   :  { %s5888_s0 = inlined_call_operand.hbm [shape: bf16[544,128], index: 0, kind: input, shape index: {}]   ;;  %s5889_s1 = inlined_call_operand.hbm [shape: bf16[544,128], index: 1, kind: input, shape index: {}]   ;;  %s5890_s2 = inlined_call_operand.hbm [shape: bf16[1152,128], index: 2, kind: input, shape index: {}]   ;;  %s5891_s3 = inlined_call_operand.vmem [shape: f32[1,128], index: 3, kind: input, shape index: {}]   ;;  %s5892_s4 = inlined_call_operand.vmem [shape: f32[1,128], index: 4, kind: input, shape index: {}]   ;;  %s5893_s5 = inlined_call_operand.hbm [shape: bf16[512,128], index: 5, kind: input, shape index: {}]   ;;  %s5894_s6 = inlined_call_operand.hbm [shape: f32[512,128], index: 6, kind: output, shape index: {}]  }
   0x1   :  { %5907 = sst [smem:[#allocation23_spill]] %s5888_s0 }
   0x2   :  { %5908 = sst [smem:[#allocation24_spill]] %s5890_s2 }
   0x3   :  { %5909 = sst [smem:[#allocation25_spill]] %s5891_s3 }
   0x4   :  { %5910 = sst [smem:[#allocation26_spill]] %s5892_s4 }
   0x5   :  { %5911 = sst [smem:[#allocation27_spill]] %s5894_s6 }
   0x6   :  { %11 = vsyncpa [#allocation4], 0 }
   0x7   :  { %13 = vsyncpa [#allocation4 + $0x1], 0 }
   0x8   :  { %14 = vsyncpa [#allocation7], 0 }
   0x9   :  { %16 = vsyncpa [#allocation7 + $0x1], 0 }
   0xa   :  { %17 = vsyncpa [#allocation10], 0 }
   0xb   :  { %19 = vsyncpa [#allocation10 + $0x1], 0 }
   0xc   :  { %20 = vsyncpa [#allocation5], 0 }
   0xd   :  { %22 = vsyncpa [#allocation5 + $0x1], 0  ;;  %s4957_s21 = smov 0   ;;  %s4959_s22 = smov 0  }
   0xe   :  { %s4961_s23 = smov 0   ;;  %s4963_s24 = smov 0  }
   0xf   :  { %s4965_s25 = smov 0   ;;  %s4967_s26 = smov 0  }
  0x10   :  { %s4969_s27 = smov 0  }
  0x11 LB: > { %5912 = sst [smem:[#allocation17_spill]] %s4898_s24  ;;  %s4991_s28 = sadd.s32 4294967295, %s4910_s27   ;;  %s4910_s27 = sphi %s4969_s27, %s5943_s27   ;;  %s4906_s26 = sphi %s4967_s26, %s5951_s26   ;;  %s4902_s25 = sphi %s4965_s25, %s5950_s25   ;;  %s4898_s24 = sphi %s4963_s24, %s5949_s24   ;;  %s4894_s23 = sphi %s4961_s23, %s5948_s23   ;;  %s4890_s22 = sphi %s4959_s22, %s5947_s22   ;;  %s4886_s21 = sphi %s4957_s21, %s5946_s21  }
  0x12   : > { %s3454_s29 = sadd.s32 4294967294, %s4910_s27   ;;  %s4995_s30 = sadd.s32 1, %s4910_s27  }
  0x13   : > { %5913 = sst [smem:[#allocation18_spill]] %s4995_s30  ;;  %s35_s7 = sadd.s32 1, %s4906_s26 }
  0x14   : > { %s32_s8 = ssub.s32 %s4910_s27, %s4995_s30  ;;  %p42_p0 = scmp.ne.s32.totalorder %s4906_s26, %s4902_s25 }
  0x15   : > { %p33_p1 = scmp.eq.s32.totalorder %s32_s8, 0  ;;  %p43_p2 = scmp.eq.s32.totalorder %s4910_s27, 0 }
  0x16   : > { %p48_p3 = scmp.ne.s32.totalorder %s4902_s25, %s4898_s24  ;;  %p5902_p4 = scmp.eq.s32.totalorder %s4991_s28, 0 }
  0x17   : > { %s5007_s9 = scalar_select %p33_p1, %s4906_s26, %s35_s7  }
  0x18   : > { %p5014_p5 = por %p43_p2, %p42_p0  ;;  %p5023_p6 = por %p5902_p4, %p48_p3 }
  0x19   : > { %5914 = sst [smem:[#allocation19_spill]] %s5007_s9  ;;  %s4283_s12 = sshll.u32 %s4910_s27, 2 }
  0x1a   : > { %s5916_s11 = scalar_select %p5023_p6, 1, 0 }
  0x1b   : > { %s65_s13 = sadd.s32 1, %s4894_s23  ;;  %s4284_s14 = sadd.s32 4, %s4283_s12 }
  0x1c   : > { %p72_p7 = scmp.ne.s32.totalorder %s4894_s23, %s4890_s22  ;;  %s4286_s15 = sadd.s32 4, %s4284_s14 }
  0x1d   : > { %p78_p8 = scmp.ne.s32.totalorder %s4890_s22, %s4886_s21  ;;  %s62_s16 = ssub.s32 %s4284_s14, %s4286_s15 }
  0x1e   : > { %p5034_p9 = por %p72_p7, %p43_p2  ;;  %p63_p10 = scmp.eq.s32.totalorder %s62_s16, 0 }
  0x1f   : > { %p5040_p11 = por %p78_p8, %p5902_p4  ;;  %p191_p12 = scmp.eq.s32.totalorder %s4991_s28, 3 }
  0x20   : > { %p197_p13 = scmp.eq.s32.totalorder %s3454_s29, 3  ;;  %p3457_p7 = scmp.ge.s32.totalorder %s4910_s27, 1 }
  0x21   : > { %s5918_s18 = scalar_select %p5040_p11, 1, 0 }
  0x22   : > { %s5046_s19 = scalar_select %p63_p10, %s4894_s23, %s65_s13  }
  0x23   : > { %p5051_p1 = por %p191_p12, %p42_p0  ;;  %p5058_p2 = por %p197_p13, %p48_p3 }
  0x24   : > { %5919 = sst [smem:[#allocation20_spill]] %s5046_s19  ;;  %p204_p6 = scmp.lt.s32.totalorder %s4910_s27, 5 }
  0x25   : > { %s5920_s20 = scalar_select %p5051_p1, 1, 0 }
  0x26   : > { %s5922_s21 = scalar_select %p5058_p2, 1, 0 }
  0x27   : > { %5921 = sst [smem:[#allocation21_spill]] %s5920_s20  ;;  %p5067_p8 = pnand %p3457_p7, %p204_p6 }
  0x28   : > { %5923 = sst [smem:[#allocation22_spill]] %s5922_s21  ;;  %s4912_s13 = smov [#allocation8]  }
  0x29   : > { %s5924_s2 = sld [smem:[#allocation24_spill]]  ;;  %p4605_p0 = pneg %p5067_p8 }
  0x2a   : > { %s217_s14 = sshll.u32 %s4912_s13, 4  ;;  %s4913_s15 = smov 64   ;;  %s218_s14 = int_to_ptr.vmem [resolvable:$true] %s217_s14 }
  0x2b   : > { %p4606_p3 = pnand %p4605_p0, %p5902_p4  ;;  %s4914_s16 = smov 4  }
  0x2c   : > { %p3459_p10 = scmp.ge.s32.totalorder %s4910_s27, 4 }
  0x2e   : > { %233 = sbr.rel (%p3459_p10) target bundleno = 127 (0x7f), region = 28 }
  0x2f   : > { %s215_s12 = sshll.u32 %s5924_s2, 4  ;;  %s216_s12 = int_to_ptr.hbm [resolvable:$true] %s215_s12 }
  0x30   : > { %4608 = dma.hbm_to_vmem [thread:$0]  (!%p4606_p3), %s216_s12, 9216, %s218_s14, [#allocation7], %s4913_s15, %s4913_s15, %s4914_s16  }
  0x33   : > { %236 = sbr.rel (!%p5014_p5) target bundleno = 94 (0x5e), region = 32  ;;  %s237_s7 = sand.u32 (%p5014_p5), 1, %s4906_s26  }
  0x34   : > { %s3461_s8 = sshll.u32 (%p5014_p5), %s4910_s27, 4  ;;  %s3460_s2 = sshll.u32 (%p5014_p5), %s237_s7, 6 }
  0x35   : > { %s243_s9 = ssub.s32 (%p5014_p5), 68, %s3461_s8  ;;  %s5083_s12 = scalar_lea.sflag (%p5014_p5), [#allocation4], %s237_s7 }
  0x36   : > { %p244_p6 = scmp.lt.s32.totalorder (%p5014_p5), %s243_s9, 16  ;;  %s241_s14 = scalar_lea.vmem (%p5014_p5), [#allocation3], %s3460_s2 }
  0x38   : > { %s5953_s9 = smov (!%p244_p6, %s243_s9), 16 }
  0x39   : > { %s3462_s13 = sshll.u32 %s5953_s9, 2 }
  0x3a   : > { %s247_s19 = ssub.s32 64, %s3462_s13 }
  0x3b   : > { %s248_s30 = sshll.u32 %s247_s19, 4 }
  0x3c   : > { %249 = vsyncadd %s5083_s12, %s248_s30  ;;  %p5086_p12 = scmp.ne.s32.totalorder %s3462_s13, 0  ;;  %s4287_s16 = sshll.u32 %s4910_s27, 6 }
  0x3d   : > { %s5927_s0 = sld [smem:[#allocation23_spill]]  ;;  %s5094_s20 = sshll.u32 %s241_s14, 4  ;;  %s257_s20 = int_to_ptr.vmem [resolvable:$true] %s5094_s20 }
  0x3e   : > { %s5903_s2 = sshll.u32 %s5953_s9, 6 }
  0x3f   : > { %s4715_s7 = sshrl.u32 %s5903_s2, 4 }
  0x43   : > { %s252_s24 = scalar_lea.hbm %s5927_s0, %s4287_s16  ;;  %s4724_s14 = scalar_lea.hbm %s5927_s0, 272 }
  0x44   : > { %s254_s19 = sshll.u32 %s252_s24, 4  ;;  %s5097_s19 = int_to_ptr.hbm [resolvable:$true] %s254_s19 }
  0x45   : > { %s4713_s30 = sshra.s32 %s5097_s19, 4  ;;  %s4714_s30 = int_to_ptr.hbm [resolvable:$true] %s4713_s30 }
  0x46   : > { %s4720_s13 = scalar_lea.hbm %s4714_s30, %s4715_s7  ;;  %p4725_p3 = scmp.lt.s32.totalorder %s4714_s30, %s5927_s0 }
  0x47   : > { %p4721_p13 = scmp.ne.s32.totalorder %s4714_s30, %s4720_s13  ;;  %p4726_p10 = scmp.lt.s32.totalorder %s4724_s14, %s4720_s13 }
  0x49   : > { %p4722_p7 = pnand %p4721_p13, %p5086_p12  ;;  %p4727_p6 = por %p4726_p10, %p4725_p3 }
  0x4b   : > { %p4723_p0 = pneg %p4722_p7 }
  0x4d   : > { %p4728_p4 = pnand %p4727_p6, %p4723_p0 }
  0x4f   : > { %4731 = shalt.err (!%p4728_p4)
}
  0x50   : > { %s4732_s2 = sshra.s32 %s257_s20, 4  ;;  %s4915_s21 = smov [#allocation3]   ;;  %s4733_s2 = int_to_ptr.vmem [resolvable:$true] %s4732_s2 }
  0x51   : > { %s4739_s6 = scalar_lea.vmem %s4733_s2, %s4715_s7  ;;  %s4743_s16 = scalar_lea.vmem %s4915_s21, 128 }
  0x52   : > { %p4740_p13 = scmp.ne.s32.totalorder %s4733_s2, %s4739_s6  ;;  %p4745_p1 = scmp.lt.s32.totalorder %s4743_s16, %s4739_s6 }
  0x54   : > { %p4741_p7 = pnand %p4740_p13, %p5086_p12 }
  0x56   : > { %p4742_p2 = pneg %p4741_p7 }
  0x58   : > { %p4747_p11 = pnand %p4745_p1, %p4742_p2 }
  0x5a   : > { %4750 = shalt.err (!%p4747_p11)
}
  0x5b   : > { %s4916_s30 = smov 64   ;;  %s4917_s13 = smov 4  }
  0x5c   : > { %s5928_s14 = sshll.u32 %s5953_s9, 6 }
  0x5d   : > { %262 = dma.hbm_to_vmem [thread:$0]  (%p5086_p12), %s5097_s19, %s5928_s14, %s257_s20, %s5083_s12, %s4916_s30, %s4916_s30, %s4917_s13  }
  0x5e PF: > { %s266_s2 = sand.u32 1, %s4910_s27   ;;  %s268_s6 = sand.u32 1, %s4894_s23  }
  0x5f   : > { %s3467_s7 = sshll.u32 %s268_s6, 4  ;;  %s3468_s8 = sshll.u32 %s4910_s27, 6 }
  0x60   : > { %s3367_s16 = scalar_lea.hbm %s5889_s1, %s3468_s8  ;;  %s270_s0 = scalar_lea.vmem [#allocation6], %s3467_s7 }
  0x61   : > { %s280_s4 = sshll.u32 %s270_s0, 4  ;;  %s3368_s3 = scalar_lea.hbm %s3367_s16, 64  ;;  %s281_s4 = int_to_ptr.vmem [resolvable:$true] %s280_s4 }
  0x62   : > { %s278_s15 = sshll.u32 %s3368_s3, 4  ;;  %s267_s9 = scalar_lea.sflag [#allocation7], %s266_s2  ;;  %s279_s15 = int_to_ptr.hbm [resolvable:$true] %s278_s15 }
  0x63   : > { %s4752_s20 = sshra.s32 %s279_s15, 4  ;;  %s4758_s13 = scalar_lea.hbm %s5889_s1, 272  ;;  %s4753_s20 = int_to_ptr.hbm [resolvable:$true] %s4752_s20 }
  0x64   : > { %s4754_s12 = scalar_lea.hbm %s4753_s20, 16  ;;  %p4759_p2 = scmp.lt.s32.totalorder %s4753_s20, %s5889_s1 }
  0x65   : > { %p4755_p4 = scmp.ne.s32.totalorder %s4753_s20, %s4754_s12  ;;  %p4760_p12 = scmp.lt.s32.totalorder %s4758_s13, %s4754_s12 }
  0x67   : > { %p4756_p11 = pnand %p4755_p4, %p5034_p9  ;;  %p4761_p0 = por %p4760_p12, %p4759_p2 }
  0x69   : > { %p4757_p1 = pneg %p4756_p11 }
  0x6b   : > { %p4762_p3 = pnand %p4761_p0, %p4757_p1 }
  0x6d   : > { %4765 = shalt.err (!%p4762_p3)
}
  0x6e   : > { %s4918_s0 = smov 64   ;;  %s4919_s3 = smov 4  }
  0x6f   : > { %4596 = dma.hbm_to_vmem [thread:$0]  (%p5034_p9), %s279_s15, 256, %s281_s4, %s267_s9, %s4918_s0, %s4918_s0, %s4919_s3  }
  0x70   : > { %s290_s2 = sand.u32 1, %s4906_s26   ;;  %s299_s21 = scalar_lea.hbm %s5893_s5, %s3468_s8 }
  0x71   : > { %s3469_s16 = sshll.u32 %s290_s2, 6  ;;  %s300_s19 = sshll.u32 %s299_s21, 4  ;;  %s301_s19 = int_to_ptr.hbm [resolvable:$true] %s300_s19 }
  0x72   : > { %s294_s20 = scalar_lea.vmem [#allocation9], %s3469_s16  ;;  %s291_s30 = scalar_lea.sflag [#allocation10], %s290_s2 }
  0x73   : > { %s302_s12 = sshll.u32 %s294_s20, 4  ;;  %s4780_s13 = sshra.s32 %s301_s19, 4  ;;  %s303_s12 = int_to_ptr.vmem [resolvable:$true] %s302_s12  ;;  %s4781_s13 = int_to_ptr.hbm [resolvable:$true] %s4780_s13 }
  0x74   : > { %s4782_s14 = scalar_lea.hbm %s4781_s13, 64  ;;  %s4786_s15 = scalar_lea.hbm %s5893_s5, 256 }
  0x75   : > { %p4783_p10 = scmp.ne.s32.totalorder %s4781_s13, %s4782_s14  ;;  %p4787_p9 = scmp.lt.s32.totalorder %s4781_s13, %s5893_s5 }
  0x76   : > { %p4788_p7 = scmp.lt.s32.totalorder %s4786_s15, %s4782_s14 }
  0x77   : > { %p4784_p6 = pnand %p4783_p10, %p5014_p5 }
  0x78   : > { %p4789_p4 = por %p4788_p7, %p4787_p9 }
  0x79   : > { %p4785_p13 = pneg %p4784_p6 }
  0x7b   : > { %p4790_p11 = pnand %p4789_p4, %p4785_p13 }
  0x7d   : > { %4793 = shalt.err (!%p4790_p11)
}
  0x7e   : > { %4597 = dma.hbm_to_vmem [thread:$0]  (%p5014_p5), %s301_s19, 1024, %s303_s12, %s291_s30, %s4918_s0, %s4918_s0, %s4919_s3  }
  0x7f PF: > { %314 = sbr.rel (%p5067_p8) target bundleno = 606 (0x25e), region = 44  ;;  %s5156_s6 = sand.u32 (!%p5067_p8), 1, %s4902_s25  }
  0x80   : > { %s3473_s2 = sshll.u32 (!%p5067_p8), %s5156_s6, 6  ;;  %s317_s7 = scalar_lea.sflag (!%p5067_p8), [#allocation4], %s5156_s6 }
  0x81   : > { %s5160_s24 = scalar_lea.vmem (!%p5067_p8), [#allocation3], %s3473_s2  ;;  %p5929_p1 = scmp.ne.s32.totalorder (!%p5067_p8), %s5916_s11, 0 }
  0x84   : > { %4865 = dma.done.wait (%p5929_p1), %s317_s7, 1024  }
  0x85   : > { %4867 = vsyncadd (%p5929_p1), %s317_s7, 4294966272  ;;  %s326_s10 = sand.u32 1, %s4991_s28   ;;  %s328_s29 = sand.u32 1, %s4890_s22  }
  0x86   : > { %s3474_s0 = sshll.u32 %s328_s29, 4  ;;  %s327_s3 = scalar_lea.sflag [#allocation7], %s326_s10 }
  0x87   : > { %s5168_s21 = scalar_lea.vmem [#allocation6], %s3474_s0  ;;  %p5930_p5 = scmp.ne.s32.totalorder %s5918_s18, 0 }
  0x89   : > { %4869 = dma.done.wait (%p5930_p5), %s327_s3, 256  }
  0x8a   : > { %4871 = vsyncadd (%p5930_p5), %s327_s3, 4294967040  ;;  %p5931_p8 = scmp.eq.s32.totalorder %s4991_s28, 0 }
  0x8c   : > { %4873 = dma.done.wait (%p5931_p8), [#allocation7], 9216   ;;  %p5932_p2 = pmov %p5931_p8 }
  0x8d   : > { %s342_s16 = scalar_lea.sflag [#allocation10], %s5156_s6  ;;  %s5179_s19 = scalar_lea.vmem [#allocation9], %s3473_s2 }
  0x8e   : > { %4875 = vsyncadd (%p5932_p2), [#allocation7], 4294958080 }
  0x8f   : > { %4877 = dma.done.wait (%p5929_p1), %s342_s16, 1024  }
  0x90   : > { %4879 = vsyncadd (%p5929_p1), %s342_s16, 4294966272  ;;  %v4424_v0 = vld [vmem:[#allocation8 + $0x38] sm:$0xff]  ;;  %v4423_v1 = vld [vmem:[#allocation8 + $0x30] sm:$0xff]  ;;  %vm484_vm0 = vsmask.f32 7424  ;;  %vm682_vm1 = vcmask 1046528  }
  0x91   : > { %4570 = vmatpush.bf16.msra.mxu1 %v4424_v0  ;;  %4571 = vmatpush.bf16.msra.mxu2 %v4424_v0  ;;  %v399_v2 = vld [vmem:[%s5160_s24 + $0x10] sm:$0xf]  ;;  %v400_v3 = vld [vmem:[%s5160_s24 + $0x14] sm:$0xf]  ;;  %v403_v4 = vld [vmem:[%s5160_s24 + $0x20] sm:$0xf] }
  0x92   : > { %4572 = vmatpush.bf16.msra.mxu3 %v4424_v0  ;;  %2748 = vmatpush.bf16.msra.mxu0 %v4424_v0  ;;  %415 = vst [vmem:[#allocation2 + $0x90] sm:$0xf] %v399_v2  ;;  %v404_v5 = vld [vmem:[%s5160_s24 + $0x24] sm:$0xf]  ;;  %v407_v6 = vld [vmem:[%s5160_s24 + $0x30] sm:$0xf] }
  0x93   : > { %416 = vst [vmem:[#allocation2 + $0xb4] sm:$0xf] %v400_v3  ;;  %v408_v7 = vld [vmem:[%s5160_s24 + $0x34] sm:$0xf]  ;;  %v4422_v8 = vld [vmem:[#allocation8 + $0x28] sm:$0xff]  ;;  %v4421_v12 = vld [vmem:[#allocation8 + $0x20] sm:$0xff] }
  0x94   : > { %419 = vst [vmem:[#allocation2 + $0x120] sm:$0xf] %v403_v4  ;;  %v395_v9 = vld [vmem:[%s5160_s24] sm:$0xf]  ;;  %v396_v10 = vld [vmem:[%s5160_s24 + $0x4] sm:$0xf] }
  0x95   : > { %4573 = vmatpush.bf16.msra.mxu1 %v4423_v1  ;;  %4574 = vmatpush.bf16.msra.mxu2 %v4423_v1  ;;  %420 = vst [vmem:[#allocation2 + $0x144] sm:$0xf] %v404_v5  ;;  %v401_v11 = vld [vmem:[%s5160_s24 + $0x18] sm:$0xf]  ;;  %v402_v13 = vld [vmem:[%s5160_s24 + $0x1c] sm:$0xf] }
  0x96   : > { %4575 = vmatpush.bf16.msra.mxu3 %v4423_v1  ;;  %2749 = vmatpush.bf16.msra.mxu0 %v4423_v1  ;;  %423 = vst [vmem:[#allocation2 + $0x1b0] sm:$0xf] %v407_v6  ;;  %v405_v14 = vld [vmem:[%s5160_s24 + $0x28] sm:$0xf]  ;;  %v406_v15 = vld [vmem:[%s5160_s24 + $0x2c] sm:$0xf] }
  0x97   : > { %424 = vst [vmem:[#allocation2 + $0x1d4] sm:$0xf] %v408_v7  ;;  %v4420_v16 = vld [vmem:[#allocation8 + $0x18] sm:$0xff]  ;;  %v4289_v19 = vld [vmem:[%s5160_s24] sm:$0xff]  ;;  %v4419_v20 = vld [vmem:[#allocation8 + $0x10] sm:$0xff]  ;;  %vm826_vm2 = vcmask 1044480  }
  0x98   : > { %411 = vst [vmem:[#allocation2] sm:$0xf] %v395_v9  ;;  %v409_v17 = vld [vmem:[%s5160_s24 + $0x38] sm:$0xf]  ;;  %v410_v18 = vld [vmem:[%s5160_s24 + $0x3c] sm:$0xf] }
  0x99   : > { %4576 = vmatpush.bf16.msra.mxu1 %v4422_v8  ;;  %4577 = vmatpush.bf16.msra.mxu2 %v4422_v8  ;;  %412 = vst [vmem:[#allocation2 + $0x24] sm:$0xf] %v396_v10  ;;  %v397_v21 = vld [vmem:[%s5160_s24 + $0x8] sm:$0xf]  ;;  %v398_v22 = vld [vmem:[%s5160_s24 + $0xc] sm:$0xf] }
  0x9a   : > { %4578 = vmatpush.bf16.msra.mxu3 %v4422_v8  ;;  %2750 = vmatpush.bf16.msra.mxu0 %v4422_v8  ;;  %417 = vst [vmem:[#allocation2 + $0xd8] sm:$0xf] %v401_v11  ;;  %v486_v23 = vshrl.u32 %v4289_v19, 16  ;;  %v488_v24 = vshll.u32 %v4289_v19, 16  ;;  %v4418_v25 = vld [vmem:[#allocation8 + $0x8] sm:$0xff]  ;;  %v4417_v44 = vld [vmem:[#allocation8] sm:$0xff] }
  0x9b   : > { %418 = vst [vmem:[#allocation2 + $0xfc] sm:$0xf] %v402_v13  ;;  %v5202_v26 = vld [vmem:[#allocation2 + $0x90] sm:$0xf]  ;;  %v5205_v27 = vld [vmem:[%s5160_s24 + $0x8] sm:$0xff]  ;;  %v4440_v54 = vld [vmem:[#allocation8 + $0xb8] sm:$0xff] }
  0x9c   : > { %421 = vst [vmem:[#allocation2 + $0x168] sm:$0xf] %v405_v14  ;;  %v5207_v28 = vld [vmem:[#allocation2 + $0xb0] sm:$0xf0]  ;;  %v5209_v29 = vld [vmem:[#allocation2 + $0x120] sm:$0xf] }
  0x9d   : > { %4579 = vmatpush.bf16.msra.mxu1 %v4421_v12  ;;  %4580 = vmatpush.bf16.msra.mxu2 %v4421_v12  ;;  %422 = vst [vmem:[#allocation2 + $0x18c] sm:$0xf] %v406_v15  ;;  %v490_v30 = vrot.slane %v488_v24, 1  ;;  %v5212_v31 = vld [vmem:[%s5160_s24 + $0x8] sm:$0xff]  ;;  %v5214_v32 = vld [vmem:[#allocation2 + $0x140] sm:$0xf0]  ;;  %v3777_v45 = vor.u32 %v5207_v28, %v5202_v26 }
  0x9e   : > { %4581 = vmatpush.bf16.msra.mxu3 %v4421_v12  ;;  %2751 = vmatpush.bf16.msra.mxu0 %v4421_v12  ;;  %425 = vst [vmem:[#allocation2 + $0x1f8] sm:$0xf] %v409_v17  ;;  %v493_v33 = vshll.u32 %v5205_v27, 16  ;;  %v3512_v34 = vld [vmem:[%s5160_s24] sm:$0xe]  ;;  %v5231_v43 = vld [vmem:[%s5160_s24 + $0xc] sm:$0xff]  ;;  %v3849_v46 = vor.u32 %v5214_v32, %v5209_v29 }
  0x9f   : > { %426 = vst [vmem:[#allocation2 + $0x21c] sm:$0xf] %v410_v18  ;;  %v5218_v35 = vld [vmem:[#allocation2 + $0x1b0] sm:$0xf]  ;;  %v5220_v36 = vld [vmem:[#allocation2 + $0x1d0] sm:$0xf0]  ;;  %v491_v39 = vor.u32 %v490_v30, %v486_v23 }
  0xa0   : > { %413 = vst [vmem:[#allocation2 + $0x48] sm:$0xf] %v397_v21  ;;  %v5222_v37 = vld [vmem:[#allocation2] sm:$0xf]  ;;  %v5224_v38 = vld [vmem:[#allocation2 + $0x20] sm:$0xf0]  ;;  %v3921_v60 = vor.u32 %v5220_v36, %v5218_v35 }
  0xa1   : > { %4582 = vmatpush.bf16.msra.mxu1 %v4420_v16  ;;  %4583 = vmatpush.bf16.msra.mxu2 %v4420_v16  ;;  %414 = vst [vmem:[#allocation2 + $0x6c] sm:$0xf] %v398_v22  ;;  %v5226_v40 = vrot.slane %v493_v33, 1  ;;  %v4297_v41 = vld [vmem:[%s5160_s24] sm:$0xf0]  ;;  %v684_v48 = vrot.slane %v5212_v31, 1  ;;  %v3705_v62 = vor.u32 %v5224_v38, %v5222_v37 }
  0xa2   : > { %4584 = vmatpush.bf16.msra.mxu3 %v4420_v16  ;;  %2752 = vmatpush.bf16.msra.mxu0 %v4420_v16  ;;  %v3544_v42 = vld [vmem:[%s5160_s24 + $0x4] sm:$0x8]  ;;  %v3513_v47 = vor.u32 %v4297_v41, %v3512_v34  ;;  %v4305_v49 = vld [vmem:[%s5160_s24 + $0x4] sm:$0xf0]  ;;  %v828_v53 = vrot.slane %v5231_v43, 3  ;;  %v4432_v55 = vld [vmem:[#allocation8 + $0x78] sm:$0xff] }
  0xa3   : > { %v3576_v50 = vld [vmem:[%s5160_s24 + $0x4] sm:$0x8]  ;;  %v496_v51 = vsel %vm484_vm0, %v491_v39, %v5226_v40  ;;  %v3545_v52 = vor.u32 %v4305_v49, %v3544_v42  ;;  %v4313_v59 = vld [vmem:[%s5160_s24 + $0x4] sm:$0xf0]  ;;  %v4448_v61 = vld [vmem:[#allocation8 + $0xf8] sm:$0xff]  ;;  %v497_v35 = vshrl.u32 %v5205_v27, 16 }
  0xa4   : > { %v561_v56 = vunpack.c.l.b16 %v496_v51  ;;  %v562_v57 = vunpack.c.h.b16 %v496_v51  ;;  %v683_v58 = vrot.slane %v3513_v47, 1  ;;  %v4314_v0 = vld [vmem:[%s5160_s24 + $0xc] sm:$0xff]  ;;  %v3577_v1 = vor.u32 %v4313_v59, %v3576_v50  ;;  %v4456_v2 = vld [vmem:[#allocation8 + $0x138] sm:$0xff]  ;;  %v4437_v50 = vld [vmem:[#allocation8 + $0xa0] sm:$0xff]  ;;  %s5935_s20 = sld [smem:[#allocation25_spill]]  ;;  %s3477_s14 = sshll.u32 %s5156_s6, 7 }
  0xa5   : > { %4585 = vmatpush.bf16.msra.mxu1 %v4419_v20  ;;  %4586 = vmatpush.bf16.msra.mxu2 %v4419_v20  ;;  %v827_v63 = vrot.slane %v3545_v52, 3  ;;  %v4439_v6 = vld [vmem:[#allocation8 + $0xb0] sm:$0xff]  ;;  %v982_v16 = vshrl.u32 %v4314_v0, 16  ;;  %v985_v22 = vshll.u32 %v4314_v0, 16  ;;  %v4438_v26 = vld [vmem:[#allocation8 + $0xa8] sm:$0xff]  ;;  %v499_v42 = vor.u32 %v497_v35, %v5226_v40  ;;  %v4429_v43 = vld [vmem:[#allocation8 + $0x60] sm:$0xff] }
  0xa6   : > { %4587 = vmatpush.bf16.msra.mxu3 %v4419_v20  ;;  %2753 = vmatpush.bf16.msra.mxu0 %v4419_v20  ;;  %v577_v3 = vpack.c.b16 %v561_v56, %v561_v56  ;;  %v578_v4 = vpack.c.b16 %v562_v57, %v562_v57  ;;  %v685_v5 = vsel %vm682_vm1, %v683_v58, %v684_v48  ;;  %v4431_v7 = vld [vmem:[#allocation8 + $0x70] sm:$0xff]  ;;  %v974_v11 = vshrl.u32 %v3577_v1, 16  ;;  %v4430_v33 = vld [vmem:[#allocation8 + $0x68] sm:$0xff]  ;;  %v4445_v59 = vld [vmem:[#allocation8 + $0xe0] sm:$0xff]  ;;  %s5936_s13 = sld [smem:[#allocation26_spill]]  ;;  %s5777_s4 = scalar_lea.vmem [#allocation11], %s3477_s14 }
  0xa7   : > { %v707_v8 = vunpack.c.l.b16 %v685_v5  ;;  %v708_v9 = vunpack.c.h.b16 %v685_v5  ;;  %v829_v10 = vsel %vm826_vm2, %v827_v63, %v828_v53  ;;  %v5256_v12 = vld [vmem:[%s5160_s24 + $0x10] sm:$0xff]  ;;  %v977_v15 = vshll.u32 %v3577_v1, 16  ;;  %v4446_v40 = vld [vmem:[#allocation8 + $0xe8] sm:$0xff]  ;;  %v3956_v1 = vld [vmem:[#allocation2 + $0x1f8] sm:$0xf]  ;;  %s4489_s17 = sshll.u32 %s4991_s28, 7 }
  0xa8   : > { %609 = vst [vmem:[#allocation2 + $0x4] sm:$0xf] %v577_v3  ;;  %v853_v13 = vunpack.c.l.b16 %v829_v10  ;;  %v854_v14 = vunpack.c.h.b16 %v829_v10  ;;  %v5259_v17 = vld [vmem:[%s5160_s24 + $0x10] sm:$0xff]  ;;  %v976_v21 = vrot.slane %v974_v11, 3  ;;  %v984_v32 = vrot.slane %v982_v16, 3  ;;  %v4454_v49 = vld [vmem:[#allocation8 + $0x128] sm:$0xff] }
  0xa9   : > { %4588 = vmatpush.bf16.msra.mxu1 %v4418_v25  ;;  %4589 = vmatpush.bf16.msra.mxu2 %v4418_v25  ;;  %v5262_v18 = vld [vmem:[%s5160_s24 + $0x14] sm:$0xff]  ;;  %610 = vst [vmem:[#allocation2 + $0x28] sm:$0xf] %v578_v4  ;;  %v723_v19 = vpack.c.b16 %v707_v8, %v707_v8  ;;  %v724_v20 = vpack.c.b16 %v708_v9, %v708_v9  ;;  %v979_v30 = vrot.slane %v977_v15, 4  ;;  %v987_v34 = vrot.slane %v985_v22, 4  ;;  %v5307_v35 = vld [vmem:[%s5160_s24 + $0x1c] sm:$0xff] }
  0xaa   : > { %4590 = vmatpush.bf16.msra.mxu3 %v4418_v25  ;;  %2754 = vmatpush.bf16.msra.mxu0 %v4418_v25  ;;  %v5265_v23 = vld [vmem:[%s5160_s24 + $0x14] sm:$0xff]  ;;  %v869_v28 = vpack.c.b16 %v853_v13, %v853_v13  ;;  %v870_v29 = vpack.c.b16 %v854_v14, %v854_v14  ;;  %v501_v36 = vshll.u32 %v5256_v12, 16  ;;  %vm972_vm3 = vsmask.f32 4352  ;;  %v3740_v3 = vld [vmem:[#allocation2 + $0x48] sm:$0xf] }
  0xab   : > { %v4447_v24 = vld [vmem:[#allocation8 + $0xf0] sm:$0xff]  ;;  %755 = vst [vmem:[#allocation2 + $0x8] sm:$0xf] %v723_v19  ;;  %v980_v37 = vor.u32 %v979_v30, %v976_v21  ;;  %v686_v38 = vrot.slane %v5259_v17, 1  ;;  %v830_v39 = vrot.slane %v5262_v18, 3  ;;  %v5271_v41 = vor.u32 %v987_v34, %v984_v32  ;;  %v4436_v13 = vld [vmem:[#allocation8 + $0x98] sm:$0xff] }
  0xac   : > { %v4455_v25 = vld [vmem:[#allocation8 + $0x130] sm:$0xff]  ;;  %756 = vst [vmem:[#allocation2 + $0x2c] sm:$0xf] %v724_v20  ;;  %v991_v27 = vshrl.u32 %v5265_v23, 16  ;;  %v994_v47 = vshll.u32 %v5265_v23, 16  ;;  %v4428_v14 = vld [vmem:[#allocation8 + $0x58] sm:$0xff] }
  0xad   : > { %4591 = vmatpush.bf16.msra.mxu1 %v4417_v44  ;;  %4592 = vmatpush.bf16.msra.mxu2 %v4417_v44  ;;  %901 = vst [vmem:[#allocation2 + $0xc] sm:$0xf] %v869_v28  ;;  %v989_v51 = vsel %vm972_vm3, %v980_v37, %v5271_v41  ;;  %v4358_v8 = vld [vmem:[#allocation2 + $0x68] sm:$0xf0]  ;;  %v5295_v22 = vld [vmem:[%s5160_s24 + $0x18] sm:$0xff]  ;;  %v505_v32 = vshrl.u32 %v5256_v12, 16 }
  0xae   : > { %4593 = vmatpush.bf16.msra.mxu3 %v4417_v44  ;;  %2755 = vmatpush.bf16.msra.mxu0 %v4417_v44  ;;  %v5274_v44 = vrot.slane %v501_v36, 1  ;;  %902 = vst [vmem:[#allocation2 + $0x30] sm:$0xf] %v870_v29  ;;  %v1064_v56 = vunpack.c.h.b16 %v989_v51  ;;  %v993_v0 = vrot.slane %v991_v27, 3  ;;  %v996_v11 = vrot.slane %v994_v47, 4  ;;  %v4316_v23 = vld [vmem:[%s5160_s24 + $0x1c] sm:$0xff] }
  0xaf   : > { %v4452_v28 = vld [vmem:[#allocation8 + $0x118] sm:$0xff]  ;;  %v4435_v36 = vld [vmem:[#allocation8 + $0x90] sm:$0xff]  ;;  %vm557_vm4 = vcmask 1047552   ;;  %vm848_vm6 = vcmask 1040384   ;;  %vm1059_vm7 = vsmask.f32 256 }
  0xb0   : > { %2766 = vmatmul.bf16.vlgmr.msra.gmra.mxu1 %v3777_v45  ;;  %2776 = vmatmul.bf16.vlgmr.msra.gmra.mxu2 %v3849_v46  ;;  %v687_v45 = vsel %vm682_vm1, %v684_v48, %v686_v38  ;;  %v831_v46 = vsel %vm826_vm2, %v828_v53, %v830_v39  ;;  %v504_v31 = vsel %vm484_vm0, %v499_v42, %v5274_v44  ;;  %v4376_v53 = vld [vmem:[#allocation2 + $0xf8] sm:$0xf0]  ;;  %v4427_v37 = vld [vmem:[#allocation8 + $0x50] sm:$0xff]  ;;  %vm558_vm5 = vmand %vm557_vm4, %vm484_vm0  ;;  %vm1273_vm9 = vcmask 1045504   ;;  %s5937_s8 = sld [smem:[#allocation27_spill]]  ;;  %s3310_s28 = scalar_lea.sflag [#allocation5], %s5156_s6 }
  0xb1   : > { %2846 = vmatpush.bf16.msrb.mxu2 %v4440_v54  ;;  %2797 = vmatpush.bf16.msrb.mxu1 %v4432_v55  ;;  %v709_v48 = vunpack.c.l.b16 %v687_v45  ;;  %v710_v52 = vunpack.c.h.b16 %v687_v45  ;;  %v3812_v54 = vld [vmem:[#allocation2 + $0xd8] sm:$0xf]  ;;  %v1063_v55 = vunpack.c.l.b16 %v989_v51  ;;  %v563_v57 = vunpack.c.l.b16 %v504_v31  ;;  %v4443_v51 = vld [vmem:[#allocation8 + $0xd0] sm:$0xff]  ;;  %vm5482_vm8 = vmand %vm848_vm6, %vm1059_vm7  ;;  %s5938_s7 = sld [smem:[#allocation21_spill]] }
  0xb2   : > { %2786 = vmatmul.bf16.vlgmr.msra.gmra.mxu3 %v3921_v60  ;;  %2756 = vmatmul.bf16.vlgmr.msra.gmra.mxu0 %v3705_v62  ;;  %v564_v58 = vunpack.c.h.b16 %v504_v31  ;;  %v3884_v60 = vld [vmem:[#allocation2 + $0x168] sm:$0xf]  ;;  %v855_v63 = vunpack.c.l.b16 %v831_v46  ;;  %v1080_v5 = vpack.c.b16 %v1064_v56, %v1064_v56  ;;  %v856_v10 = vunpack.c.h.b16 %v831_v46  ;;  %v5304_v34 = vld [vmem:[%s5160_s24 + $0x18] sm:$0xff]  ;;  %v4451_v31 = vld [vmem:[#allocation8 + $0x110] sm:$0xff] }
  0xb3   : > { %2895 = vmatpush.bf16.msrb.mxu3 %v4448_v61  ;;  %2944 = vmatpush.bf16.msrb.mxu0 %v4456_v2  ;;  %v4394_v61 = vld [vmem:[#allocation2 + $0x188] sm:$0xf0]  ;;  %v725_v62 = vpack.c.b16 %v709_v48, %v709_v48  ;;  %v4412_v2 = vld [vmem:[#allocation2 + $0x218] sm:$0xf0]  ;;  %v1079_v4 = vpack.c.b16 %v1063_v55, %v1063_v55  ;;  %v726_v15 = vpack.c.b16 %v710_v52, %v710_v52  ;;  %v1000_v45 = vshrl.u32 %v4316_v23, 16 }
  0xb4   : > { %v580_v9 = vpack.c.b16 %v564_v58, %v564_v58  ;;  %v3813_v16 = vor.u32 %v4376_v53, %v3812_v54  ;;  %v3885_v19 = vor.u32 %v4394_v61, %v3884_v60  ;;  %1112 = vst [vmem:[#allocation2 + $0x34] sm:$0xf] %v1080_v5  ;;  %v871_v20 = vpack.c.b16 %v855_v63, %v855_v63  ;;  %v4434_v54 = vld [vmem:[#allocation8 + $0x88] sm:$0xff] }
  0xb5   : > { %2847 = vmatpush.bf16.msrb.mxu2 %v4439_v6  ;;  %2798 = vmatpush.bf16.msrb.mxu1 %v4431_v7  ;;  %v579_v6 = vpack.c.b16 %v563_v57, %v563_v57  ;;  %v4453_v7 = vld [vmem:[#allocation8 + $0x120] sm:$0xff]  ;;  %757 = vst [vmem:[#allocation2 + $0x50] sm:$0xf] %v725_v62  ;;  %v5292_v21 = vor.u32 %v996_v11, %v993_v0  ;;  %v1003_v46 = vshll.u32 %v4316_v23, 16  ;;  %v688_v47 = vrot.slane %v5304_v34, 1  ;;  %v4426_v53 = vld [vmem:[#allocation8 + $0x48] sm:$0xff] }
  0xb6   : > { %1111 = vst [vmem:[#allocation2 + $0x10] sm:$0xf] %v1079_v4  ;;  %v872_v29 = vpack.c.b16 %v856_v10, %v856_v10  ;;  %v507_v12 = vor.u32 %v505_v32, %v5274_v44  ;;  %v4442_v60 = vld [vmem:[#allocation8 + $0xc8] sm:$0xff]  ;;  %v4433_v62 = vld [vmem:[#allocation8 + $0x80] sm:$0xff]  ;;  %vm1420_vm10 = vsmask.f32 5376  ;;  %s3321_s2 = scalar_lea.hbm %s5937_s8, %s4489_s17 }
  0xb7   : > { %2896 = vmatpush.bf16.msrb.mxu3 %v4447_v24  ;;  %2945 = vmatpush.bf16.msrb.mxu0 %v4455_v25  ;;  %v3957_v24 = vor.u32 %v4412_v2, %v3956_v1  ;;  %v4444_v25 = vld [vmem:[#allocation8 + $0xd8] sm:$0xff]  ;;  %611 = vst [vmem:[#allocation2 + $0x4c] sm:$0xf] %v579_v6  ;;  %v998_v30 = vsel %vm972_vm3, %v5271_v41, %v5292_v21  ;;  %v4450_v61 = vld [vmem:[#allocation8 + $0x108] sm:$0xff]  ;;  %v4425_v0 = vld [vmem:[#allocation8 + $0x40] sm:$0xff]  ;;  %vm1297_vm11 = vcmask 1041408  }
  0xb8   : > { %612 = vst [vmem:[#allocation2 + $0x70] sm:$0xf] %v580_v9  ;;  %v1065_v42 = vunpack.c.l.b16 %v998_v30  ;;  %v1066_v27 = vunpack.c.h.b16 %v998_v30  ;;  %v689_v44 = vsel %vm682_vm1, %v686_v38, %v688_v47  ;;  %v1005_v38 = vrot.slane %v1003_v46, 4  ;;  %v4472_v1 = vld [vmem:[#allocation8 + $0x1b8] sm:$0xff]  ;;  %v4345_v4 = vld [vmem:[#allocation2 + $0x4] sm:$0xf] }
  0xb9   : > { %2848 = vmatpush.bf16.msrb.mxu2 %v4438_v26  ;;  %2799 = vmatpush.bf16.msrb.mxu1 %v4430_v33  ;;  %v3741_v26 = vor.u32 %v4358_v8, %v3740_v3  ;;  %v509_v33 = vshll.u32 %v5295_v22, 16  ;;  %758 = vst [vmem:[#allocation2 + $0x74] sm:$0xf] %v726_v15  ;;  %v711_v57 = vunpack.c.l.b16 %v689_v44  ;;  %v712_v58 = vunpack.c.h.b16 %v689_v44  ;;  %v4464_v2 = vld [vmem:[#allocation8 + $0x178] sm:$0xff]  ;;  %v3706_v5 = vld [vmem:[#allocation2 + $0x24] sm:$0xf0] }
  0xba   : > { %903 = vst [vmem:[#allocation2 + $0x54] sm:$0xf] %v871_v20  ;;  %v4441_v8 = vld [vmem:[#allocation8 + $0xc0] sm:$0xff]  ;;  %v3712_v10 = vld [vmem:[#allocation2 + $0x8] sm:$0xf]  ;;  %v513_v46 = vshrl.u32 %v5295_v22, 16 }
  0xbb   : > { %2897 = vmatpush.bf16.msrb.mxu3 %v4446_v40  ;;  %2946 = vmatpush.bf16.msrb.mxu0 %v4454_v49  ;;  %v5310_v41 = vrot.slane %v509_v33, 1  ;;  %v832_v40 = vrot.slane %v5307_v35, 3  ;;  %904 = vst [vmem:[#allocation2 + $0x78] sm:$0xf] %v872_v29  ;;  %v1081_v49 = vpack.c.b16 %v1065_v42, %v1065_v42  ;;  %v728_v3 = vpack.c.b16 %v712_v58, %v712_v58  ;;  %v4449_v9 = vld [vmem:[#allocation8 + $0x100] sm:$0xff]  ;;  %v4471_v42 = vld [vmem:[#allocation8 + $0x1b0] sm:$0xff] }
  0xbc   : > { %v4350_v11 = vld [vmem:[#allocation2 + $0x28] sm:$0xf0]  ;;  %v3714_v15 = vld [vmem:[#allocation2 + $0x2c] sm:$0xf0]  ;;  %v4351_v20 = vld [vmem:[#allocation2 + $0x30] sm:$0xf0] }
  0xbd   : > { %2849 = vmatpush.bf16.msrb.mxu2 %v4437_v50  ;;  %2800 = vmatpush.bf16.msrb.mxu1 %v4429_v43  ;;  %v1082_v50 = vpack.c.b16 %v1066_v27, %v1066_v27  ;;  %v512_v48 = vsel %vm484_vm0, %v507_v12, %v5310_v41  ;;  %v833_v52 = vsel %vm826_vm2, %v830_v39, %v832_v40  ;;  %v1002_v43 = vrot.slane %v1000_v45, 3  ;;  %v5332_v32 = vld [vmem:[%s5160_s24 + $0x20] sm:$0xff]  ;;  %v4479_v27 = vld [vmem:[#allocation8 + $0x1f0] sm:$0xff]  ;;  %s3324_s10 = sshll.u32 %s3321_s2, 4  ;;  %p5939_p0 = scmp.ne.s32.totalorder %s5938_s7, 0  ;;  %s3325_s10 = int_to_ptr.hbm [resolvable:$true] %s3324_s10 }
  0xbe   : > { %1113 = vst [vmem:[#allocation2 + $0x58] sm:$0xf] %v1081_v49  ;;  %v565_v55 = vunpack.c.l.b16 %v512_v48  ;;  %v566_v56 = vunpack.c.h.b16 %v512_v48  ;;  %v857_v17 = vunpack.c.l.b16 %v833_v52  ;;  %v727_v39 = vpack.c.b16 %v711_v57, %v711_v57  ;;  %v4317_v33 = vld [vmem:[%s5160_s24 + $0x24] sm:$0xff]  ;;  %v4463_v45 = vld [vmem:[#allocation8 + $0x170] sm:$0xff]  ;;  %v4354_v34 = vld [vmem:[#allocation2 + $0x4c] sm:$0xf] }
  0xbf   : > { %2898 = vmatpush.bf16.msrb.mxu3 %v4445_v59  ;;  %2947 = vmatpush.bf16.msrb.mxu0 %v4453_v7  ;;  %1114 = vst [vmem:[#allocation2 + $0x7c] sm:$0xf] %v1082_v50  ;;  %v858_v59 = vunpack.c.h.b16 %v833_v52  ;;  %v5326_v7 = vor.u32 %v1005_v38, %v1002_v43  ;;  %v3713_v29 = vor.u32 %v4350_v11, %v3712_v10  ;;  %v517_v12 = vshll.u32 %v5332_v32, 16  ;;  %v4487_v49 = vld [vmem:[#allocation8 + $0x230] sm:$0xff]  ;;  %v5338_v50 = vld [vmem:[%s5160_s24 + $0x20] sm:$0xff]  ;;  %v4470_v43 = vld [vmem:[#allocation8 + $0x1a8] sm:$0xff] }
  0xc0   : > { %2771 = vmatmul.bf16.gmra.mxu1 %v3813_v16  ;;  %2781 = vmatmul.bf16.gmra.mxu2 %v3885_v19  ;;  %v581_v18 = vpack.c.b16 %v565_v55, %v565_v55  ;;  %v582_v63 = vpack.c.b16 %v566_v56, %v566_v56  ;;  %v873_v6 = vpack.c.b16 %v857_v17, %v857_v17  ;;  %v3720_v19 = vld [vmem:[#allocation2 + $0x10] sm:$0xf]  ;;  %v1009_v44 = vshrl.u32 %v4317_v33, 16  ;;  %v4486_v57 = vld [vmem:[#allocation8 + $0x228] sm:$0xff]  ;;  %s4822_s29 = sshra.s32 %s3325_s10, 4  ;;  %s4828_s16 = scalar_lea.hbm %s5937_s8, 512  ;;  %s4823_s29 = int_to_ptr.hbm [resolvable:$true] %s4822_s29 }
  0xc1   : > { %2850 = vmatpush.bf16.msrb.mxu2 %v4436_v13  ;;  %2801 = vmatpush.bf16.msrb.mxu1 %v4428_v14  ;;  %v874_v13 = vpack.c.b16 %v858_v59, %v858_v59  ;;  %v4346_v14 = vld [vmem:[#allocation2 + $0xc] sm:$0xf]  ;;  %759 = vst [vmem:[#allocation2 + $0x98] sm:$0xf] %v727_v39  ;;  %v1007_v16 = vsel %vm972_vm3, %v5292_v21, %v5326_v7  ;;  %v5344_v48 = vrot.slane %v517_v12, 1  ;;  %v690_v22 = vrot.slane %v5338_v50, 1  ;;  %p4829_p6 = scmp.lt.s32.totalorder %s4823_s29, %s5937_s8 }
  0xc2   : > { %2791 = vmatmul.bf16.gmra.mxu3 %v3957_v24  ;;  %2761 = vmatmul.bf16.gmra.mxu0 %v3741_v26  ;;  %613 = vst [vmem:[#allocation2 + $0x94] sm:$0xf] %v581_v18  ;;  %v1067_v23 = vunpack.c.l.b16 %v1007_v16  ;;  %v1068_v24 = vunpack.c.h.b16 %v1007_v16  ;;  %v4480_v26 = vld [vmem:[#allocation8 + $0x1f8] sm:$0xff]  ;;  %v1011_v55 = vrot.slane %v1009_v44, 3  ;;  %v1012_v56 = vshll.u32 %v4317_v33, 16  ;;  %s4824_s0 = scalar_lea.hbm %s4823_s29, 128 }
  0xc3   : > { %2899 = vmatpush.bf16.msrb.mxu3 %v4444_v25  ;;  %2948 = vmatpush.bf16.msrb.mxu0 %v4452_v28  ;;  %614 = vst [vmem:[#allocation2 + $0xb8] sm:$0xf] %v582_v63  ;;  %v3709_v25 = vor.u32 %v4345_v4, %v3706_v5  ;;  %v4488_v28 = vld [vmem:[#allocation8 + $0x238] sm:$0xff]  ;;  %v691_v59 = vsel %vm682_vm1, %v688_v47, %v690_v22  ;;  %v4359_v4 = vld [vmem:[#allocation2 + $0x70] sm:$0xf0]  ;;  %p4825_p12 = scmp.ne.s32.totalorder %s4823_s29, %s4824_s0  ;;  %p4830_p13 = scmp.lt.s32.totalorder %s4828_s16, %s4824_s0 }
  0xc4   : > { %760 = vst [vmem:[#allocation2 + $0xbc] sm:$0xf] %v728_v3  ;;  %v1083_v21 = vpack.c.b16 %v1067_v23, %v1067_v23  ;;  %v1084_v30 = vpack.c.b16 %v1068_v24, %v1068_v24  ;;  %v3748_v3 = vld [vmem:[#allocation2 + $0x50] sm:$0xf]  ;;  %v5366_v23 = vld [vmem:[%s5160_s24 + $0x28] sm:$0xff] }
  0xc5   : > { %2851 = vmatpush.bf16.msrb.mxu2 %v4435_v36  ;;  %2802 = vmatpush.bf16.msrb.mxu1 %v4427_v37  ;;  %905 = vst [vmem:[#allocation2 + $0x9c] sm:$0xf] %v873_v6  ;;  %v3717_v36 = vor.u32 %v4346_v14, %v3714_v15  ;;  %v3721_v37 = vor.u32 %v4351_v20, %v3720_v19  ;;  %v4355_v6 = vld [vmem:[#allocation2 + $0x54] sm:$0xf]  ;;  %v3756_v10 = vld [vmem:[#allocation2 + $0x58] sm:$0xf]  ;;  %p4826_p3 = pnand %p4825_p12, %p5939_p0  ;;  %p4831_p9 = por %p4830_p13, %p4829_p6 }
  0xc6   : > { %906 = vst [vmem:[#allocation2 + $0xc0] sm:$0xf] %v874_v13  ;;  %v4360_v11 = vld [vmem:[#allocation2 + $0x78] sm:$0xf0]  ;;  %v3749_v16 = vor.u32 %v4359_v4, %v3748_v3  ;;  %v4318_v24 = vld [vmem:[%s5160_s24 + $0x2c] sm:$0xff] }
  0xc7   : > { %2900 = vmatpush.bf16.msrb.mxu3 %v4443_v51  ;;  %2949 = vmatpush.bf16.msrb.mxu0 %v4451_v31  ;;  %1115 = vst [vmem:[#allocation2 + $0xa0] sm:$0xf] %v1083_v21  ;;  %v5341_v51 = vld [vmem:[%s5160_s24 + $0x24] sm:$0xff]  ;;  %v515_v31 = vor.u32 %v513_v46, %v5310_v41  ;;  %v5375_v21 = vld [vmem:[%s5160_s24 + $0x2c] sm:$0xff]  ;;  %vm1494_vm12 = vsmask.f32 1280  ;;  %p4827_p10 = pneg %p4826_p3 }
  0xc8   : > { %1116 = vst [vmem:[#allocation2 + $0xc4] sm:$0xf] %v1084_v30  ;;  %v834_v52 = vrot.slane %v5341_v51, 3  ;;  %v4478_v41 = vld [vmem:[#allocation8 + $0x1e8] sm:$0xff]  ;;  %v4485_v46 = vld [vmem:[#allocation8 + $0x220] sm:$0xff]  ;;  %vm1513_vm13 = vmand %vm1297_vm11, %vm1494_vm12 }
  0xc9   : > { %2852 = vmatpush.bf16.msrb.mxu2 %v4434_v54  ;;  %2803 = vmatpush.bf16.msrb.mxu1 %v4426_v53  ;;  %v4462_v54 = vld [vmem:[#allocation8 + $0x168] sm:$0xff]  ;;  %v520_v53 = vsel %vm484_vm0, %v515_v31, %v5344_v48  ;;  %v1021_v31 = vshll.u32 %v4318_v24, 16  ;;  %v4363_v50 = vld [vmem:[#allocation2 + $0x94] sm:$0xf]  ;;  %v3784_v51 = vld [vmem:[#allocation2 + $0x98] sm:$0xf]  ;;  %p4832_p7 = pnand %p4831_p9, %p4827_p10 }
  0xca   : > { %v567_v58 = vunpack.c.l.b16 %v520_v53  ;;  %v568_v17 = vunpack.c.h.b16 %v520_v53  ;;  %v835_v38 = vsel %vm826_vm2, %v832_v40, %v834_v52  ;;  %v3742_v40 = vld [vmem:[#allocation2 + $0x6c] sm:$0xf0] }
  0xcb   : > { %2901 = vmatpush.bf16.msrb.mxu3 %v4442_v60  ;;  %2950 = vmatpush.bf16.msrb.mxu0 %v4450_v61  ;;  %v713_v60 = vunpack.c.l.b16 %v691_v59  ;;  %v714_v61 = vunpack.c.h.b16 %v691_v59  ;;  %v860_v39 = vunpack.c.h.b16 %v835_v38  ;;  %v3745_v15 = vor.u32 %v4354_v34, %v3742_v40 }
  0xcc   : > { %v583_v18 = vpack.c.b16 %v567_v58, %v567_v58  ;;  %v584_v63 = vpack.c.b16 %v568_v17, %v568_v17  ;;  %v1023_v17 = vrot.slane %v1021_v31, 4 }
  0xcd   : > { %2853 = vmatpush.bf16.msrb.mxu2 %v4433_v62  ;;  %2804 = vmatpush.bf16.msrb.mxu1 %v4425_v0  ;;  %v859_v62 = vunpack.c.l.b16 %v835_v38  ;;  %v1014_v0 = vrot.slane %v1012_v56, 4  ;;  %v876_v5 = vpack.c.b16 %v860_v39, %v860_v39 }
  0xce   : > { %615 = vst [vmem:[#allocation2 + $0xdc] sm:$0xf] %v583_v18  ;;  %v4364_v18 = vld [vmem:[#allocation2 + $0x9c] sm:$0xf] }
  0xcf   : > { %2902 = vmatpush.bf16.msrb.mxu3 %v4441_v8  ;;  %2951 = vmatpush.bf16.msrb.mxu0 %v4449_v9  ;;  %v875_v47 = vpack.c.b16 %v859_v62, %v859_v62  ;;  %v5360_v35 = vor.u32 %v1014_v0, %v1011_v55  ;;  %616 = vst [vmem:[#allocation2 + $0x100] sm:$0xf] %v584_v63  ;;  %v3750_v8 = vld [vmem:[#allocation2 + $0x74] sm:$0xf0]  ;;  %v4368_v62 = vld [vmem:[#allocation2 + $0xb8] sm:$0xf0] }
  0xd0   : > { %2805 = vmatmul.bf16.vlgmr.msrb.gmra.mxu1 %v3709_v25  ;;  %2854 = vmatmul.bf16.vlgmr.msrb.gmra.mxu2 %v3713_v29  ;;  %908 = vst [vmem:[#allocation2 + $0x108] sm:$0xf] %v876_v5  ;;  %v3753_v25 = vor.u32 %v4355_v6, %v3750_v8  ;;  %v5372_v29 = vld [vmem:[%s5160_s24 + $0x28] sm:$0xff]  ;;  %v3786_v63 = vld [vmem:[#allocation2 + $0xbc] sm:$0xf0]  ;;  %v5400_v5 = vld [vmem:[%s5160_s24 + $0x30] sm:$0xff] }
  0xd1   : > { %3042 = vmatpush.bf16.msra.mxu2 %v4472_v1  ;;  %2993 = vmatpush.bf16.msra.mxu1 %v4464_v2  ;;  %v729_v1 = vpack.c.b16 %v713_v60, %v713_v60  ;;  %v730_v2 = vpack.c.b16 %v714_v61, %v714_v61  ;;  %v1016_v9 = vsel %vm972_vm3, %v5326_v7, %v5360_v35  ;;  %v521_v7 = vshrl.u32 %v5332_v32, 16  ;;  %v3778_v60 = vld [vmem:[#allocation2 + $0xb4] sm:$0xf0]  ;;  %v3792_v0 = vld [vmem:[#allocation2 + $0xa0] sm:$0xf] }
  0xd2   : > { %2903 = vmatmul.bf16.vlgmr.msrb.gmra.mxu3 %v3717_v36  ;;  %2952 = vmatmul.bf16.vlgmr.msrb.gmra.mxu0 %v3721_v37  ;;  %v1069_v13 = vunpack.c.l.b16 %v1016_v9  ;;  %v1070_v14 = vunpack.c.h.b16 %v1016_v9  ;;  %907 = vst [vmem:[#allocation2 + $0xe4] sm:$0xf] %v875_v47  ;;  %v1018_v36 = vshrl.u32 %v4318_v24, 16  ;;  %v4469_v37 = vld [vmem:[#allocation8 + $0x1a0] sm:$0xff]  ;;  %v692_v32 = vrot.slane %v5372_v29, 1  ;;  %v4319_v6 = vld [vmem:[%s5160_s24 + $0x34] sm:$0xff] }
  0xd3   : > { %3091 = vmatpush.bf16.msra.mxu3 %v4480_v26  ;;  %3140 = vmatpush.bf16.msra.mxu0 %v4488_v28  ;;  %761 = vst [vmem:[#allocation2 + $0xe0] sm:$0xf] %v729_v1  ;;  %v3757_v26 = vor.u32 %v4360_v11, %v3756_v10  ;;  %v525_v28 = vshll.u32 %v5366_v23, 16  ;;  %v523_v30 = vor.u32 %v521_v7, %v5344_v48  ;;  %v4369_v1 = vld [vmem:[#allocation2 + $0xc0] sm:$0xf0]  ;;  %v533_v10 = vshll.u32 %v5400_v5, 16 }
  0xd4   : > { %762 = vst [vmem:[#allocation2 + $0x104] sm:$0xf] %v730_v2  ;;  %v1085_v19 = vpack.c.b16 %v1069_v13, %v1069_v13  ;;  %v1086_v20 = vpack.c.b16 %v1070_v14, %v1070_v14  ;;  %v3781_v3 = vor.u32 %v4363_v50, %v3778_v60  ;;  %v3785_v47 = vor.u32 %v4368_v62, %v3784_v51  ;;  %v5406_v11 = vld [vmem:[%s5160_s24 + $0x30] sm:$0xff] }
  0xd5   : > { %3043 = vmatpush.bf16.msra.mxu2 %v4471_v42  ;;  %2994 = vmatpush.bf16.msra.mxu1 %v4463_v45  ;;  %v5378_v33 = vrot.slane %v525_v28, 1  ;;  %v4477_v42 = vld [vmem:[#allocation8 + $0x1e0] sm:$0xff]  ;;  %v3789_v8 = vor.u32 %v4364_v18, %v3786_v63  ;;  %v3793_v9 = vor.u32 %v4369_v1, %v3792_v0  ;;  %v5409_v13 = vld [vmem:[%s5160_s24 + $0x34] sm:$0xff] }
  0xd6   : > { %1117 = vst [vmem:[#allocation2 + $0xe8] sm:$0xf] %v1085_v19  ;;  %v4461_v45 = vld [vmem:[#allocation8 + $0x160] sm:$0xff]  ;;  %v4468_v19 = vld [vmem:[#allocation8 + $0x198] sm:$0xff]  ;;  %v838_v24 = vrot.slane %v5409_v13, 3 }
  0xd7   : > { %3092 = vmatpush.bf16.msra.mxu3 %v4479_v27  ;;  %3141 = vmatpush.bf16.msra.mxu0 %v4487_v49  ;;  %1118 = vst [vmem:[#allocation2 + $0x10c] sm:$0xf] %v1086_v20  ;;  %v836_v27 = vrot.slane %v5375_v21, 3  ;;  %v528_v12 = vsel %vm484_vm0, %v523_v30, %v5378_v33  ;;  %v1020_v49 = vrot.slane %v1018_v36, 3  ;;  %v4476_v20 = vld [vmem:[#allocation8 + $0x1d8] sm:$0xff]  ;;  %v1030_v30 = vshll.u32 %v4319_v6, 16 }
  0xd8   : > { %v569_v48 = vunpack.c.l.b16 %v528_v12  ;;  %v570_v44 = vunpack.c.h.b16 %v528_v12 }
  0xd9   : > { %3044 = vmatpush.bf16.msra.mxu2 %v4470_v43  ;;  %2995 = vmatpush.bf16.msra.mxu1 %v4462_v54  ;;  %v693_v43 = vsel %vm682_vm1, %v690_v22, %v692_v32  ;;  %v837_v54 = vsel %vm826_vm2, %v834_v52, %v836_v27  ;;  %v5394_v61 = vor.u32 %v1023_v17, %v1020_v49  ;;  %v931_v17 = vld [vmem:[%s5160_s24 + $0x3c] sm:$0xf] }
  0xda   : > { %v715_v53 = vunpack.c.l.b16 %v693_v43  ;;  %v716_v55 = vunpack.c.h.b16 %v693_v43  ;;  %v861_v56 = vunpack.c.l.b16 %v837_v54  ;;  %v862_v58 = vunpack.c.h.b16 %v837_v54  ;;  %v4372_v43 = vld [vmem:[#allocation2 + $0xdc] sm:$0xf] }
  0xdb   : > { %3093 = vmatpush.bf16.msra.mxu3 %v4478_v41  ;;  %3142 = vmatpush.bf16.msra.mxu0 %v4486_v57  ;;  %v585_v41 = vpack.c.b16 %v569_v48, %v569_v48  ;;  %v586_v57 = vpack.c.b16 %v570_v44, %v570_v44  ;;  %v1025_v39 = vsel %vm972_vm3, %v5360_v35, %v5394_v61  ;;  %v529_v35 = vshrl.u32 %v5366_v23, 16 }
  0xdc   : > { %v731_v59 = vpack.c.b16 %v715_v53, %v715_v53  ;;  %v732_v38 = vpack.c.b16 %v716_v55, %v716_v55  ;;  %v877_v22 = vpack.c.b16 %v861_v56, %v861_v56  ;;  %v878_v52 = vpack.c.b16 %v862_v58, %v862_v58  ;;  %v3820_v53 = vld [vmem:[#allocation2 + $0xe0] sm:$0xf]  ;;  %v4373_v56 = vld [vmem:[#allocation2 + $0xe4] sm:$0xf] }
  0xdd   : > { %3045 = vmatpush.bf16.msra.mxu2 %v4469_v37  ;;  %2996 = vmatpush.bf16.msra.mxu1 %v4461_v45  ;;  %617 = vst [vmem:[#allocation2 + $0x124] sm:$0xf] %v585_v41  ;;  %v1071_v2 = vunpack.c.l.b16 %v1025_v39  ;;  %v1072_v34 = vunpack.c.h.b16 %v1025_v39  ;;  %v531_v14 = vor.u32 %v529_v35, %v5378_v33  ;;  %v694_v23 = vrot.slane %v5406_v11, 1  ;;  %v5436_v39 = vld [vmem:[%s5160_s24 + $0x38] sm:$0xff]  ;;  %v4467_v35 = vld [vmem:[#allocation8 + $0x190] sm:$0xff] }
  0xde   : > { %618 = vst [vmem:[#allocation2 + $0x148] sm:$0xf] %v586_v57  ;;  %v1032_v44 = vrot.slane %v1030_v30, 4  ;;  %v3822_v57 = vld [vmem:[#allocation2 + $0x104] sm:$0xf0] }
  0xdf   : > { %3094 = vmatpush.bf16.msra.mxu3 %v4477_v42  ;;  %3143 = vmatpush.bf16.msra.mxu0 %v4485_v46  ;;  %763 = vst [vmem:[#allocation2 + $0x128] sm:$0xf] %v731_v59  ;;  %v1087_v40 = vpack.c.b16 %v1071_v2, %v1071_v2  ;;  %v1088_v4 = vpack.c.b16 %v1072_v34, %v1072_v34  ;;  %v3828_v59 = vld [vmem:[#allocation2 + $0xe8] sm:$0xf]  ;;  %v537_v34 = vshrl.u32 %v5400_v5, 16  ;;  %v4475_v5 = vld [vmem:[#allocation8 + $0x1d0] sm:$0xff] }
  0xe0   : > { %2810 = vmatmul.bf16.gmra.mxu1 %v3745_v15  ;;  %2859 = vmatmul.bf16.gmra.mxu2 %v3749_v16  ;;  %764 = vst [vmem:[#allocation2 + $0x14c] sm:$0xf] %v732_v38  ;;  %v5412_v15 = vrot.slane %v533_v10, 1  ;;  %v1027_v16 = vshrl.u32 %v4319_v6, 16  ;;  %v695_v37 = vsel %vm682_vm1, %v692_v32, %v694_v23  ;;  %v839_v42 = vsel %vm826_vm2, %v836_v27, %v838_v24  ;;  %v3814_v32 = vld [vmem:[#allocation2 + $0xfc] sm:$0xf0] }
  0xe1   : > { %909 = vst [vmem:[#allocation2 + $0x12c] sm:$0xf] %v877_v22  ;;  %3046 = vmatpush.bf16.msra.mxu2 %v4468_v19  ;;  %v717_v45 = vunpack.c.l.b16 %v695_v37  ;;  %v718_v46 = vunpack.c.h.b16 %v695_v37  ;;  %v863_v12 = vunpack.c.l.b16 %v839_v42  ;;  %v864_v48 = vunpack.c.h.b16 %v839_v42  ;;  %v4377_v27 = vld [vmem:[#allocation2 + $0x100] sm:$0xf0]  ;;  %v4378_v38 = vld [vmem:[#allocation2 + $0x108] sm:$0xf0] }
  0xe2   : > { %2908 = vmatmul.bf16.gmra.mxu3 %v3753_v25  ;;  %2957 = vmatmul.bf16.gmra.mxu0 %v3757_v26  ;;  %910 = vst [vmem:[#allocation2 + $0x150] sm:$0xf] %v878_v52  ;;  %v4460_v25 = vld [vmem:[#allocation8 + $0x158] sm:$0xff]  ;;  %v536_v7 = vsel %vm484_vm0, %v531_v14, %v5412_v15  ;;  %v1029_v28 = vrot.slane %v1027_v16, 3  ;;  %v963_v22 = vunpack.c.l.b16 %v931_v17  ;;  %v3817_v51 = vor.u32 %v4372_v43, %v3814_v32  ;;  %v4459_v14 = vld [vmem:[#allocation8 + $0x150] sm:$0xff] }
  0xe3   : > { %1119 = vst [vmem:[#allocation2 + $0x130] sm:$0xf] %v1087_v40  ;;  %v4484_v26 = vld [vmem:[#allocation8 + $0x218] sm:$0xff]  ;;  %3095 = vmatpush.bf16.msra.mxu3 %v4476_v20  ;;  %v571_v33 = vunpack.c.l.b16 %v536_v7  ;;  %v572_v36 = vunpack.c.h.b16 %v536_v7  ;;  %2997 = vmatpush.bf16.msra.mxu1 %v4460_v25  ;;  %v733_v29 = vpack.c.b16 %v717_v45, %v717_v45  ;;  %v734_v54 = vpack.c.b16 %v718_v46, %v718_v46  ;;  %v4483_v16 = vld [vmem:[#allocation8 + $0x210] sm:$0xff] }
  0xe4   : > { %1120 = vst [vmem:[#allocation2 + $0x154] sm:$0xf] %v1088_v4  ;;  %3144 = vmatpush.bf16.msra.mxu0 %v4484_v26  ;;  %v879_v55 = vpack.c.b16 %v863_v12, %v863_v12  ;;  %v5428_v21 = vor.u32 %v1032_v44, %v1029_v28  ;;  %v880_v41 = vpack.c.b16 %v864_v48, %v864_v48  ;;  %v785_v52 = vld [vmem:[%s5160_s24 + $0x3c] sm:$0xf]  ;;  %v4381_v45 = vld [vmem:[#allocation2 + $0x124] sm:$0xf] }
  0xe5   : > { %v587_v49 = vpack.c.b16 %v571_v33, %v571_v33  ;;  %v588_v31 = vpack.c.b16 %v572_v36, %v572_v36  ;;  %765 = vst [vmem:[#allocation2 + $0x170] sm:$0xf] %v733_v29  ;;  %v3821_v62 = vor.u32 %v4377_v27, %v3820_v53  ;;  %v817_v0 = vunpack.c.l.b16 %v785_v52  ;;  %v5443_v40 = vld [vmem:[%s5160_s24 + $0x38] sm:$0xff]  ;;  %3047 = vmatpush.bf16.msra.mxu2 %v4467_v35  ;;  %v443_v32 = vld [vmem:[%s5168_s21] sm:$0x1] }
  0xe6   : > { %v1034_v58 = vsel %vm972_vm3, %v5394_v61, %v5428_v21  ;;  %766 = vst [vmem:[#allocation2 + $0x194] sm:$0xf] %v734_v54  ;;  %v971_v1 = vpack.c.b16 %v963_v22, %v963_v22  ;;  %v3825_v61 = vor.u32 %v4373_v56, %v3822_v57  ;;  %v3829_v2 = vor.u32 %v4378_v38, %v3828_v59  ;;  %v641_v17 = vld [vmem:[%s5168_s21] sm:$0x1]  ;;  %v4312_v52 = vld [vmem:[%s5168_s21] sm:$0x70] }
  0xe7   : > { %619 = vst [vmem:[#allocation2 + $0x16c] sm:$0xf] %v587_v49  ;;  %v1073_v50 = vunpack.c.l.b16 %v1034_v58  ;;  %v1074_v60 = vunpack.c.h.b16 %v1034_v58  ;;  %v539_v6 = vor.u32 %v537_v34, %v5412_v15  ;;  %v696_v10 = vrot.slane %v5443_v40, 1  ;;  %3096 = vmatpush.bf16.msra.mxu3 %v4475_v5  ;;  %2998 = vmatpush.bf16.msra.mxu1 %v4459_v14  ;;  %v3850_v49 = vld [vmem:[#allocation2 + $0x144] sm:$0xf0] }
  0xe8   : > { %620 = vst [vmem:[#allocation2 + $0x190] sm:$0xf] %v588_v31  ;;  %v1036_v4 = vshrl.u32 %v971_v1, 16  ;;  %v1039_v25 = vshll.u32 %v971_v1, 16  ;;  %3145 = vmatpush.bf16.msra.mxu0 %v4483_v16  ;;  %v3856_v31 = vld [vmem:[#allocation2 + $0x128] sm:$0xf]  ;;  %v3853_v57 = vor.u32 %v4381_v45, %v3850_v49 }
  0xe9   : > { %911 = vst [vmem:[#allocation2 + $0x174] sm:$0xf] %v879_v55  ;;  %v1089_v18 = vpack.c.b16 %v1073_v50, %v1073_v50  ;;  %v1090_v63 = vpack.c.b16 %v1074_v60, %v1074_v60  ;;  %v697_v28 = vsel %vm682_vm1, %v694_v23, %v696_v10  ;;  %v4386_v23 = vld [vmem:[#allocation2 + $0x148] sm:$0xf0]  ;;  %v3858_v29 = vld [vmem:[#allocation2 + $0x14c] sm:$0xf0]  ;;  %v699_v60 = vunpack.c.l.b16 %v641_v17 }
  0xea   : > { %912 = vst [vmem:[#allocation2 + $0x198] sm:$0xf] %v880_v41  ;;  %v5457_v20 = vrot.slane %v1036_v4, 3  ;;  %v719_v33 = vunpack.c.l.b16 %v697_v28  ;;  %v720_v13 = vunpack.c.h.b16 %v697_v28  ;;  %v1041_v42 = vrot.slane %v1039_v25, 4  ;;  %v4382_v44 = vld [vmem:[#allocation2 + $0x12c] sm:$0xf] }
  0xeb   : > { %1121 = vst [vmem:[#allocation2 + $0x178] sm:$0xf] %v1089_v18  ;;  %v3864_v53 = vld [vmem:[#allocation2 + $0x130] sm:$0xf]  ;;  %v4387_v55 = vld [vmem:[#allocation2 + $0x150] sm:$0xf0]  ;;  %v550_v41 = vunpack.c.l.b16 %v443_v32  ;;  %v3857_v58 = vor.u32 %v4386_v23, %v3856_v31  ;;  %v3861_v22 = vor.u32 %v4382_v44, %v3858_v29 }
  0xec   : > { %1122 = vst [vmem:[#allocation2 + $0x19c] sm:$0xf] %v1090_v63  ;;  %v735_v46 = vpack.c.b16 %v719_v33, %v719_v33  ;;  %v736_v12 = vpack.c.b16 %v720_v13, %v720_v13  ;;  %v1042_v11 = vor.u32 %v1041_v42, %v5457_v20  ;;  %v545_v18 = vshrl.u32 %v5436_v39, 16  ;;  %v4474_v4 = vld [vmem:[#allocation8 + $0x1c8] sm:$0xff]  ;;  %v4329_v29 = vld [vmem:[%s5160_s24 + $0xc] sm:$0xf0] }
  0xed   : > { %v551_v50 = vpack.c.b16 %v550_v41, %v550_v41  ;;  %3097 = vmatpush.bf16.msra.mxu3 %v4474_v4  ;;  %v4395_v42 = vld [vmem:[#allocation2 + $0x190] sm:$0xf0]  ;;  %v4556_v4 = vld [vmem:[%s5160_s24 + $0x8] sm:$0xff]  }
  0xee   : > { %767 = vst [vmem:[#allocation2 + $0x1b8] sm:$0xf] %v735_v46  ;;  %v1043_v54 = vsel %vm972_vm3, %v5428_v21, %v1042_v11  ;;  %v4320_v21 = vld [vmem:[%s5168_s21] sm:$0xff]  ;;  %v4390_v40 = vld [vmem:[#allocation2 + $0x16c] sm:$0xf] }
  0xef   : > { %768 = vst [vmem:[#allocation2 + $0x1dc] sm:$0xf] %v736_v12  ;;  %v1075_v27 = vunpack.c.l.b16 %v1043_v54  ;;  %v1076_v56 = vunpack.c.h.b16 %v1043_v54  ;;  %v553_v63 = vshll.u32 %v551_v50, 16  ;;  %v1054_v5 = vshll.u32 %v4320_v21, 16  ;;  %v4330_v32 = vld [vmem:[%s5160_s24 + $0x14] sm:$0xff] }
  0xf0   : > { %2815 = vmatmul.bf16.gmra.mxu1 %v3781_v3  ;;  %2864 = vmatmul.bf16.gmra.mxu2 %v3785_v47  ;;  %v541_v3 = vshll.u32 %v5436_v39, 16  ;;  %v5440_v47 = vpack.c.b16 %v817_v0, %v817_v0  ;;  %v700_v0 = vpack.c.b16 %v699_v60, %v699_v60  ;;  %v4391_v46 = vld [vmem:[#allocation2 + $0x174] sm:$0xf]  ;;  %v1433_v17 = vshll.u32 %v4330_v32, 16  ;;  %v3608_v50 = vld [vmem:[%s5160_s24 + $0xc] sm:$0xc] }
  0xf1   : > { %v1091_v59 = vpack.c.b16 %v1075_v27, %v1075_v27  ;;  %v1092_v38 = vpack.c.b16 %v1076_v56, %v1076_v56  ;;  %v555_v34 = vrot.slane %v553_v63, 1  ;;  %v3894_v12 = vld [vmem:[#allocation2 + $0x194] sm:$0xf0]  ;;  %v4321_v60 = vld [vmem:[%s5160_s24 + $0xc] sm:$0xf0] }
  0xf2   : > { %2913 = vmatmul.bf16.gmra.mxu3 %v3789_v8  ;;  %2962 = vmatmul.bf16.gmra.mxu0 %v3793_v9  ;;  %v5446_v8 = vrot.slane %v541_v3, 1  ;;  %v840_v9 = vrot.slane %v5440_v47, 3  ;;  %v4466_v3 = vld [vmem:[#allocation8 + $0x188] sm:$0xff]  ;;  %v3900_v49 = vld [vmem:[#allocation2 + $0x178] sm:$0xf] }
  0xf3   : > { %1123 = vst [vmem:[#allocation2 + $0x1c0] sm:$0xf] %v1091_v59  ;;  %3048 = vmatpush.bf16.msra.mxu2 %v4466_v3  ;;  %v4396_v54 = vld [vmem:[#allocation2 + $0x198] sm:$0xf0]  ;;  %v3897_v59 = vor.u32 %v4391_v46, %v3894_v12  ;;  %v3672_v3 = vld [vmem:[%s5160_s24 + $0xc] sm:$0x8] }
  0xf4   : > { %v544_v19 = vsel %vm484_vm0, %v539_v6, %v5446_v8  ;;  %v841_v15 = vsel %vm826_vm2, %v838_v24, %v840_v9  ;;  %1124 = vst [vmem:[#allocation2 + $0x1e4] sm:$0xf] %v1092_v38  ;;  %v701_v6 = vrot.slane %v700_v0, 1  ;;  %v3901_v38 = vor.u32 %v4396_v54, %v3900_v49 }
  0xf5   : > { %v573_v26 = vunpack.c.l.b16 %v544_v19  ;;  %v574_v7 = vunpack.c.h.b16 %v544_v19  ;;  %v865_v30 = vunpack.c.l.b16 %v841_v15  ;;  %v866_v36 = vunpack.c.h.b16 %v841_v15  ;;  %v4458_v19 = vld [vmem:[#allocation8 + $0x148] sm:$0xff] }
  0xf6   : > { %2999 = vmatpush.bf16.msra.mxu1 %v4458_v19 }
  0xf7   : > { %v589_v24 = vpack.c.b16 %v573_v26, %v573_v26  ;;  %v590_v37 = vpack.c.b16 %v574_v7, %v574_v7  ;;  %v881_v48 = vpack.c.b16 %v865_v30, %v865_v30  ;;  %v882_v43 = vpack.c.b16 %v866_v36, %v866_v36 }
  0xf9   : > { %621 = vst [vmem:[#allocation2 + $0x1b4] sm:$0xf] %v589_v24  ;;  %v3886_v24 = vld [vmem:[#allocation2 + $0x18c] sm:$0xf0] }
  0xfa   : > { %622 = vst [vmem:[#allocation2 + $0x1d8] sm:$0xf] %v590_v37  ;;  %v3892_v37 = vld [vmem:[#allocation2 + $0x170] sm:$0xf] }
  0xfb   : > { %913 = vst [vmem:[#allocation2 + $0x1bc] sm:$0xf] %v881_v48  ;;  %v3893_v27 = vor.u32 %v4395_v42, %v3892_v37  ;;  %v4404_v37 = vld [vmem:[#allocation2 + $0x1d8] sm:$0xf0] }
  0xfc   : > { %914 = vst [vmem:[#allocation2 + $0x1e0] sm:$0xf] %v882_v43  ;;  %v3640_v43 = vld [vmem:[%s5160_s24 + $0xc] sm:$0xc] }
 0x100   : > { %2820 = vmatmul.bf16.gmra.mxu1 %v3817_v51  ;;  %2869 = vmatmul.bf16.gmra.mxu2 %v3821_v62  ;;  %v3865_v51 = vor.u32 %v4387_v55, %v3864_v53  ;;  %v3572_v62 = vld [vmem:[%s5168_s21] sm:$0xf]  ;;  %v3641_v53 = vor.u32 %v4329_v29, %v3640_v43  ;;  %v3889_v55 = vor.u32 %v4390_v40, %v3886_v24  ;;  %v3928_v24 = vld [vmem:[#allocation2 + $0x1b8] sm:$0xf] }
 0x101   : > { %v3573_v1 = vor.u32 %v4312_v52, %v3572_v62 }
 0x102   : > { %2918 = vmatmul.bf16.gmra.mxu3 %v3825_v61  ;;  %2967 = vmatmul.bf16.gmra.mxu0 %v3829_v2  ;;  %v1051_v61 = vshrl.u32 %v4320_v21, 16  ;;  %v547_v2 = vor.u32 %v545_v18, %v5446_v8  ;;  %v705_v8 = vsel %vm682_vm1, %v696_v10, %v701_v6  ;;  %v4482_v10 = vld [vmem:[#allocation8 + $0x208] sm:$0xff]  ;;  %v5495_v21 = vld [vmem:[%s5160_s24 + $0x14] sm:$0xff]  ;;  %v1435_v18 = vrot.slane %v1433_v17, 3  ;;  %v4400_v42 = vld [vmem:[#allocation2 + $0x1bc] sm:$0xf] }
 0x103   : > { %v847_v35 = vrot.slane %v3573_v1, 7  ;;  %v721_v26 = vunpack.c.l.b16 %v705_v8  ;;  %v722_v7 = vunpack.c.h.b16 %v705_v8  ;;  %3146 = vmatpush.bf16.msra.mxu0 %v4482_v10  ;;  %v1275_v0 = vrot.slane %v5495_v21, 2  ;;  %v4337_v8 = vld [vmem:[%s5160_s24 + $0xc] sm:$0xf0]  ;;  %v3930_v49 = vld [vmem:[#allocation2 + $0x1dc] sm:$0xf0] }
 0x104   : > { %v1053_v39 = vrot.slane %v1051_v61, 7  ;;  %v559_v14 = vsel %vm558_vm5, %v547_v2, %v555_v34  ;;  %v4465_v61 = vld [vmem:[#allocation8 + $0x180] sm:$0xff] }
 0x105   : > { %v851_v16 = vsel %vm848_vm6, %v840_v9, %v847_v35  ;;  %v575_v15 = vunpack.c.l.b16 %v559_v14  ;;  %v576_v25 = vunpack.c.h.b16 %v559_v14  ;;  %v737_v9 = vpack.c.b16 %v721_v26, %v721_v26  ;;  %v4473_v2 = vld [vmem:[#allocation8 + $0x1c0] sm:$0xff]  ;;  %v5506_v35 = vld [vmem:[%s5160_s24 + $0x14] sm:$0xff]  ;;  %3049 = vmatpush.bf16.msra.mxu2 %v4465_v61 }
 0x106   : > { %v867_v28 = vunpack.c.l.b16 %v851_v16  ;;  %v868_v30 = vunpack.c.h.b16 %v851_v16  ;;  %v1056_v33 = vor.u32 %v1054_v5, %v1053_v39  ;;  %v738_v45 = vpack.c.b16 %v722_v7, %v722_v7  ;;  %3098 = vmatpush.bf16.msra.mxu3 %v4473_v2  ;;  %v4457_v16 = vld [vmem:[#allocation8 + $0x140] sm:$0xff] }
 0x107   : > { %v591_v47 = vpack.c.b16 %v575_v15, %v575_v15  ;;  %v592_v36 = vpack.c.b16 %v576_v25, %v576_v25  ;;  %769 = vst [vmem:[#allocation2 + $0x200] sm:$0xf] %v737_v9  ;;  %v4492_v39 = vunpack.c.l.b16 %v4556_v4  ;;  %v4493_v5 = vunpack.c.h.b16 %v4556_v4  ;;  %3000 = vmatpush.bf16.msra.mxu1 %v4457_v16  ;;  %v3922_v9 = vld [vmem:[#allocation2 + $0x1d4] sm:$0xf0] }
 0x108   : > { %v883_v31 = vpack.c.b16 %v867_v28, %v867_v28  ;;  %v1061_v48 = vsel %vm5482_vm8, %v5457_v20, %v1056_v33  ;;  %v884_v11 = vpack.c.b16 %v868_v30, %v868_v30  ;;  %770 = vst [vmem:[#allocation2 + $0x224] sm:$0xf] %v738_v45  ;;  %v1422_v20 = vshrl.u32 %v3641_v53, 16  ;;  %v4481_v33 = vld [vmem:[#allocation8 + $0x200] sm:$0xff] }
 0x109   : > { %623 = vst [vmem:[#allocation2 + $0x1fc] sm:$0xf] %v591_v47  ;;  %v1077_v23 = vunpack.c.l.b16 %v1061_v48  ;;  %v1078_v44 = vunpack.c.h.b16 %v1061_v48  ;;  %v3673_v25 = vor.u32 %v4337_v8, %v3672_v3  ;;  %v1631_v26 = vrot.slane %v5506_v35, 3  ;;  %3147 = vmatpush.bf16.msra.mxu0 %v4481_v33 }
 0x10a   : > { %624 = vst [vmem:[#allocation2 + $0x220] sm:$0xf] %v592_v36  ;;  %v1175_v7 = vpack.c.b16 %v4492_v39, %v4492_v39  ;;  %v1176_v28 = vpack.c.b16 %v4493_v5, %v4493_v5  ;;  %v4399_v36 = vld [vmem:[#allocation2 + $0x1b4] sm:$0xf] }
 0x10b   : > { %v1093_v56 = vpack.c.b16 %v1077_v23, %v1077_v23  ;;  %v1094_v41 = vpack.c.b16 %v1078_v44, %v1078_v44  ;;  %915 = vst [vmem:[#allocation2 + $0x204] sm:$0xf] %v883_v31  ;;  %v1630_v47 = vrot.slane %v3673_v25, 3  ;;  %v3936_v31 = vld [vmem:[#allocation2 + $0x1c0] sm:$0xf]  ;;  %v3925_v54 = vor.u32 %v4399_v36, %v3922_v9 }
 0x10c   : > { %916 = vst [vmem:[#allocation2 + $0x228] sm:$0xf] %v884_v11  ;;  %v4405_v23 = vld [vmem:[#allocation2 + $0x1e0] sm:$0xf0]  ;;  %v4331_v44 = vld [vmem:[%s5160_s24 + $0x1c] sm:$0xff] }
 0x10d   : > { %1125 = vst [vmem:[#allocation2 + $0x208] sm:$0xf] %v1093_v56  ;;  %v1632_v12 = vsel %vm826_vm2, %v1630_v47, %v1631_v26  ;;  %v3933_v56 = vor.u32 %v4400_v42, %v3930_v49  ;;  %v4332_v47 = vld [vmem:[%s5160_s24 + $0x24] sm:$0xff] }
 0x10e   : > { %1126 = vst [vmem:[#allocation2 + $0x22c] sm:$0xf] %v1094_v41  ;;  %v1660_v48 = vunpack.c.l.b16 %v1632_v12  ;;  %v1661_v11 = vunpack.c.h.b16 %v1632_v12  ;;  %v3937_v41 = vor.u32 %v4405_v23, %v3936_v31  ;;  %v1448_v42 = vshrl.u32 %v4332_v47, 16 }
 0x10f   : > { %1207 = vst [vmem:[#allocation2 + $0x14] sm:$0xf] %v1175_v7  ;;  %v4413_v35 = vld [vmem:[#allocation2 + $0x220] sm:$0xf0] }
 0x110   : > { %2825 = vmatmul.bf16.gmra.mxu1 %v3853_v57  ;;  %2874 = vmatmul.bf16.gmra.mxu2 %v3857_v58  ;;  %v1425_v57 = vshll.u32 %v3641_v53, 16  ;;  %v1430_v58 = vshrl.u32 %v4330_v32, 16  ;;  %1208 = vst [vmem:[#allocation2 + $0x38] sm:$0xf] %v1176_v28  ;;  %v1676_v43 = vpack.c.b16 %v1660_v48, %v1660_v48  ;;  %v1677_v29 = vpack.c.b16 %v1661_v11, %v1661_v11  ;;  %v5562_v48 = vld [vmem:[%s5160_s24 + $0x24] sm:$0xff] }
 0x111   : > { %v3929_v32 = vor.u32 %v4404_v37, %v3928_v24  ;;  %v1439_v53 = vshrl.u32 %v4331_v44, 16  ;;  %v1450_v11 = vrot.slane %v1448_v42, 2 }
 0x112   : > { %2923 = vmatmul.bf16.gmra.mxu3 %v3861_v22  ;;  %2972 = vmatmul.bf16.gmra.mxu0 %v3865_v51  ;;  %v3609_v22 = vor.u32 %v4321_v60, %v3608_v50  ;;  %v1424_v51 = vrot.slane %v1422_v20, 2  ;;  %v1427_v62 = vrot.slane %v1425_v57, 3  ;;  %v1432_v52 = vrot.slane %v1430_v58, 2  ;;  %1708 = vst [vmem:[#allocation2 + $0x20] sm:$0xf] %v1676_v43  ;;  %v5521_v57 = vld [vmem:[%s5160_s24 + $0x1c] sm:$0xff] }
 0x113   : > { %1709 = vst [vmem:[#allocation2 + $0x44] sm:$0xf] %v1677_v29  ;;  %v1441_v58 = vrot.slane %v1439_v53, 2  ;;  %v4557_v60 = vld [vmem:[%s5160_s24 + $0x10] sm:$0xff]   ;;  %v4409_v7 = vld [vmem:[#allocation2 + $0x204] sm:$0xf] }
 0x114   : > { %v1274_v63 = vrot.slane %v3609_v22, 2  ;;  %v1428_v1 = vor.u32 %v1427_v62, %v1424_v51  ;;  %v5498_v34 = vor.u32 %v1435_v18, %v1432_v52  ;;  %v4496_v52 = vunpack.c.l.b16 %v4557_v60  ;;  %v3972_v33 = vld [vmem:[#allocation2 + $0x208] sm:$0xf] }
 0x115   : > { %v4497_v18 = vunpack.c.h.b16 %v4557_v60  ;;  %v5566_v43 = vld [vmem:[%s5160_s24 + $0x24] sm:$0xff] }
 0x116   : > { %v1276_v6 = vsel %vm1273_vm9, %v1274_v63, %v1275_v0  ;;  %v1437_v15 = vsel %vm1420_vm10, %v1428_v1, %v5498_v34  ;;  %v1177_v3 = vpack.c.b16 %v4496_v52, %v4496_v52  ;;  %v1635_v53 = vrot.slane %v5566_v43, 3 }
 0x117   : > { %v1306_v14 = vunpack.c.l.b16 %v1276_v6  ;;  %v1307_v19 = vunpack.c.h.b16 %v1276_v6  ;;  %v1516_v40 = vunpack.c.l.b16 %v1437_v15  ;;  %v1517_v10 = vunpack.c.h.b16 %v1437_v15  ;;  %v3958_v15 = vld [vmem:[#allocation2 + $0x21c] sm:$0xf0] }
 0x118   : > { %v1178_v4 = vpack.c.b16 %v4497_v18, %v4497_v18  ;;  %1209 = vst [vmem:[#allocation2 + $0x5c] sm:$0xf] %v1177_v3 }
 0x119   : > { %v1322_v30 = vpack.c.b16 %v1306_v14, %v1306_v14  ;;  %v1323_v13 = vpack.c.b16 %v1307_v19, %v1307_v19  ;;  %v1532_v45 = vpack.c.b16 %v1516_v40, %v1516_v40  ;;  %v1533_v46 = vpack.c.b16 %v1517_v10, %v1517_v10  ;;  %v4408_v19 = vld [vmem:[#allocation2 + $0x1fc] sm:$0xf]  ;;  %v4414_v40 = vld [vmem:[#allocation2 + $0x228] sm:$0xf0] }
 0x11a   : > { %1210 = vst [vmem:[#allocation2 + $0x80] sm:$0xf] %v1178_v4  ;;  %v3961_v24 = vor.u32 %v4408_v19, %v3958_v15  ;;  %v3973_v49 = vor.u32 %v4414_v40, %v3972_v33  ;;  %v3736_v15 = vld [vmem:[#allocation2 + $0x20] sm:$0xf] }
 0x11b   : > { %1354 = vst [vmem:[#allocation2 + $0x18] sm:$0xf] %v1322_v30  ;;  %v3966_v30 = vld [vmem:[#allocation2 + $0x224] sm:$0xf0] }
 0x11c   : > { %1355 = vst [vmem:[#allocation2 + $0x3c] sm:$0xf] %v1323_v13  ;;  %v3969_v12 = vor.u32 %v4409_v7, %v3966_v30  ;;  %v4333_v7 = vld [vmem:[%s5160_s24 + $0x2c] sm:$0xff] }
 0x11d   : > { %1564 = vst [vmem:[#allocation2 + $0x1c] sm:$0xf] %v1532_v45  ;;  %v1451_v45 = vshll.u32 %v4332_v47, 16  ;;  %v1460_v40 = vshll.u32 %v4333_v7, 16 }
 0x11e   : > { %1565 = vst [vmem:[#allocation2 + $0x40] sm:$0xf] %v1533_v46 }
 0x11f   : > { %v1453_v23 = vrot.slane %v1451_v45, 3  ;;  %v5600_v45 = vld [vmem:[%s5160_s24 + $0x2c] sm:$0xff] }
 0x120   : > { %2830 = vmatmul.bf16.gmra.mxu1 %v3889_v55  ;;  %2879 = vmatmul.bf16.gmra.mxu2 %v3893_v27  ;;  %v1442_v55 = vshll.u32 %v4331_v44, 16  ;;  %v1279_v44 = vrot.slane %v5562_v48, 2 }
 0x121   : > { %v5568_v29 = vor.u32 %v1453_v23, %v1450_v11  ;;  %v1281_v11 = vrot.slane %v5600_v45, 2  ;;  %v5604_v23 = vld [vmem:[%s5160_s24 + $0x2c] sm:$0xff] }
 0x122   : > { %2928 = vmatmul.bf16.gmra.mxu3 %v3897_v59  ;;  %2977 = vmatmul.bf16.gmra.mxu0 %v3901_v38  ;;  %v1444_v17 = vrot.slane %v1442_v55, 3  ;;  %v1277_v59 = vrot.slane %v5521_v57, 2  ;;  %v5525_v38 = vld [vmem:[%s5160_s24 + $0x1c] sm:$0xff] }
 0x123   : > { %v1633_v51 = vrot.slane %v5525_v38, 3  ;;  %v4352_v38 = vld [vmem:[#allocation2 + $0x38] sm:$0xf0] }
 0x124   : > { %v5527_v50 = vor.u32 %v1444_v17, %v1441_v58  ;;  %v1278_v22 = vsel %vm1273_vm9, %v1275_v0, %v1277_v59 }
 0x125   : > { %v1308_v63 = vunpack.c.l.b16 %v1278_v22  ;;  %v1309_v1 = vunpack.c.h.b16 %v1278_v22  ;;  %v1634_v21 = vsel %vm826_vm2, %v1631_v26, %v1633_v51  ;;  %v1636_v57 = vsel %vm826_vm2, %v1633_v51, %v1635_v53  ;;  %v3730_v19 = vld [vmem:[#allocation2 + $0x3c] sm:$0xf0] }
 0x126   : > { %v1446_v2 = vsel %vm1420_vm10, %v5498_v34, %v5527_v50  ;;  %v1662_v16 = vunpack.c.l.b16 %v1634_v21  ;;  %v3964_v34 = vld [vmem:[#allocation2 + $0x200] sm:$0xf]  ;;  %v1663_v25 = vunpack.c.h.b16 %v1634_v21  ;;  %v1455_v22 = vsel %vm1420_vm10, %v5527_v50, %v5568_v29  ;;  %v3728_v50 = vld [vmem:[#allocation2 + $0x18] sm:$0xf] }
 0x127   : > { %v1324_v6 = vpack.c.b16 %v1308_v63, %v1308_v63  ;;  %v1325_v5 = vpack.c.b16 %v1309_v1, %v1309_v1  ;;  %v1518_v14 = vunpack.c.l.b16 %v1446_v2  ;;  %v1519_v8 = vunpack.c.h.b16 %v1446_v2 }
 0x128   : > { %v1678_v13 = vpack.c.b16 %v1662_v16, %v1662_v16  ;;  %v1679_v10 = vpack.c.b16 %v1663_v25, %v1663_v25  ;;  %v3965_v37 = vor.u32 %v4413_v35, %v3964_v34  ;;  %v1520_v21 = vunpack.c.l.b16 %v1455_v22  ;;  %v4353_v25 = vld [vmem:[#allocation2 + $0x40] sm:$0xf0] }
 0x129   : > { %v1534_v26 = vpack.c.b16 %v1518_v14, %v1518_v14  ;;  %v1535_v28 = vpack.c.b16 %v1519_v8, %v1519_v8  ;;  %1356 = vst [vmem:[#allocation2 + $0x60] sm:$0xf] %v1324_v6  ;;  %v1521_v3 = vunpack.c.h.b16 %v1455_v22  ;;  %v1664_v4 = vunpack.c.l.b16 %v1636_v57  ;;  %v4347_v6 = vld [vmem:[#allocation2 + $0x14] sm:$0xf]  ;;  %v4348_v8 = vld [vmem:[#allocation2 + $0x1c] sm:$0xf] }
 0x12a   : > { %1357 = vst [vmem:[#allocation2 + $0x84] sm:$0xf] %v1325_v5  ;;  %v3722_v5 = vld [vmem:[#allocation2 + $0x34] sm:$0xf0]  ;;  %v1665_v14 = vunpack.c.h.b16 %v1636_v57  ;;  %v1536_v51 = vpack.c.b16 %v1520_v21, %v1520_v21  ;;  %v3729_v33 = vor.u32 %v4352_v38, %v3728_v50  ;;  %v3733_v47 = vor.u32 %v4348_v8, %v3730_v19  ;;  %v4356_v50 = vld [vmem:[#allocation2 + $0x5c] sm:$0xf] }
 0x12b   : > { %1566 = vst [vmem:[#allocation2 + $0x64] sm:$0xf] %v1534_v26  ;;  %v1537_v16 = vpack.c.b16 %v1521_v3, %v1521_v3  ;;  %v1680_v34 = vpack.c.b16 %v1664_v4, %v1664_v4  ;;  %v3725_v30 = vor.u32 %v4347_v6, %v3722_v5  ;;  %v3758_v8 = vld [vmem:[#allocation2 + $0x7c] sm:$0xf0] }
 0x12c   : > { %1567 = vst [vmem:[#allocation2 + $0x88] sm:$0xf] %v1535_v28  ;;  %v1681_v35 = vpack.c.b16 %v1665_v14, %v1665_v14 }
 0x12d   : > { %v5516_v27 = vpop.f32.mrf.mxu1  ;;  %1710 = vst [vmem:[#allocation2 + $0x68] sm:$0xf] %v1678_v13  ;;  %v1457_v13 = vshrl.u32 %v4333_v7, 16 }
 0x12e   : > { %1711 = vst [vmem:[#allocation2 + $0x8c] sm:$0xf] %v1679_v10 }
 0x12f   : > { %v5518_v20 = vpop.f32.mrf.mxu0  ;;  %1568 = vst [vmem:[#allocation2 + $0xac] sm:$0xf] %v1536_v51 }
 0x130   : > { %2835 = vmatmul.bf16.gmra.mxu1 %v3925_v54  ;;  %2884 = vmatmul.bf16.gmra.mxu2 %v3929_v32  ;;  %v4558_v54 = vld [vmem:[%s5160_s24 + $0x18] sm:$0xff]   ;;  %v1280_v32 = vsel %vm1273_vm9, %v1277_v59, %v1279_v44  ;;  %1569 = vst [vmem:[#allocation2 + $0xd0] sm:$0xf] %v1537_v16  ;;  %v3764_v51 = vld [vmem:[#allocation2 + $0x60] sm:$0xf] }
 0x131   : > { %v1310_v58 = vunpack.c.l.b16 %v1280_v32  ;;  %v1311_v17 = vunpack.c.h.b16 %v1280_v32  ;;  %1712 = vst [vmem:[#allocation2 + $0xb0] sm:$0xf] %v1680_v34  ;;  %v4559_v32 = vld [vmem:[%s5160_s24 + $0x20] sm:$0xff]  }
 0x132   : > { %2933 = vmatmul.bf16.gmra.mxu3 %v3933_v56  ;;  %2982 = vmatmul.bf16.gmra.mxu0 %v3937_v41  ;;  %v4500_v56 = vunpack.c.l.b16 %v4558_v54  ;;  %v4501_v41 = vunpack.c.h.b16 %v4558_v54  ;;  %1713 = vst [vmem:[#allocation2 + $0xd4] sm:$0xf] %v1681_v35  ;;  %v4361_v19 = vld [vmem:[#allocation2 + $0x80] sm:$0xf0] }
 0x133   : > { %v5536_v62 = vpop.f32.mrf.mxu2  ;;  %v1326_v63 = vpack.c.b16 %v1310_v58, %v1310_v58  ;;  %v1327_v2 = vpack.c.b16 %v1311_v17, %v1311_v17  ;;  %v4504_v58 = vunpack.c.l.b16 %v4559_v32  ;;  %v4505_v17 = vunpack.c.h.b16 %v4559_v32 }
 0x134   : > { %v1179_v52 = vpack.c.b16 %v4500_v56, %v4500_v56  ;;  %v1180_v18 = vpack.c.b16 %v4501_v41, %v4501_v41  ;;  %v1637_v56 = vrot.slane %v5604_v23, 3  ;;  %v3772_v35 = vld [vmem:[#allocation2 + $0x68] sm:$0xf]  ;;  %v1382_v23 = vld [vmem:[%s5160_s24 + $0x3c] sm:$0xf] }
 0x135   : > { %v5538_v61 = vpop.f32.mrf.mxu3  ;;  %v5548_v0 = vpop.f32.mrf.mxu1  ;;  %1358 = vst [vmem:[#allocation2 + $0xa8] sm:$0xf] %v1326_v63  ;;  %v1182_v21 = vpack.c.b16 %v4505_v17, %v4505_v17 }
 0x136   : > { %1211 = vst [vmem:[#allocation2 + $0xa4] sm:$0xf] %v1179_v52  ;;  %v1638_v48 = vsel %vm826_vm2, %v1635_v53, %v1637_v56  ;;  %v4357_v53 = vld [vmem:[#allocation2 + $0x64] sm:$0xf] }
 0x137   : > { %v5550_v39 = vpop.f32.mrf.mxu0  ;;  %1212 = vst [vmem:[#allocation2 + $0xc8] sm:$0xf] %v1180_v18  ;;  %v1666_v16 = vunpack.c.l.b16 %v1638_v48  ;;  %v1667_v43 = vunpack.c.h.b16 %v1638_v48 }
 0x138   : > { %1359 = vst [vmem:[#allocation2 + $0xcc] sm:$0xf] %v1327_v2  ;;  %v1181_v2 = vpack.c.b16 %v4504_v58, %v4504_v58 }
 0x139   : > { %1214 = vst [vmem:[#allocation2 + $0x110] sm:$0xf] %v1182_v21  ;;  %v1682_v7 = vpack.c.b16 %v1666_v16, %v1666_v16 }
 0x13a   : > { %1213 = vst [vmem:[#allocation2 + $0xec] sm:$0xf] %v1181_v2  ;;  %v4560_v2 = vld [vmem:[%s5160_s24 + $0x28] sm:$0xff]  }
 0x13b   : > { %v5553_v36 = vpop.f32.mrf.mxu2  ;;  %1714 = vst [vmem:[#allocation2 + $0xf8] sm:$0xf] %v1682_v7 }
 0x13d   : > { %v5555_v9 = vpop.f32.mrf.mxu3  ;;  %v5557_v46 = vpop.f32.mrf.mxu1 }
 0x13f   : > { %v5559_v31 = vpop.f32.mrf.mxu0 }
 0x140   : > { %2840 = vmatmul.bf16.gmra.mxu1 %v3961_v24  ;;  %2889 = vmatmul.bf16.gmra.mxu2 %v3965_v37  ;;  %v3737_v24 = vor.u32 %v4353_v25, %v3736_v15  ;;  %v3766_v25 = vld [vmem:[#allocation2 + $0x84] sm:$0xf0] }
 0x141   : > { %v3769_v32 = vor.u32 %v4357_v53, %v3766_v25 }
 0x142   : > { %2938 = vmatmul.bf16.gmra.mxu3 %v3969_v12  ;;  %2987 = vmatmul.bf16.gmra.mxu0 %v3973_v49  ;;  %v1459_v12 = vrot.slane %v1457_v13, 2  ;;  %v1462_v49 = vrot.slane %v1460_v40, 3  ;;  %v4334_v13 = vld [vmem:[%s5160_s24 + $0x34] sm:$0xff] }
 0x143   : > { %v5577_v55 = vpop.f32.mrf.mxu2 }
 0x144   : > { %v5606_v54 = vor.u32 %v1462_v49, %v1459_v12  ;;  %v1466_v12 = vshrl.u32 %v4334_v13, 16 }
 0x145   : > { %v5579_v60 = vpop.f32.mrf.mxu3  ;;  %v5589_v59 = vpop.f32.mrf.mxu1 }
 0x146   : > { %v1464_v63 = vsel %vm1420_vm10, %v5568_v29, %v5606_v54 }
 0x147   : > { %v5591_v1 = vpop.f32.mrf.mxu0  ;;  %v1522_v38 = vunpack.c.l.b16 %v1464_v63  ;;  %v1523_v29 = vunpack.c.h.b16 %v1464_v63  ;;  %v5633_v63 = vld [vmem:[%s5160_s24 + $0x34] sm:$0xff] }
 0x148   : > { %v1639_v21 = vrot.slane %v5633_v63, 3  ;;  %v4335_v63 = vld [vmem:[%s5168_s21] sm:$0xff] }
 0x149   : > { %v1538_v15 = vpack.c.b16 %v1522_v38, %v1522_v38 }
 0x14a   : > { %v1640_v45 = vsel %vm826_vm2, %v1637_v56, %v1639_v21  ;;  %v4370_v56 = vld [vmem:[#allocation2 + $0xc8] sm:$0xf0] }
 0x14b   : > { %v5594_v26 = vpop.f32.mrf.mxu2  ;;  %1570 = vst [vmem:[#allocation2 + $0xf4] sm:$0xf] %v1538_v15  ;;  %v4365_v15 = vld [vmem:[#allocation2 + $0xa4] sm:$0xf]  ;;  %v1668_v7 = vunpack.c.l.b16 %v1640_v45 }
 0x14d   : > { %v5596_v28 = vpop.f32.mrf.mxu3  ;;  %v2806_v10 = vpop.f32.mrf.mxu1 }
 0x14e   : > { %v2807_v37 = vadd.f32 %v2806_v10, %v5518_v20  ;;  %v1282_v20 = vsel %vm1273_vm9, %v1279_v44, %v1281_v11  ;;  %v3761_v10 = vor.u32 %v4356_v50, %v3758_v8 }
 0x14f   : > { %v2953_v42 = vpop.f32.mrf.mxu0  ;;  %v1312_v22 = vunpack.c.l.b16 %v1282_v20  ;;  %v1313_v57 = vunpack.c.h.b16 %v1282_v20 }
 0x150   : > { %3001 = vmatmul.bf16.vlgmr.msra.gmra.mxu1 %v3725_v30  ;;  %3050 = vmatmul.bf16.vlgmr.msra.gmra.mxu2 %v3729_v33  ;;  %v4362_v30 = vld [vmem:[#allocation2 + $0x88] sm:$0xf0]  ;;  %v1683_v33 = vpack.c.b16 %v1667_v43, %v1667_v43 }
 0x151   : > { %v1328_v3 = vpack.c.b16 %v1312_v22, %v1312_v22  ;;  %v1329_v14 = vpack.c.b16 %v1313_v57, %v1313_v57  ;;  %v3773_v20 = vor.u32 %v4362_v30, %v3772_v35  ;;  %v5629_v22 = vld [vmem:[%s5160_s24 + $0x34] sm:$0xff]  ;;  %v1468_v57 = vrot.slane %v1466_v12, 2  ;;  %v3808_v12 = vld [vmem:[#allocation2 + $0xb0] sm:$0xf] }
 0x152   : > { %3099 = vmatmul.bf16.vlgmr.msra.gmra.mxu3 %v3733_v47  ;;  %3148 = vmatmul.bf16.vlgmr.msra.gmra.mxu0 %v3737_v24  ;;  %1715 = vst [vmem:[#allocation2 + $0x11c] sm:$0xf] %v1683_v33  ;;  %v1669_v30 = vunpack.c.h.b16 %v1640_v45  ;;  %v3800_v33 = vld [vmem:[#allocation2 + $0xa8] sm:$0xf] }
 0x153   : > { %v2855_v41 = vpop.f32.mrf.mxu2  ;;  %1360 = vst [vmem:[#allocation2 + $0xf0] sm:$0xf] %v1328_v3 }
 0x154   : > { %v2856_v52 = vadd.f32 %v2855_v41, %v2807_v37  ;;  %1361 = vst [vmem:[#allocation2 + $0x114] sm:$0xf] %v1329_v14  ;;  %v3765_v37 = vor.u32 %v4361_v19, %v3764_v51 }
 0x155   : > { %v2904_v18 = vpop.f32.mrf.mxu3  ;;  %v2808_v44 = vpop.f32.mrf.mxu1 }
 0x156   : > { %v2905_v4 = vadd.f32 %v2904_v18, %v2856_v52  ;;  %v2809_v6 = vadd.f32 %v2808_v44, %v5550_v39  ;;  %v1539_v39 = vpack.c.b16 %v1523_v29, %v1523_v29  ;;  %v1283_v18 = vrot.slane %v5629_v22, 2 }
 0x157   : > { %v2955_v5 = vpop.f32.mrf.mxu0 }
 0x158   : > { %v5624_v34 = vadd.f32 %v2953_v42, %v2905_v4  ;;  %1571 = vst [vmem:[#allocation2 + $0x118] sm:$0xf] %v1539_v39  ;;  %v1469_v42 = vshll.u32 %v4334_v13, 16  ;;  %v4508_v4 = vunpack.c.l.b16 %v4560_v2  ;;  %v3794_v39 = vld [vmem:[#allocation2 + $0xc4] sm:$0xf0] }
 0x15a   : > { %v1471_v52 = vrot.slane %v1469_v42, 3  ;;  %v1183_v51 = vpack.c.b16 %v4508_v4, %v4508_v4  ;;  %v4371_v42 = vld [vmem:[#allocation2 + $0xd0] sm:$0xf0] }
 0x15b   : > { %v2857_v40 = vpop.f32.mrf.mxu2 }
 0x15c   : > { %v2858_v47 = vadd.f32 %v2857_v40, %v2809_v6  ;;  %v5637_v44 = vor.u32 %v1471_v52, %v1468_v57  ;;  %v4509_v6 = vunpack.c.h.b16 %v4560_v2  ;;  %1215 = vst [vmem:[#allocation2 + $0x134] sm:$0xf] %v1183_v51  ;;  %v1412_v40 = vunpack.c.l.b16 %v1382_v23  ;;  %v1235_v57 = vld [vmem:[%s5160_s24 + $0x3c] sm:$0xf] }
 0x15d   : > { %v2906_v24 = vpop.f32.mrf.mxu3  ;;  %v2811_v49 = vpop.f32.mrf.mxu1 }
 0x15e   : > { %v2907_v41 = vadd.f32 %v2906_v24, %v2858_v47  ;;  %v2812_v58 = vadd.f32 %v2811_v49, %v5559_v31  ;;  %v1284_v31 = vsel %vm1273_vm9, %v1281_v11, %v1283_v18  ;;  %v1473_v8 = vsel %vm1420_vm10, %v5606_v54, %v5637_v44  ;;  %v4366_v47 = vld [vmem:[#allocation2 + $0xac] sm:$0xf] }
 0x15f   : > { %v2958_v17 = vpop.f32.mrf.mxu0  ;;  %v1314_v50 = vunpack.c.l.b16 %v1284_v31  ;;  %v1315_v14 = vunpack.c.h.b16 %v1284_v31  ;;  %v1184_v29 = vpack.c.b16 %v4509_v6, %v4509_v6  ;;  %v1524_v35 = vunpack.c.l.b16 %v1473_v8 }
 0x160   : > { %3006 = vmatmul.bf16.gmra.mxu1 %v3761_v10  ;;  %3055 = vmatmul.bf16.gmra.mxu2 %v3765_v37  ;;  %v5635_v48 = vadd.f32 %v2955_v5, %v2907_v41  ;;  %v1525_v54 = vunpack.c.h.b16 %v1473_v8  ;;  %v1684_v37 = vpack.c.b16 %v1668_v7, %v1668_v7  ;;  %v1685_v49 = vpack.c.b16 %v1669_v30, %v1669_v30 }
 0x161   : > { %v1330_v16 = vpack.c.b16 %v1314_v50, %v1314_v50  ;;  %v1331_v25 = vpack.c.b16 %v1315_v14, %v1315_v14  ;;  %1216 = vst [vmem:[#allocation2 + $0x158] sm:$0xf] %v1184_v29  ;;  %v1540_v13 = vpack.c.b16 %v1524_v35, %v1524_v35  ;;  %v3797_v41 = vor.u32 %v4365_v15, %v3794_v39  ;;  %v1592_v14 = vld [vmem:[%s5160_s24 + $0x3c] sm:$0xf] }
 0x162   : > { %3104 = vmatmul.bf16.gmra.mxu3 %v3769_v32  ;;  %3153 = vmatmul.bf16.gmra.mxu0 %v3773_v20  ;;  %v1541_v24 = vpack.c.b16 %v1525_v54, %v1525_v54  ;;  %v1419_v32 = vpack.c.b16 %v1412_v40, %v1412_v40  ;;  %v3809_v50 = vor.u32 %v4371_v42, %v3808_v12  ;;  %v1622_v29 = vunpack.c.l.b16 %v1592_v14 }
 0x163   : > { %v2860_v3 = vpop.f32.mrf.mxu2  ;;  %1362 = vst [vmem:[#allocation2 + $0x138] sm:$0xf] %v1330_v16 }
 0x164   : > { %v2861_v5 = vadd.f32 %v2860_v3, %v2812_v58  ;;  %1363 = vst [vmem:[#allocation2 + $0x15c] sm:$0xf] %v1331_v25  ;;  %v3801_v58 = vor.u32 %v4370_v56, %v3800_v33  ;;  %v1475_v31 = vshrl.u32 %v1419_v32, 16  ;;  %v1478_v3 = vshll.u32 %v1419_v32, 16  ;;  %v3836_v32 = vld [vmem:[#allocation2 + $0xf0] sm:$0xf] }
 0x165   : > { %v2909_v38 = vpop.f32.mrf.mxu3  ;;  %v2813_v11 = vpop.f32.mrf.mxu1  ;;  %1572 = vst [vmem:[#allocation2 + $0x13c] sm:$0xf] %v1540_v13  ;;  %v5668_v15 = vpack.c.b16 %v1622_v29, %v1622_v29 }
 0x166   : > { %v2910_v43 = vadd.f32 %v2909_v38, %v2861_v5  ;;  %v2814_v19 = vadd.f32 %v2813_v11, %v5591_v1  ;;  %v3802_v1 = vld [vmem:[#allocation2 + $0xcc] sm:$0xf0]  ;;  %1573 = vst [vmem:[#allocation2 + $0x160] sm:$0xf] %v1541_v24  ;;  %v1477_v11 = vrot.slane %v1475_v31, 2  ;;  %v1480_v51 = vrot.slane %v1478_v3, 3 }
 0x167   : > { %v2960_v53 = vpop.f32.mrf.mxu0  ;;  %v3805_v6 = vor.u32 %v4366_v47, %v3802_v1  ;;  %1716 = vst [vmem:[#allocation2 + $0x140] sm:$0xf] %v1684_v37  ;;  %v1641_v56 = vrot.slane %v5668_v15, 3  ;;  %v4374_v37 = vld [vmem:[#allocation2 + $0xec] sm:$0xf] }
 0x168   : > { %v5656_v10 = vadd.f32 %v2958_v17, %v2910_v43  ;;  %v1265_v17 = vunpack.c.l.b16 %v1235_v57  ;;  %1717 = vst [vmem:[#allocation2 + $0x164] sm:$0xf] %v1685_v49  ;;  %v3830_v49 = vld [vmem:[#allocation2 + $0x10c] sm:$0xf0]  ;;  %v3844_v31 = vld [vmem:[#allocation2 + $0xf8] sm:$0xf] }
 0x16a   : > { %v5661_v45 = vpack.c.b16 %v1265_v17, %v1265_v17  ;;  %v3838_v17 = vld [vmem:[#allocation2 + $0x114] sm:$0xf0] }
 0x16b   : > { %v2862_v20 = vpop.f32.mrf.mxu2 }
 0x16c   : > { %v2863_v52 = vadd.f32 %v2862_v20, %v2814_v19  ;;  %v1285_v16 = vrot.slane %v5661_v45, 2  ;;  %v5666_v19 = vor.u32 %v1480_v51, %v1477_v11  ;;  %v1496_v51 = vshrl.u32 %v4335_v63, 16 }
 0x16d   : > { %v2911_v2 = vpop.f32.mrf.mxu3  ;;  %v2816_v4 = vpop.f32.mrf.mxu1 }
 0x16e   : > { %v2912_v5 = vadd.f32 %v2911_v2, %v2863_v52  ;;  %v2817_v38 = vadd.f32 %v2816_v4, %v5516_v27  ;;  %v4561_v27 = vld [vmem:[%s5160_s24 + $0x30] sm:$0xff]   ;;  %v1286_v25 = vsel %vm1273_vm9, %v1283_v18, %v1285_v16  ;;  %v1482_v33 = vsel %vm1420_vm10, %v5637_v44, %v5666_v19  ;;  %v4380_v4 = vld [vmem:[#allocation2 + $0x118] sm:$0xf0] }
 0x16f   : > { %v2963_v8 = vpop.f32.mrf.mxu0  ;;  %v4512_v39 = vunpack.c.l.b16 %v4561_v27  ;;  %v4513_v54 = vunpack.c.h.b16 %v4561_v27  ;;  %v1316_v7 = vunpack.c.l.b16 %v1286_v25  ;;  %v1317_v30 = vunpack.c.h.b16 %v1286_v25 }
 0x170   : > { %3011 = vmatmul.bf16.gmra.mxu1 %v3797_v41  ;;  %3060 = vmatmul.bf16.gmra.mxu2 %v3801_v58  ;;  %v5664_v43 = vadd.f32 %v2960_v53, %v2912_v5  ;;  %v1526_v42 = vunpack.c.l.b16 %v1482_v33  ;;  %v1527_v20 = vunpack.c.h.b16 %v1482_v33  ;;  %v1642_v44 = vsel %vm826_vm2, %v1639_v21, %v1641_v56  ;;  %v4379_v41 = vld [vmem:[#allocation2 + $0x110] sm:$0xf0] }
 0x171   : > { %v1185_v40 = vpack.c.b16 %v4512_v39, %v4512_v39  ;;  %v1186_v47 = vpack.c.b16 %v4513_v54, %v4513_v54  ;;  %v1332_v1 = vpack.c.b16 %v1316_v7, %v1316_v7  ;;  %v1333_v12 = vpack.c.b16 %v1317_v30, %v1317_v30  ;;  %v4375_v58 = vld [vmem:[#allocation2 + $0xf4] sm:$0xf] }
 0x172   : > { %3109 = vmatmul.bf16.gmra.mxu3 %v3805_v6  ;;  %3158 = vmatmul.bf16.gmra.mxu0 %v3809_v50  ;;  %v1542_v57 = vpack.c.b16 %v1526_v42, %v1526_v42  ;;  %v1671_v52 = vunpack.c.h.b16 %v1642_v44  ;;  %v1543_v3 = vpack.c.b16 %v1527_v20, %v1527_v20  ;;  %v3833_v21 = vor.u32 %v4374_v37, %v3830_v49  ;;  %v5691_v7 = vld [vmem:[%s5168_s21] sm:$0xff] }
 0x173   : > { %v2865_v35 = vpop.f32.mrf.mxu2  ;;  %1217 = vst [vmem:[#allocation2 + $0x17c] sm:$0xf] %v1185_v40  ;;  %v3837_v11 = vor.u32 %v4379_v41, %v3836_v32  ;;  %v3841_v27 = vor.u32 %v4375_v58, %v3838_v17  ;;  %v3845_v25 = vor.u32 %v4380_v4, %v3844_v31  ;;  %v1498_v30 = vrot.slane %v1496_v51, 6  ;;  %v4562_v40 = vld [vmem:[%s5160_s24 + $0x38] sm:$0xff]   ;;  %s3322_s24 = sshll.u32 %s5777_s4, 4  ;;  %s3323_s24 = int_to_ptr.vmem [resolvable:$true] %s3322_s24 }
 0x174   : > { %v2866_v53 = vadd.f32 %v2865_v35, %v2817_v38  ;;  %1218 = vst [vmem:[#allocation2 + $0x1a0] sm:$0xf] %v1186_v47  ;;  %v1687_v50 = vpack.c.b16 %v1671_v52, %v1671_v52  ;;  %v3866_v52 = vld [vmem:[#allocation2 + $0x154] sm:$0xf0]  ;;  %v4388_v4 = vld [vmem:[#allocation2 + $0x158] sm:$0xf0] }
 0x175   : > { %v2914_v23 = vpop.f32.mrf.mxu3  ;;  %v2818_v13 = vpop.f32.mrf.mxu1  ;;  %1364 = vst [vmem:[#allocation2 + $0x180] sm:$0xf] %v1332_v1  ;;  %v4336_v51 = vld [vmem:[%s5168_s21 + $0x8] sm:$0x70] }
 0x176   : > { %v2915_v22 = vadd.f32 %v2914_v23, %v2866_v53  ;;  %v2819_v18 = vadd.f32 %v2818_v13, %v5548_v0  ;;  %v1670_v0 = vunpack.c.l.b16 %v1642_v44  ;;  %1365 = vst [vmem:[#allocation2 + $0x1a4] sm:$0xf] %v1333_v12  ;;  %v1298_v23 = vrot.slane %v5691_v7, 6 }
 0x177   : > { %v2965_v24 = vpop.f32.mrf.mxu0  ;;  %1574 = vst [vmem:[#allocation2 + $0x184] sm:$0xf] %v1542_v57 }
 0x178   : > { %v5686_v2 = vadd.f32 %v2963_v8, %v2915_v22  ;;  %v1686_v6 = vpack.c.b16 %v1670_v0, %v1670_v0  ;;  %1575 = vst [vmem:[#allocation2 + $0x1a8] sm:$0xf] %v1543_v3  ;;  %v1499_v8 = vshll.u32 %v4335_v63, 16  ;;  %v1304_v47 = vsel %vm1297_vm11, %v1285_v16, %v1298_v23  ;;  %v4383_v0 = vld [vmem:[#allocation2 + $0x134] sm:$0xf] }
 0x179   : > { %1719 = vst [vmem:[#allocation2 + $0x1ac] sm:$0xf] %v1687_v50  ;;  %v4516_v22 = vunpack.c.l.b16 %v4562_v40  ;;  %v1318_v37 = vunpack.c.l.b16 %v1304_v47  ;;  %v1319_v12 = vunpack.c.h.b16 %v1304_v47  ;;  %v3872_v3 = vld [vmem:[#allocation2 + $0x138] sm:$0xf]  ;;  %v4384_v50 = vld [vmem:[#allocation2 + $0x13c] sm:$0xf] }
 0x17a   : > { %1718 = vst [vmem:[#allocation2 + $0x188] sm:$0xf] %v1686_v6  ;;  %v1501_v53 = vrot.slane %v1499_v8, 7  ;;  %v3874_v63 = vld [vmem:[#allocation2 + $0x15c] sm:$0xf0] }
 0x17b   : > { %v2867_v14 = vpop.f32.mrf.mxu2  ;;  %v1187_v44 = vpack.c.b16 %v4516_v22, %v4516_v22  ;;  %v1334_v58 = vpack.c.b16 %v1318_v37, %v1318_v37  ;;  %v1335_v17 = vpack.c.b16 %v1319_v12, %v1319_v12  ;;  %v3880_v8 = vld [vmem:[#allocation2 + $0x140] sm:$0xf]  ;;  %v4328_v37 = vld [vmem:[%s5168_s21 + $0x8] sm:$0x30] }
 0x17c   : > { %v2868_v5 = vadd.f32 %v2867_v14, %v2819_v18  ;;  %v5694_v33 = vor.u32 %v1501_v53, %v1498_v30  ;;  %v4517_v18 = vunpack.c.h.b16 %v4562_v40  ;;  %v3873_v53 = vor.u32 %v4388_v4, %v3872_v3 }
 0x17d   : > { %v2916_v38 = vpop.f32.mrf.mxu3  ;;  %v2821_v29 = vpop.f32.mrf.mxu1  ;;  %1219 = vst [vmem:[#allocation2 + $0x1c4] sm:$0xf] %v1187_v44  ;;  %v3700_v44 = vld [vmem:[%s5168_s21 + $0x8] sm:$0xf] }
 0x17e   : > { %v2917_v35 = vadd.f32 %v2916_v38, %v2868_v5  ;;  %v2822_v39 = vadd.f32 %v2821_v29, %v5557_v46  ;;  %v5699_v46 = vld [vmem:[%s5168_s21] sm:$0xff]  ;;  %v1514_v32 = vsel %vm1513_vm13, %v5666_v19, %v5694_v33  ;;  %v1188_v41 = vpack.c.b16 %v4517_v18, %v4517_v18  ;;  %1366 = vst [vmem:[#allocation2 + $0x1c8] sm:$0xf] %v1334_v58  ;;  %v3636_v18 = vld [vmem:[%s5168_s21 + $0x8] sm:$0xf] }
 0x17f   : > { %v2968_v54 = vpop.f32.mrf.mxu0  ;;  %v1528_v31 = vunpack.c.l.b16 %v1514_v32  ;;  %v1529_v19 = vunpack.c.h.b16 %v1514_v32  ;;  %v4389_v29 = vld [vmem:[#allocation2 + $0x160] sm:$0xf0]  ;;  %1367 = vst [vmem:[#allocation2 + $0x1ec] sm:$0xf] %v1335_v17  ;;  %v4344_v58 = vld [vmem:[%s5168_s21 + $0x8] sm:$0x70] }
 0x180   : > { %3016 = vmatmul.bf16.gmra.mxu1 %v3833_v21  ;;  %3065 = vmatmul.bf16.gmra.mxu2 %v3837_v11  ;;  %v5701_v13 = vadd.f32 %v2965_v24, %v2917_v35  ;;  %v1653_v24 = vrot.slane %v5699_v46, 7  ;;  %1220 = vst [vmem:[#allocation2 + $0x1e8] sm:$0xf] %v1188_v41  ;;  %v3668_v11 = vld [vmem:[%s5168_s21 + $0x8] sm:$0xf]  ;;  %v3869_v35 = vor.u32 %v4383_v0, %v3866_v52  ;;  %v4519_v17 = vld [vmem:[%s5168_s21] sm:$0xff]  }
 0x181   : > { %v1545_v38 = vpack.c.b16 %v1529_v19, %v1529_v19  ;;  %v3881_v22 = vor.u32 %v4389_v29, %v3880_v8  ;;  %v3701_v0 = vor.u32 %v4344_v58, %v3700_v44  ;;  %v4520_v4 = vunpack.c.l.b16 %v4519_v17 }
 0x182   : > { %3114 = vmatmul.bf16.gmra.mxu3 %v3841_v27  ;;  %3163 = vmatmul.bf16.gmra.mxu0 %v3845_v25  ;;  %v1658_v6 = vsel %vm848_vm6, %v1641_v56, %v1653_v24  ;;  %v3669_v56 = vor.u32 %v4336_v51, %v3668_v11  ;;  %v4521_v19 = vunpack.c.h.b16 %v4519_v17 }
 0x183   : > { %v2870_v1 = vpop.f32.mrf.mxu2  ;;  %v1672_v14 = vunpack.c.l.b16 %v1658_v6  ;;  %v1673_v21 = vunpack.c.h.b16 %v1658_v6  ;;  %1577 = vst [vmem:[#allocation2 + $0x1f0] sm:$0xf] %v1545_v38  ;;  %v1189_v38 = vpack.c.b16 %v4520_v4, %v4520_v4 }
 0x184   : > { %v2871_v42 = vadd.f32 %v2870_v1, %v2822_v39  ;;  %v1507_v40 = vshll.u32 %v3669_v56, 16  ;;  %v3877_v1 = vor.u32 %v4384_v50, %v3874_v63  ;;  %v1190_v11 = vpack.c.b16 %v4521_v19, %v4521_v19 }
 0x185   : > { %v2919_v49 = vpop.f32.mrf.mxu3  ;;  %v2823_v20 = vpop.f32.mrf.mxu1  ;;  %v1688_v27 = vpack.c.b16 %v1672_v14, %v1672_v14  ;;  %v1689_v15 = vpack.c.b16 %v1673_v21, %v1673_v21  ;;  %v1654_v14 = vrot.slane %v3701_v0, 7  ;;  %1221 = vst [vmem:[#allocation2 + $0x20c] sm:$0xf] %v1189_v38 }
 0x186   : > { %v2920_v57 = vadd.f32 %v2919_v49, %v2871_v42  ;;  %v2824_v45 = vadd.f32 %v2823_v20, %v5589_v59  ;;  %v1544_v59 = vpack.c.b16 %v1528_v31, %v1528_v31  ;;  %v3637_v49 = vor.u32 %v4328_v37, %v3636_v18  ;;  %1222 = vst [vmem:[#allocation2 + $0x230] sm:$0xf] %v1190_v11  ;;  %v4398_v18 = vld [vmem:[#allocation2 + $0x1a8] sm:$0xf0] }
 0x187   : > { %v2970_v16 = vpop.f32.mrf.mxu0  ;;  %1720 = vst [vmem:[#allocation2 + $0x1d0] sm:$0xf] %v1688_v27  ;;  %v1509_v20 = vrot.slane %v1507_v40, 7  ;;  %v3902_v27 = vld [vmem:[#allocation2 + $0x19c] sm:$0xf0] }
 0x188   : > { %v5718_v5 = vadd.f32 %v2968_v54, %v2920_v57  ;;  %1576 = vst [vmem:[#allocation2 + $0x1cc] sm:$0xf] %v1544_v59  ;;  %v1504_v54 = vshrl.u32 %v3669_v56, 16  ;;  %v1299_v41 = vrot.slane %v3637_v49, 6  ;;  %v1655_v56 = vsel %vm848_vm6, %v1653_v24, %v1654_v14  ;;  %v3910_v40 = vld [vmem:[#allocation2 + $0x1a4] sm:$0xf0] }
 0x189   : > { %1721 = vst [vmem:[#allocation2 + $0x1f4] sm:$0xf] %v1689_v15 }
 0x18a   : > { %v1506_v32 = vrot.slane %v1504_v54, 6  ;;  %v1300_v31 = vsel %vm1297_vm11, %v1298_v23, %v1299_v41  ;;  %v4392_v23 = vld [vmem:[#allocation2 + $0x17c] sm:$0xf]  ;;  %v4393_v54 = vld [vmem:[#allocation2 + $0x184] sm:$0xf] }
 0x18b   : > { %v2872_v25 = vpop.f32.mrf.mxu2  ;;  %v1320_v6 = vunpack.c.l.b16 %v1300_v31  ;;  %v1321_v50 = vunpack.c.h.b16 %v1300_v31  ;;  %v3913_v44 = vor.u32 %v4393_v54, %v3910_v40  ;;  %v3946_v38 = vld [vmem:[#allocation2 + $0x1ec] sm:$0xf0] }
 0x18c   : > { %v2873_v39 = vadd.f32 %v2872_v25, %v2824_v45  ;;  %v1510_v45 = vor.u32 %v1509_v20, %v1506_v32  ;;  %v3908_v25 = vld [vmem:[#allocation2 + $0x180] sm:$0xf]  ;;  %v3905_v32 = vor.u32 %v4392_v23, %v3902_v27 }
 0x18d   : > { %v2921_v30 = vpop.f32.mrf.mxu3  ;;  %v2826_v47 = vpop.f32.mrf.mxu1  ;;  %v1337_v7 = vpack.c.b16 %v1321_v50, %v1321_v50  ;;  %v3938_v50 = vld [vmem:[#allocation2 + $0x1e4] sm:$0xf0] }
 0x18e   : > { %v2922_v12 = vadd.f32 %v2921_v30, %v2873_v39  ;;  %v2827_v52 = vadd.f32 %v2826_v47, %v5536_v62  ;;  %v1336_v62 = vpack.c.b16 %v1320_v6, %v1320_v6  ;;  %v1674_v39 = vunpack.c.l.b16 %v1655_v56  ;;  %v4401_v6 = vld [vmem:[#allocation2 + $0x1c4] sm:$0xf]  ;;  %v3952_v11 = vld [vmem:[#allocation2 + $0x1d0] sm:$0xf] }
 0x18f   : > { %v2973_v42 = vpop.f32.mrf.mxu0  ;;  %v1675_v30 = vunpack.c.h.b16 %v1655_v56  ;;  %1369 = vst [vmem:[#allocation2 + $0x234] sm:$0xf] %v1337_v7  ;;  %v4402_v14 = vld [vmem:[#allocation2 + $0x1cc] sm:$0xf]  ;;  %v3941_v7 = vor.u32 %v4401_v6, %v3938_v50 }
 0x190   : > { %3021 = vmatmul.bf16.gmra.mxu1 %v3869_v35  ;;  %3070 = vmatmul.bf16.gmra.mxu2 %v3873_v53  ;;  %v5726_v57 = vadd.f32 %v2970_v16, %v2922_v12  ;;  %v1511_v16 = vsel %vm1494_vm12, %v5694_v33, %v1510_v45  ;;  %v4397_v35 = vld [vmem:[#allocation2 + $0x1a0] sm:$0xf0]  ;;  %1368 = vst [vmem:[#allocation2 + $0x210] sm:$0xf] %v1336_v62  ;;  %v4407_v62 = vld [vmem:[#allocation2 + $0x1f0] sm:$0xf0] }
 0x191   : > { %v1530_v29 = vunpack.c.l.b16 %v1511_v16  ;;  %v1531_v15 = vunpack.c.h.b16 %v1511_v16  ;;  %v1690_v46 = vpack.c.b16 %v1674_v39, %v1674_v39  ;;  %v1691_v37 = vpack.c.b16 %v1675_v30, %v1675_v30  ;;  %v4406_v16 = vld [vmem:[#allocation2 + $0x1e8] sm:$0xf0] }
 0x192   : > { %3119 = vmatmul.bf16.gmra.mxu3 %v3877_v1  ;;  %3168 = vmatmul.bf16.gmra.mxu0 %v3881_v22  ;;  %v3916_v22 = vld [vmem:[#allocation2 + $0x188] sm:$0xf]  ;;  %v3909_v20 = vor.u32 %v4397_v35, %v3908_v25  ;;  %v3949_v27 = vor.u32 %v4402_v14, %v3946_v38 }
 0x193   : > { %v2875_v3 = vpop.f32.mrf.mxu2  ;;  %v1546_v33 = vpack.c.b16 %v1530_v29, %v1530_v29  ;;  %v1547_v47 = vpack.c.b16 %v1531_v15, %v1531_v15  ;;  %v3917_v41 = vor.u32 %v4398_v18, %v3916_v22  ;;  %1722 = vst [vmem:[#allocation2 + $0x218] sm:$0xf] %v1690_v46  ;;  %v3953_v15 = vor.u32 %v4407_v62, %v3952_v11  ;;  %v3974_v22 = vld [vmem:[#allocation2 + $0x22c] sm:$0xf0] }
 0x194   : > { %v2876_v63 = vadd.f32 %v2875_v3, %v2827_v52  ;;  %1723 = vst [vmem:[#allocation2 + $0x23c] sm:$0xf] %v1691_v37 }
 0x195   : > { %v2924_v59 = vpop.f32.mrf.mxu3  ;;  %v2828_v21 = vpop.f32.mrf.mxu1  ;;  %1578 = vst [vmem:[#allocation2 + $0x214] sm:$0xf] %v1546_v33 }
 0x196   : > { %v2925_v51 = vadd.f32 %v2924_v59, %v2876_v63  ;;  %v2829_v1 = vadd.f32 %v2828_v21, %v5553_v36  ;;  %1579 = vst [vmem:[#allocation2 + $0x238] sm:$0xf] %v1547_v47  ;;  %v3944_v59 = vld [vmem:[#allocation2 + $0x1c8] sm:$0xf]  ;;  %v4415_v37 = vld [vmem:[#allocation2 + $0x230] sm:$0xf0] }
 0x197   : > { %v2975_v8 = vpop.f32.mrf.mxu0  ;;  %v3945_v29 = vor.u32 %v4406_v16, %v3944_v59  ;;  %v3980_v46 = vld [vmem:[#allocation2 + $0x210] sm:$0xf] }
 0x198   : > { %v5738_v53 = vadd.f32 %v2973_v42, %v2925_v51 }
 0x19b   : > { %v2877_v24 = vpop.f32.mrf.mxu2 }
 0x19c   : > { %v2878_v12 = vadd.f32 %v2877_v24, %v2829_v1  ;;  %v4410_v1 = vld [vmem:[#allocation2 + $0x20c] sm:$0xf]  ;;  %v4411_v24 = vld [vmem:[#allocation2 + $0x214] sm:$0xf] }
 0x19d   : > { %v2926_v49 = vpop.f32.mrf.mxu3  ;;  %v2831_v42 = vpop.f32.mrf.mxu1 }
 0x19e   : > { %v2927_v58 = vadd.f32 %v2926_v49, %v2878_v12  ;;  %v2832_v0 = vadd.f32 %v2831_v42, %v5577_v55  ;;  %v3982_v49 = vld [vmem:[#allocation2 + $0x234] sm:$0xf0] }
 0x19f   : > { %v2978_v45 = vpop.f32.mrf.mxu0 }
 0x1a0   : > { %3026 = vmatmul.bf16.gmra.mxu1 %v3905_v32  ;;  %3075 = vmatmul.bf16.gmra.mxu2 %v3909_v20  ;;  %v5741_v36 = vadd.f32 %v2975_v8, %v2927_v58  ;;  %v3988_v32 = vld [vmem:[#allocation2 + $0x218] sm:$0xf]  ;;  %v4416_v20 = vld [vmem:[#allocation2 + $0x238] sm:$0xf0]  ;;  %v3981_v58 = vor.u32 %v4415_v37, %v3980_v46 }
 0x1a2   : > { %3124 = vmatmul.bf16.gmra.mxu3 %v3913_v44  ;;  %3173 = vmatmul.bf16.gmra.mxu0 %v3917_v41  ;;  %v3977_v41 = vor.u32 %v4410_v1, %v3974_v22 }
 0x1a3   : > { %v2880_v52 = vpop.f32.mrf.mxu2 }
 0x1a4   : > { %v2881_v17 = vadd.f32 %v2880_v52, %v2832_v0  ;;  %v3985_v0 = vor.u32 %v4411_v24, %v3982_v49  ;;  %v3989_v52 = vor.u32 %v4416_v20, %v3988_v32 }
 0x1a5   : > { %v2929_v31 = vpop.f32.mrf.mxu3  ;;  %v2833_v3 = vpop.f32.mrf.mxu1 }
 0x1a6   : > { %v2930_v4 = vadd.f32 %v2929_v31, %v2881_v17  ;;  %v2834_v21 = vadd.f32 %v2833_v3, %v5594_v26 }
 0x1a7   : > { %v2980_v19 = vpop.f32.mrf.mxu0 }
 0x1a8   : > { %v5744_v63 = vadd.f32 %v2978_v45, %v2930_v4 }
 0x1ab   : > { %v2882_v51 = vpop.f32.mrf.mxu2 }
 0x1ac   : > { %v2883_v55 = vadd.f32 %v2882_v51, %v2834_v21 }
 0x1ad   : > { %v2931_v8 = vpop.f32.mrf.mxu3  ;;  %v2836_v23 = vpop.f32.mrf.mxu1 }
 0x1ae   : > { %v2932_v56 = vadd.f32 %v2931_v8, %v2883_v55  ;;  %v2837_v26 = vadd.f32 %v2836_v23, %v5538_v61 }
 0x1af   : > { %v2983_v25 = vpop.f32.mrf.mxu0 }
 0x1b0   : > { %3031 = vmatmul.bf16.gmra.mxu1 %v3941_v7  ;;  %3080 = vmatmul.bf16.gmra.mxu2 %v3945_v29  ;;  %v5747_v35 = vadd.f32 %v2980_v19, %v2932_v56 }
 0x1b2   : > { %3129 = vmatmul.bf16.gmra.mxu3 %v3949_v27  ;;  %3178 = vmatmul.bf16.gmra.mxu0 %v3953_v15 }
 0x1b3   : > { %v2885_v33 = vpop.f32.mrf.mxu2 }
 0x1b4   : > { %v2886_v39 = vadd.f32 %v2885_v33, %v2837_v26  ;;  %v4523_v26 = vld [vmem:[%s5179_s19] sm:$0xff]  }
 0x1b5   : > { %v2934_v30 = vpop.f32.mrf.mxu3  ;;  %v2838_v54 = vpop.f32.mrf.mxu1  ;;  %v4525_v20 = vunpack.c.h.bf16 %v4523_v26 }
 0x1b6   : > { %v2935_v40 = vadd.f32 %v2934_v30, %v2886_v39  ;;  %v2839_v12 = vadd.f32 %v2838_v54, %v5555_v9  ;;  %v5771_v39 = vld [vmem:[%s5936_s13] ss:$0 sm:$0xff]  ;;  %v4524_v30 = vunpack.c.l.bf16 %v4523_v26 }
 0x1b7   : > { %v2985_v47 = vpop.f32.mrf.mxu0 }
 0x1b8   : > { %v5750_v18 = vadd.f32 %v2983_v25, %v2935_v40 }
 0x1bb   : > { %v2887_v42 = vpop.f32.mrf.mxu2 }
 0x1bc   : > { %v2888_v61 = vadd.f32 %v2887_v42, %v2839_v12 }
 0x1bd   : > { %v2936_v44 = vpop.f32.mrf.mxu3  ;;  %v2841_v45 = vpop.f32.mrf.mxu1 }
 0x1be   : > { %v2937_v17 = vadd.f32 %v2936_v44, %v2888_v61  ;;  %v2842_v9 = vadd.f32 %v2841_v45, %v5579_v60 }
 0x1bf   : > { %v2988_v31 = vpop.f32.mrf.mxu0 }
 0x1c0   : > { %3036 = vmatmul.bf16.gmra.mxu1 %v3977_v41  ;;  %3085 = vmatmul.bf16.gmra.mxu2 %v3981_v58  ;;  %v5753_v3 = vadd.f32 %v2985_v47, %v2937_v17 }
 0x1c2   : > { %3134 = vmatmul.bf16.gmra.mxu3 %v3985_v0  ;;  %3183 = vmatmul.bf16.gmra.mxu0 %v3989_v52 }
 0x1c3   : > { %v2890_v4 = vpop.f32.mrf.mxu2 }
 0x1c4   : > { %v2891_v19 = vadd.f32 %v2890_v4, %v2842_v9 }
 0x1c5   : > { %v2939_v6 = vpop.f32.mrf.mxu3  ;;  %v2843_v50 = vpop.f32.mrf.mxu1 }
 0x1c6   : > { %v2940_v59 = vadd.f32 %v2939_v6, %v2891_v19  ;;  %v2844_v21 = vadd.f32 %v2843_v50, %v5596_v28  ;;  %v5765_v28 = vld [vmem:[%s5935_s20] ss:$0 sm:$0xff] }
 0x1c7   : > { %v2990_v16 = vpop.f32.mrf.mxu0 }
 0x1c8   : > { %v5756_v14 = vadd.f32 %v2988_v31, %v2940_v59  ;;  %v4563_v31 = vld [vmem:[%s5179_s19 + $0x8] sm:$0xff]  }
 0x1c9   : > { %v4528_v6 = vunpack.c.l.bf16 %v4563_v31 }
 0x1cb   : > { %v2892_v38 = vpop.f32.mrf.mxu2 }
 0x1cc   : > { %v2893_v11 = vadd.f32 %v2892_v38, %v2844_v21 }
 0x1cd   : > { %v2941_v62 = vpop.f32.mrf.mxu3  ;;  %v3002_v51 = vpop.f32.mrf.mxu1 }
 0x1ce   : > { %v2942_v55 = vadd.f32 %v2941_v62, %v2893_v11  ;;  %v3003_v60 = vadd.f32 %v3002_v51, %v5624_v34 }
 0x1cf   : > { %v3149_v8 = vpop.f32.mrf.mxu0 }
 0x1d0   : > { %v5759_v7 = vadd.f32 %v2990_v16, %v2942_v55 }
 0x1d3   : > { %v3051_v29 = vpop.f32.mrf.mxu2 }
 0x1d4   : > { %v3052_v23 = vadd.f32 %v3051_v29, %v3003_v60  ;;  %v4529_v29 = vunpack.c.h.bf16 %v4563_v31 }
 0x1d5   : > { %v3100_v27 = vpop.f32.mrf.mxu3  ;;  %v3004_v15 = vpop.f32.mrf.mxu1 }
 0x1d6   : > { %v3101_v56 = vadd.f32 %v3100_v27, %v3052_v23  ;;  %v3005_v54 = vadd.f32 %v3004_v15, %v5635_v48 }
 0x1d7   : > { %v3151_v25 = vpop.f32.mrf.mxu0 }
 0x1d8   : > { %v3150_v33 = vadd.f32 %v3149_v8, %v3101_v56 }
 0x1da   : > { %v3193_v34 = vmul.f32 %v5765_v28, %v3150_v33 }
 0x1db   : > { %v3053_v40 = vpop.f32.mrf.mxu2 }
 0x1dc   : > { %v3213_v47 = vadd.f32 %v5771_v39, %v3193_v34  ;;  %v3054_v1 = vadd.f32 %v3053_v40, %v3005_v54 }
 0x1dd   : > { %v3102_v22 = vpop.f32.mrf.mxu3  ;;  %v3007_v46 = vpop.f32.mrf.mxu1 }
 0x1de   : > { %v3261_v37 = vadd.f32 %v4524_v30, %v3213_v47  ;;  %v3103_v24 = vadd.f32 %v3102_v22, %v3054_v1  ;;  %v3008_v42 = vadd.f32 %v3007_v46, %v5656_v10  ;;  %v4564_v30 = vld [vmem:[%s5179_s19 + $0x10] sm:$0xff]  }
 0x1df   : > { %v3154_v12 = vpop.f32.mrf.mxu0  ;;  %v4532_v1 = vunpack.c.l.bf16 %v4564_v30 }
 0x1e0   : > { %v3277_v49 = vmax.f32 %v3261_v37, 0.0  ;;  %v3152_v32 = vadd.f32 %v3151_v25, %v3103_v24 }
 0x1e2   : > { %3293 = vst [vmem:[%s5777_s4] sm:$0xff] %v3277_v49  ;;  %v3194_v48 = vmul.f32 %v5765_v28, %v3152_v32 }
 0x1e3   : > { %v3056_v61 = vpop.f32.mrf.mxu2 }
 0x1e4   : > { %v3214_v44 = vadd.f32 %v5771_v39, %v3194_v48  ;;  %v3057_v41 = vadd.f32 %v3056_v61, %v3008_v42 }
 0x1e5   : > { %v3105_v58 = vpop.f32.mrf.mxu3  ;;  %v3009_v45 = vpop.f32.mrf.mxu1 }
 0x1e6   : > { %v3262_v0 = vadd.f32 %v4525_v20, %v3214_v44  ;;  %v3106_v52 = vadd.f32 %v3105_v58, %v3057_v41  ;;  %v3010_v50 = vadd.f32 %v3009_v45, %v5664_v43  ;;  %v4533_v44 = vunpack.c.h.bf16 %v4564_v30  ;;  %v4566_v30 = vld [vmem:[%s5179_s19 + $0x20] sm:$0xff]  }
 0x1e7   : > { %v3156_v17 = vpop.f32.mrf.mxu0 }
 0x1e8   : > { %v3278_v9 = vmax.f32 %v3262_v0, 0.0  ;;  %v3155_v4 = vadd.f32 %v3154_v12, %v3106_v52 }
 0x1ea   : > { %3294 = vst [vmem:[%s5777_s4 + $0x8] sm:$0xff] %v3278_v9  ;;  %v3195_v19 = vmul.f32 %v5765_v28, %v3155_v4  ;;  %v4565_v4 = vld [vmem:[%s5179_s19 + $0x18] sm:$0xff]  }
 0x1eb   : > { %v3058_v10 = vpop.f32.mrf.mxu2 }
 0x1ec   : > { %v3215_v59 = vadd.f32 %v5771_v39, %v3195_v19  ;;  %v3059_v16 = vadd.f32 %v3058_v10, %v3010_v50  ;;  %v4536_v10 = vunpack.c.l.bf16 %v4565_v4 }
 0x1ed   : > { %v3107_v21 = vpop.f32.mrf.mxu3  ;;  %v3012_v38 = vpop.f32.mrf.mxu1 }
 0x1ee   : > { %v3263_v11 = vadd.f32 %v4528_v6, %v3215_v59  ;;  %v3108_v62 = vadd.f32 %v3107_v21, %v3059_v16  ;;  %v3013_v23 = vadd.f32 %v3012_v38, %v5686_v2 }
 0x1ef   : > { %v3159_v51 = vpop.f32.mrf.mxu0 }
 0x1f0   : > { %v3279_v55 = vmax.f32 %v3263_v11, 0.0  ;;  %v3157_v8 = vadd.f32 %v3156_v17, %v3108_v62 }
 0x1f2   : > { %3295 = vst [vmem:[%s5777_s4 + $0x10] sm:$0xff] %v3279_v55  ;;  %v3196_v60 = vmul.f32 %v5765_v28, %v3157_v8 }
 0x1f3   : > { %v3061_v43 = vpop.f32.mrf.mxu2 }
 0x1f4   : > { %v3216_v27 = vadd.f32 %v5771_v39, %v3196_v60  ;;  %v3062_v15 = vadd.f32 %v3061_v43, %v3013_v23  ;;  %v4537_v23 = vunpack.c.h.bf16 %v4565_v4 }
 0x1f5   : > { %v3110_v56 = vpop.f32.mrf.mxu3  ;;  %v3014_v25 = vpop.f32.mrf.mxu1 }
 0x1f6   : > { %v3264_v26 = vadd.f32 %v4529_v29, %v3216_v27  ;;  %v3111_v33 = vadd.f32 %v3110_v56, %v3062_v15  ;;  %v3015_v22 = vadd.f32 %v3014_v25, %v5701_v13 }
 0x1f7   : > { %v3161_v34 = vpop.f32.mrf.mxu0 }
 0x1f8   : > { %v3280_v54 = vmax.f32 %v3264_v26, 0.0  ;;  %v3160_v40 = vadd.f32 %v3159_v51, %v3111_v33 }
 0x1fa   : > { %3296 = vst [vmem:[%s5777_s4 + $0x18] sm:$0xff] %v3280_v54  ;;  %v3197_v47 = vmul.f32 %v5765_v28, %v3160_v40 }
 0x1fb   : > { %v3063_v2 = vpop.f32.mrf.mxu2 }
 0x1fc   : > { %v3217_v46 = vadd.f32 %v5771_v39, %v3197_v47  ;;  %v3064_v37 = vadd.f32 %v3063_v2, %v3015_v22 }
 0x1fd   : > { %v3112_v24 = vpop.f32.mrf.mxu3  ;;  %v3017_v12 = vpop.f32.mrf.mxu1 }
 0x1fe   : > { %v3265_v49 = vadd.f32 %v4532_v1, %v3217_v46  ;;  %v3113_v32 = vadd.f32 %v3112_v24, %v3064_v37  ;;  %v3018_v41 = vadd.f32 %v3017_v12, %v5718_v5  ;;  %v4540_v1 = vunpack.c.l.bf16 %v4566_v30 }
 0x1ff   : > { %v3164_v48 = vpop.f32.mrf.mxu0 }
 0x200   : > { %v3281_v20 = vmax.f32 %v3265_v49, 0.0  ;;  %v3162_v42 = vadd.f32 %v3161_v34, %v3113_v32 }
 0x202   : > { %3297 = vst [vmem:[%s5777_s4 + $0x20] sm:$0xff] %v3281_v20  ;;  %v3198_v61 = vmul.f32 %v5765_v28, %v3162_v42 }
 0x203   : > { %v3066_v13 = vpop.f32.mrf.mxu2 }
 0x204   : > { %v3218_v58 = vadd.f32 %v5771_v39, %v3198_v61  ;;  %v3067_v45 = vadd.f32 %v3066_v13, %v3018_v41  ;;  %v4541_v61 = vunpack.c.h.bf16 %v4566_v30 }
 0x205   : > { %v3115_v0 = vpop.f32.mrf.mxu3  ;;  %v3019_v52 = vpop.f32.mrf.mxu1 }
 0x206   : > { %v3266_v17 = vadd.f32 %v4533_v44, %v3218_v58  ;;  %v3116_v31 = vadd.f32 %v3115_v0, %v3067_v45  ;;  %v3020_v59 = vadd.f32 %v3019_v52, %v5726_v57 }
 0x207   : > { %v3166_v9 = vpop.f32.mrf.mxu0 }
 0x208   : > { %v3282_v19 = vmax.f32 %v3266_v17, 0.0  ;;  %v3165_v6 = vadd.f32 %v3164_v48, %v3116_v31  ;;  %v4567_v17 = vld [vmem:[%s5179_s19 + $0x28] sm:$0xff]  }
 0x20a   : > { %3298 = vst [vmem:[%s5777_s4 + $0x28] sm:$0xff] %v3282_v19  ;;  %v3199_v50 = vmul.f32 %v5765_v28, %v3165_v6  ;;  %v4544_v6 = vunpack.c.l.bf16 %v4567_v17 }
 0x20b   : > { %v3068_v5 = vpop.f32.mrf.mxu2 }
 0x20c   : > { %v3219_v16 = vadd.f32 %v5771_v39, %v3199_v50  ;;  %v3069_v21 = vadd.f32 %v3068_v5, %v3020_v59 }
 0x20d   : > { %v3117_v38 = vpop.f32.mrf.mxu3  ;;  %v3022_v11 = vpop.f32.mrf.mxu1 }
 0x20e   : > { %v3267_v62 = vadd.f32 %v4536_v10, %v3219_v16  ;;  %v3118_v51 = vadd.f32 %v3117_v38, %v3069_v21  ;;  %v3023_v43 = vadd.f32 %v3022_v11, %v5738_v53 }
 0x20f   : > { %v3169_v55 = vpop.f32.mrf.mxu0 }
 0x210   : > { %v3283_v8 = vmax.f32 %v3267_v62, 0.0  ;;  %v3167_v60 = vadd.f32 %v3166_v9, %v3118_v51 }
 0x212   : > { %3299 = vst [vmem:[%s5777_s4 + $0x30] sm:$0xff] %v3283_v8  ;;  %v3200_v29 = vmul.f32 %v5765_v28, %v3167_v60  ;;  %v4545_v8 = vunpack.c.h.bf16 %v4567_v17 }
 0x213   : > { %v3071_v57 = vpop.f32.mrf.mxu2 }
 0x214   : > { %v3220_v27 = vadd.f32 %v5771_v39, %v3200_v29  ;;  %v3072_v15 = vadd.f32 %v3071_v57, %v3023_v43 }
 0x215   : > { %v3120_v56 = vpop.f32.mrf.mxu3  ;;  %v3024_v25 = vpop.f32.mrf.mxu1 }
 0x216   : > { %v3268_v26 = vadd.f32 %v4537_v23, %v3220_v27  ;;  %v3121_v33 = vadd.f32 %v3120_v56, %v3072_v15  ;;  %v3025_v22 = vadd.f32 %v3024_v25, %v5741_v36  ;;  %v4568_v56 = vld [vmem:[%s5179_s19 + $0x30] sm:$0xff]  }
 0x217   : > { %v3171_v34 = vpop.f32.mrf.mxu0 }
 0x218   : > { %v3284_v54 = vmax.f32 %v3268_v26, 0.0  ;;  %v3170_v40 = vadd.f32 %v3169_v55, %v3121_v33 }
 0x21a   : > { %3300 = vst [vmem:[%s5777_s4 + $0x38] sm:$0xff] %v3284_v54  ;;  %v3201_v47 = vmul.f32 %v5765_v28, %v3170_v40 }
 0x21b   : > { %v3073_v53 = vpop.f32.mrf.mxu2 }
 0x21c   : > { %v3221_v2 = vadd.f32 %v5771_v39, %v3201_v47  ;;  %v3074_v46 = vadd.f32 %v3073_v53, %v3025_v22 }
 0x21d   : > { %v3122_v37 = vpop.f32.mrf.mxu3  ;;  %v3027_v24 = vpop.f32.mrf.mxu1 }
 0x21e   : > { %v3269_v12 = vadd.f32 %v4540_v1, %v3221_v2  ;;  %v3123_v49 = vadd.f32 %v3122_v37, %v3074_v46  ;;  %v3028_v44 = vadd.f32 %v3027_v24, %v5744_v63 }
 0x21f   : > { %v3174_v32 = vpop.f32.mrf.mxu0 }
 0x220   : > { %v3285_v48 = vmax.f32 %v3269_v12, 0.0  ;;  %v3172_v20 = vadd.f32 %v3171_v34, %v3123_v49  ;;  %v4548_v34 = vunpack.c.l.bf16 %v4568_v56  ;;  %v4549_v12 = vunpack.c.h.bf16 %v4568_v56 }
 0x222   : > { %3301 = vst [vmem:[%s5777_s4 + $0x40] sm:$0xff] %v3285_v48  ;;  %v3202_v42 = vmul.f32 %v5765_v28, %v3172_v20 }
 0x223   : > { %v3076_v36 = vpop.f32.mrf.mxu2 }
 0x224   : > { %v3222_v41 = vadd.f32 %v5771_v39, %v3202_v42  ;;  %v3077_v13 = vadd.f32 %v3076_v36, %v3028_v44  ;;  %v4569_v36 = vld [vmem:[%s5179_s19 + $0x38] sm:$0xff]  }
 0x225   : > { %v3125_v58 = vpop.f32.mrf.mxu3  ;;  %v3029_v45 = vpop.f32.mrf.mxu1 }
 0x226   : > { %v3270_v0 = vadd.f32 %v4541_v61, %v3222_v41  ;;  %v3126_v52 = vadd.f32 %v3125_v58, %v3077_v13  ;;  %v3030_v50 = vadd.f32 %v3029_v45, %v5747_v35 }
 0x227   : > { %v3176_v31 = vpop.f32.mrf.mxu0 }
 0x228   : > { %v3286_v9 = vmax.f32 %v3270_v0, 0.0  ;;  %v3175_v4 = vadd.f32 %v3174_v32, %v3126_v52  ;;  %v4552_v0 = vunpack.c.l.bf16 %v4569_v36 }
 0x22a   : > { %3302 = vst [vmem:[%s5777_s4 + $0x48] sm:$0xff] %v3286_v9  ;;  %v3203_v19 = vmul.f32 %v5765_v28, %v3175_v4 }
 0x22b   : > { %v3078_v63 = vpop.f32.mrf.mxu2 }
 0x22c   : > { %v3223_v10 = vadd.f32 %v5771_v39, %v3203_v19  ;;  %v3079_v59 = vadd.f32 %v3078_v63, %v3030_v50 }
 0x22d   : > { %v3127_v5 = vpop.f32.mrf.mxu3  ;;  %v3032_v16 = vpop.f32.mrf.mxu1 }
 0x22e   : > { %v3271_v21 = vadd.f32 %v4544_v6, %v3223_v10  ;;  %v3128_v38 = vadd.f32 %v3127_v5, %v3079_v59  ;;  %v3033_v60 = vadd.f32 %v3032_v16, %v5750_v18  ;;  %v4553_v10 = vunpack.c.h.bf16 %v4569_v36 }
 0x22f   : > { %v3179_v51 = vpop.f32.mrf.mxu0 }
 0x230   : > { %v3287_v11 = vmax.f32 %v3271_v21, 0.0  ;;  %v3177_v62 = vadd.f32 %v3176_v31, %v3128_v38 }
 0x232   : > { %3303 = vst [vmem:[%s5777_s4 + $0x50] sm:$0xff] %v3287_v11  ;;  %v3204_v55 = vmul.f32 %v5765_v28, %v3177_v62 }
 0x233   : > { %v3081_v35 = vpop.f32.mrf.mxu2 }
 0x234   : > { %v3224_v29 = vadd.f32 %v5771_v39, %v3204_v55  ;;  %v3082_v23 = vadd.f32 %v3081_v35, %v3033_v60 }
 0x235   : > { %v3130_v43 = vpop.f32.mrf.mxu3  ;;  %v3034_v57 = vpop.f32.mrf.mxu1 }
 0x236   : > { %v3272_v27 = vadd.f32 %v4545_v8, %v3224_v29  ;;  %v3131_v15 = vadd.f32 %v3130_v43, %v3082_v23  ;;  %v3035_v30 = vadd.f32 %v3034_v57, %v5753_v3 }
 0x237   : > { %v3181_v54 = vpop.f32.mrf.mxu0 }
 0x238   : > { %v3288_v25 = vmax.f32 %v3272_v27, 0.0  ;;  %v3180_v26 = vadd.f32 %v3179_v51, %v3131_v15 }
 0x23a   : > { %3304 = vst [vmem:[%s5777_s4 + $0x58] sm:$0xff] %v3288_v25  ;;  %v3205_v33 = vmul.f32 %v5765_v28, %v3180_v26 }
 0x23b   : > { %v3083_v18 = vpop.f32.mrf.mxu2 }
 0x23c   : > { %v3225_v40 = vadd.f32 %v5771_v39, %v3205_v33  ;;  %v3084_v47 = vadd.f32 %v3083_v18, %v3035_v30 }
 0x23d   : > { %v3132_v1 = vpop.f32.mrf.mxu3  ;;  %v3037_v22 = vpop.f32.mrf.mxu1 }
 0x23e   : > { %v3273_v53 = vadd.f32 %v4548_v34, %v3225_v40  ;;  %v3133_v2 = vadd.f32 %v3132_v1, %v3084_v47  ;;  %v3038_v49 = vadd.f32 %v3037_v22, %v5756_v14 }
 0x23f   : > { %v3184_v42 = vpop.f32.mrf.mxu0 }
 0x240   : > { %v3289_v46 = vmax.f32 %v3273_v53, 0.0  ;;  %v3182_v37 = vadd.f32 %v3181_v54, %v3133_v2 }
 0x242   : > { %3305 = vst [vmem:[%s5777_s4 + $0x60] sm:$0xff] %v3289_v46  ;;  %v3206_v24 = vmul.f32 %v5765_v28, %v3182_v37 }
 0x243   : > { %v3086_v3 = vpop.f32.mrf.mxu2 }
 0x244   : > { %v3226_v32 = vadd.f32 %v5771_v39, %v3206_v24  ;;  %v3087_v48 = vadd.f32 %v3086_v3, %v3038_v49 }
 0x245   : > { %v3135_v20 = vpop.f32.mrf.mxu3  ;;  %v3039_v41 = vpop.f32.mrf.mxu1 }
 0x246   : > { %v3274_v61 = vadd.f32 %v4549_v12, %v3226_v32  ;;  %v3136_v44 = vadd.f32 %v3135_v20, %v3087_v48  ;;  %v3040_v14 = vadd.f32 %v3039_v41, %v5759_v7 }
 0x247   : > { %v3186_v6 = vpop.f32.mrf.mxu0 }
 0x248   : > { %v3290_v13 = vmax.f32 %v3274_v61, 0.0  ;;  %v3185_v58 = vadd.f32 %v3184_v42, %v3136_v44 }
 0x24a   : > { %3306 = vst [vmem:[%s5777_s4 + $0x68] sm:$0xff] %v3290_v13  ;;  %v3207_v45 = vmul.f32 %v5765_v28, %v3185_v58 }
 0x24b   : > { %v3088_v52 = vpop.f32.mrf.mxu2 }
 0x24c   : > { %v3227_v17 = vadd.f32 %v5771_v39, %v3207_v45  ;;  %v3089_v31 = vadd.f32 %v3088_v52, %v3040_v14 }
 0x24d   : > { %v3137_v9 = vpop.f32.mrf.mxu3 }
 0x24e   : > { %v3275_v4 = vadd.f32 %v4552_v0, %v3227_v17  ;;  %v3138_v19 = vadd.f32 %v3137_v9, %v3089_v31 }
 0x250   : > { %v3291_v50 = vmax.f32 %v3275_v4, 0.0  ;;  %v3187_v63 = vadd.f32 %v3186_v6, %v3138_v19 }
 0x252   : > { %3307 = vst [vmem:[%s5777_s4 + $0x70] sm:$0xff] %v3291_v50  ;;  %v3208_v7 = vmul.f32 %v5765_v28, %v3187_v63 }
 0x254   : > { %v3228_v59 = vadd.f32 %v5771_v39, %v3208_v7 }
 0x256   : > { %v3276_v5 = vadd.f32 %v4553_v10, %v3228_v59 }
 0x258   : > { %v3292_v16 = vmax.f32 %v3276_v5, 0.0 }
 0x25a   : > { %3308 = vst [vmem:[%s5777_s4 + $0x78] sm:$0xff] %v3292_v16 }
 0x25b   : > { %4835 = shalt.err (!%p4832_p7)
}
 0x25c   : > { %s4920_s6 = smov 128   ;;  %s4921_s18 = smov 8  }
 0x25d   : > { %4603 = dma.vmem_to_hbm [thread:$0]  (%p5939_p0), %s3323_s24, 2048, %s3325_s10, %s3310_s28, %s4920_s6, %s4920_s6, %s4921_s18  }
 0x25e PF: > { %s5940_s20 = sld [smem:[#allocation17_spill]]  ;;  %p4615_p4 = scmp.ge.s32.totalorder %s4910_s27, 2 }
 0x25f   : > { %s5941_s12 = sld [smem:[#allocation22_spill]] }
 0x264   : > { %s3339_s30 = sand.u32 1, %s5940_s20  }
 0x265   : > { %p5942_p11 = scmp.ne.s32.totalorder %s5941_s12, 0  ;;  %s3340_s13 = scalar_lea.sflag [#allocation5], %s3339_s30 }
 0x267   : > { %p4610_p1 = pnand %p4615_p4, %p5942_p11 }
 0x269   : > { %p4611_p5 = pneg %p4610_p1 }
 0x26b   : > { %4881 = dma.done.wait (%p4611_p5), %s3340_s13, 2048  }
 0x26c   : > { %4883 = vsyncadd (%p4611_p5), %s3340_s13, 4294965248  ;;  %s5943_s27 = sld [smem:[#allocation18_spill]]  ;;  %s5946_s21 = smov %s4890_s22 }
 0x26d   : > { %s5944_s14 = sld [smem:[#allocation20_spill]]  ;;  %s5947_s22 = smov %s4894_s23 }
 0x26e   : > { %s5945_s4 = sld [smem:[#allocation19_spill]]  ;;  %s5949_s24 = smov %s4902_s25 }
 0x26f   : > { %s5950_s25 = smov %s4906_s26 }
 0x272   : > { %p25_p8 = scmp.ge.s32.totalorder %s5943_s27, 6  }
 0x273   : > { %s5948_s23 = smov %s5944_s14 }
 0x274   : > { %s5951_s26 = smov %s5945_s4  ;;  %27 = sbr.rel (!%p25_p8) target bundleno = 17 (0x11), region = 119 }
 0x279   :  { %3346 = vsyncpa [#allocation4], 1 }
 0x27a   :  { %3348 = vsyncpa [#allocation4 + $0x1], 1 }
 0x27b   :  { %3349 = vsyncpa [#allocation7], 1 }
 0x27c   :  { %3351 = vsyncpa [#allocation7 + $0x1], 1 }
 0x27d   :  { %3352 = vsyncpa [#allocation10], 1 }
 0x27e   :  { %3354 = vsyncpa [#allocation10 + $0x1], 1 }
 0x27f   :  { %3355 = vsyncpa [#allocation5], 1 }
 0x280   :  { %3357 = vsyncpa [#allocation5 + $0x1], 1 }

</bundles_post_ra>
